<compile_context>
chip_gen: v7x
topology: tpu7x:2x2x1
jax: 0.10.0
libtpu: 0.0.40
codegen_flags: <defaults>
</compile_context>

<pallas_src>
import math
import jax
import jax.numpy as jnp
from jax.experimental import pallas as pl
from jax.experimental.pallas import tpu as pltpu

APPROX_RECIPROCAL = True  # softmax denom via EUP vrcp; set False for exact divide


def prod(lst):
    r = 1
    for v in lst:
        r *= v
    return r


def _round_up(v, m):
    return (v + m - 1) // m * m


# ----------------------------------------------------------------------------
# Kernel 1: generic  y = x @ w + b   (patch-embed conv & pool convs expressed
# as patchified matmuls), tiled over M with a parallel grid (>=2 tiles when
# possible so both v7x cores are used), ragged M padded instead of collapsing
# to a single block.
# ----------------------------------------------------------------------------
def _matmul_bias_kernel(x_ref, w_ref, b_ref, o_ref):
    acc = jnp.dot(x_ref[...], w_ref[...], preferred_element_type=jnp.float32)
    o_ref[...] = (acc + b_ref[...]).astype(o_ref.dtype)


def matmul_bias(x, w, b, tm_max=512, out_dtype=jnp.bfloat16):
    M, K = x.shape
    N = w.shape[1]
    if M <= 8:
        tm = M
        grid_m = 1
    else:
        # at least 8 rows per tile, at most tm_max, aim for >= 2 grid steps
        tm = min(tm_max, _round_up(pl.cdiv(M, 2), 8))
        grid_m = pl.cdiv(M, tm)
    m_pad = grid_m * tm
    if m_pad != M:
        x = jnp.pad(x, ((0, m_pad - M), (0, 0)))
    b2 = b.reshape(1, N).astype(jnp.float32)

    out = pl.pallas_call(
        _matmul_bias_kernel,
        out_shape=jax.ShapeDtypeStruct((m_pad, N), out_dtype),
        grid=(grid_m,),
        in_specs=[
            pl.BlockSpec((tm, K), lambda i: (i, 0)),
            pl.BlockSpec((K, N), lambda i: (0, 0)),
            pl.BlockSpec((1, N), lambda i: (0, 0)),
        ],
        out_specs=pl.BlockSpec((tm, N), lambda i: (i, 0)),
        compiler_params=pltpu.CompilerParams(dimension_semantics=("parallel",)),
    )(x, w, b2)
    return out[:M] if m_pad != M else out


# ----------------------------------------------------------------------------
# Kernel 2: one full transformer LEVEL.
#   grid = (batch, depth); per grid step the kernel applies layer `l` of the
#   level to one batch element's (S, D) token slab.
#   - x (+ pos embed) is loaded once per batch element (l == 0) into a f32
#     VMEM accumulator that stays resident across the depth axis.
#   - per-layer weights are stacked along a leading depth axis and streamed
#     (double-buffered) by the BlockSpec pipeline.
#   - output is written only on the last layer of each batch element.
#
#   Per layer (PyTorch TransformerBlock, eval mode):
#     x = x + MHA(LN1(x));  x = x + MLP(LN2(x))
# ----------------------------------------------------------------------------
PARAM_ORDER = ["ln1_w", "ln1_b", "wq", "bq", "wk", "bk", "wv", "bv",
               "wo", "bo", "ln2_w", "ln2_b", "w1", "b1", "w2", "b2"]

_SQRT_HALF = 0.7071067811865476


def make_level_kernel(S, D, num_heads, n_layers):
    Dh = D // num_heads
    scale = 1.0 / math.sqrt(Dh)

    def kernel(x_ref, pos_ref,
               ln1w_ref, ln1b_ref, wq_ref, bq_ref, wk_ref, bk_ref,
               wv_ref, bv_ref, wo_ref, bo_ref, ln2w_ref, ln2b_ref,
               w1_ref, b1_ref, w2_ref, b2_ref,
               o_ref, acc_ref):
        l = pl.program_id(1)

        # load x and fuse the positional-embedding add on the level's first layer
        @pl.when(l == 0)
        def _():
            acc_ref[...] = (x_ref[0].astype(jnp.float32)
                            + pos_ref[...].astype(jnp.float32))

        x = acc_ref[...]                                  # (S, D) f32 residual stream

        def layernorm(v, w, b):                           # stats in f32
            mu = jnp.mean(v, axis=-1, keepdims=True)
            var = jnp.mean((v - mu) ** 2, axis=-1, keepdims=True)
            return (v - mu) * jax.lax.rsqrt(var + 1e-5) * w + b

        # ---------------- multi-head self-attention ----------------
        xn = layernorm(x, ln1w_ref[0], ln1b_ref[0]).astype(jnp.bfloat16)
        q = (jnp.dot(xn, wq_ref[0], preferred_element_type=jnp.float32)
             + bq_ref[0]) * scale                         # pre-scaled q
        k = jnp.dot(xn, wk_ref[0], preferred_element_type=jnp.float32) + bk_ref[0]
        v = jnp.dot(xn, wv_ref[0], preferred_element_type=jnp.float32) + bv_ref[0]

        def split_heads(t):                               # (S, D) -> (H, S, Dh)
            return jnp.stack(
                [t[:, h * Dh:(h + 1) * Dh] for h in range(num_heads)], axis=0)

        qh = split_heads(q).astype(jnp.bfloat16)
        kh = split_heads(k).astype(jnp.bfloat16)
        vh = split_heads(v).astype(jnp.bfloat16)

        # all heads in one batched score / context matmul
        s = jnp.einsum('hqd,hkd->hqk', qh, kh,
                       preferred_element_type=jnp.float32)      # (H, S, S)
        m = jnp.max(s, axis=-1, keepdims=True)
        e = jnp.exp(s - m)
        denom = jnp.sum(e, axis=-1, keepdims=True)
        if APPROX_RECIPROCAL:
            p = e * pl.reciprocal(denom, approx=True)
        else:
            p = e / denom
        ctx = jnp.einsum('hqk,hkd->hqd', p.astype(jnp.bfloat16), vh,
                         preferred_element_type=jnp.float32)    # (H, S, Dh)

        # re-assemble (S, D) context and do a single K=D out-projection
        ctx_flat = jnp.concatenate(
            [ctx[h] for h in range(num_heads)], axis=-1).astype(jnp.bfloat16)
        attn = (jnp.dot(ctx_flat, wo_ref[0], preferred_element_type=jnp.float32)
                + bo_ref[0])
        x = x + attn

        # ---------------- MLP ----------------
        # TODO(synk): for large S / mlp_dim on v7x (64 MiB VMEM) tile the
        # attention with an online softmax over keys and the MLP over token
        # rows instead of materializing (H,S,S) and (S,mlp_dim) in one shot.
        xn2 = layernorm(x, ln2w_ref[0], ln2b_ref[0]).astype(jnp.bfloat16)
        h1 = (jnp.dot(xn2, w1_ref[0], preferred_element_type=jnp.float32)
              + b1_ref[0])
        # exact (erf) GELU, matching nn.GELU default
        h1 = 0.5 * h1 * (1.0 + jax.lax.erf(h1 * _SQRT_HALF))
        h2 = (jnp.dot(h1.astype(jnp.bfloat16), w2_ref[0],
                      preferred_element_type=jnp.float32) + b2_ref[0])
        x = x + h2

        acc_ref[...] = x

        @pl.when(l == n_layers - 1)
        def _():
            o_ref[0] = x.astype(o_ref.dtype)

    return kernel


def transformer_level(x, level_params, pos, num_heads):
    B, S, D = x.shape
    n_layers = level_params["wq"].shape[0]
    kernel = make_level_kernel(S, D, num_heads, n_layers)
    arrays = [level_params[name] for name in PARAM_ORDER]

    def stacked_spec(a):
        # every stacked parameter is 3-D: (depth, r, c) -> stream layer l
        return pl.BlockSpec((1,) + tuple(a.shape[1:]), lambda b, l: (l, 0, 0))

    in_specs = ([pl.BlockSpec((1, S, D), lambda b, l: (b, 0, 0)),
                 pl.BlockSpec((S, D), lambda b, l: (0, 0))]
                + [stacked_spec(a) for a in arrays])

    return pl.pallas_call(
        kernel,
        out_shape=jax.ShapeDtypeStruct((B, S, D), jnp.bfloat16),
        grid=(B, n_layers),
        in_specs=in_specs,
        out_specs=pl.BlockSpec((1, S, D), lambda b, l: (b, 0, 0)),
        scratch_shapes=[pltpu.VMEM((S, D), jnp.float32)],
        compiler_params=pltpu.CompilerParams(
            dimension_semantics=("parallel", "arbitrary")),
    )(x, pos, *arrays)


# ----------------------------------------------------------------------------
# Parameter initialization (deterministic, synthetic).  Matmul weights bf16,
# biases / LayerNorm params / positional tables f32.  Per-level transformer
# weights are stacked along a leading depth axis for the level kernel.
# ----------------------------------------------------------------------------
def init_params(key, cfg):
    D = cfg["hidden_dim"]
    Mm = cfg["mlp_dim"]
    P = cfg["patch_size"]
    C = cfg["in_channels"]
    num_patches = (cfg["img_size"] // P) ** 2
    depth = cfg["num_layers"] // cfg["num_levels"]
    assert depth >= 1, "need at least one transformer layer per level"

    keys = iter(jax.random.split(key, 1024))

    def nrm(shape, std=0.02):
        return std * jax.random.normal(next(keys), shape, jnp.float32)

    params = {}

    # patch embed conv (out, in, kh, kw) -> flattened matmul weight (C*P*P, D)
    patch_w = nrm((D, C, P, P))
    params["patch_w"] = patch_w.reshape(D, C * P * P).T.astype(jnp.bfloat16)
    params["patch_b"] = jnp.zeros((D,), jnp.float32)

    # positional embedding tables (per level)
    params["pos_embeds"] = []
    for i in range(cfg["num_levels"]):
        n = num_patches // (prod(cfg["pool_ratios"][:i]) if i > 0 else 1)
        params["pos_embeds"].append(nrm((n, D)))

    # transformer levels: weights stacked along depth
    params["levels"] = []
    for _lvl in range(cfg["num_levels"]):
        layers = []
        for _ in range(depth):
            layers.append(dict(
                ln1_w=jnp.ones((1, D), jnp.float32),
                ln1_b=jnp.zeros((1, D), jnp.float32),
                wq=nrm((D, D)).T.astype(jnp.bfloat16),
                bq=jnp.zeros((1, D), jnp.float32),
                wk=nrm((D, D)).T.astype(jnp.bfloat16),
                bk=jnp.zeros((1, D), jnp.float32),
                wv=nrm((D, D)).T.astype(jnp.bfloat16),
                bv=jnp.zeros((1, D), jnp.float32),
                wo=nrm((D, D)).T.astype(jnp.bfloat16),
                bo=jnp.zeros((1, D), jnp.float32),
                ln2_w=jnp.ones((1, D), jnp.float32),
                ln2_b=jnp.zeros((1, D), jnp.float32),
                w1=nrm((Mm, D)).T.astype(jnp.bfloat16),    # (D, M)
                b1=jnp.zeros((1, Mm), jnp.float32),
                w2=nrm((D, Mm)).T.astype(jnp.bfloat16),    # (M, D)
                b2=jnp.zeros((1, D), jnp.float32),
            ))
        stacked = {k: jnp.stack([lay[k] for lay in layers], axis=0)
                   for k in layers[0]}
        params["levels"].append(stacked)

    # pooling convs (kernel == stride == pool_ratio)
    params["pools"] = []
    for i in range(cfg["num_levels"] - 1):
        r = cfg["pool_ratios"][i]
        w = nrm((D, D, r, r)).reshape(D, D * r * r).T.astype(jnp.bfloat16)
        params["pools"].append(dict(w=w, b=jnp.zeros((D,), jnp.float32)))

    return params


# ----------------------------------------------------------------------------
# Forward pass (mirrors HierarchicalViT.forward, including its
# H // prod(pool_ratios[:level]) rearrange indexing).
# ----------------------------------------------------------------------------
def hierarchical_vit_forward(x_img, params, cfg, return_features=False):
    B, C, Himg, Wimg = x_img.shape
    P = cfg["patch_size"]
    D = cfg["hidden_dim"]

    # patch_embed: Conv2d(C, D, P, stride=P) == patchify + matmul
    H = Himg // P
    W = Wimg // P
    xp = (x_img.reshape(B, C, H, P, W, P)
          .transpose(0, 2, 4, 1, 3, 5)                 # (B, H, W, C, P, P)
          .reshape(B * H * W, C * P * P)
          .astype(jnp.bfloat16))
    x = matmul_bias(xp, params["patch_w"], params["patch_b"]).reshape(B, H * W, D)

    features = []
    for level in range(cfg["num_levels"]):
        S = x.shape[1]
        pos_table = params["pos_embeds"][level]
        assert pos_table.shape[0] >= S, "pos-embedding table shorter than seq"
        pos = pos_table[:S]
        # whole level (all layers + fused positional add) in one pallas_call
        x = transformer_level(x, params["levels"][level], pos, cfg["num_heads"])
        features.append(x)

        if level < cfg["num_levels"] - 1:
            r = cfg["pool_ratios"][level]
            # replicate original rearrange: h = H // prod(pool_ratios[:level])
            hh = H // prod(cfg["pool_ratios"][:level])
            ww = x.shape[1] // hh
            xs = x.reshape(B, hh, ww, D)
            hh2, ww2 = hh // r, ww // r
            xs = xs[:, : hh2 * r, : ww2 * r, :]
            # TODO(synk): fold this r x r window gather into the pooling
            # matmul's input BlockSpec index_map to remove one HBM round trip
            # of the feature map per level.
            xs = (xs.reshape(B, hh2, r, ww2, r, D)
                  .transpose(0, 1, 3, 5, 2, 4)          # (B, hh2, ww2, D, r, r)
                  .reshape(B * hh2 * ww2, D * r * r))
            x = matmul_bias(xs, params["pools"][level]["w"],
                            params["pools"][level]["b"]).reshape(B, hh2 * ww2, D)
            H, W = H // r, W // r

    if return_features:
        return x, features
    return x, None


# ----------------------------------------------------------------------------
if __name__ == "__main__":
    cfg = dict(
        img_size=32,
        patch_size=4,
        in_channels=3,
        num_layers=6,        # 2 transformer layers per level (exercises depth axis)
        num_heads=4,
        hidden_dim=32,
        mlp_dim=64,
        num_levels=3,
        pool_ratios=[2, 2, 2],
    )

    key = jax.random.PRNGKey(0)
    kx, kp = jax.random.split(key)
    x = jax.random.normal(
        kx, (2, cfg["in_channels"], cfg["img_size"], cfg["img_size"]), jnp.float32)
    params = init_params(kp, cfg)

    fwd = jax.jit(lambda xi, p: hierarchical_vit_forward(
        xi, p, cfg, return_features=True))
    out, feats = fwd(x, params)

    jax.block_until_ready(out)
    for f in feats:
        jax.block_until_ready(f)

    assert out.shape == (2, 4, cfg["hidden_dim"]), out.shape
    print("KERNEL_OK")
</pallas_src>

<mosaic_0001>
module attributes {stable_mosaic.version = 11 : i64} {
  func.func @_matmul_bias_kernel(%arg0: i32, %arg1: memref<64x48xbf16, #tpu.memory_space<vmem>>, %arg2: memref<48x32xbf16, #tpu.memory_space<vmem>>, %arg3: memref<1x32xf32, #tpu.memory_space<vmem>>, %arg4: memref<64x32xbf16, #tpu.memory_space<vmem>>) attributes {dimension_semantics = [#tpu.dimension_semantics<parallel>], iteration_bounds = array<i64: 2>, scalar_prefetch = 0 : i64, scratch_operands = 0 : i64, tpu.core_type = #tpu.core_type<tc>, window_params = [{transform_indices = @transform_0, window_bounds = array<i64: 64, 48>}, {pipeline_mode = #tpu.pipeline_mode<synchronous>, transform_indices = @transform_1, window_bounds = array<i64: 48, 32>}, {pipeline_mode = #tpu.pipeline_mode<synchronous>, transform_indices = @transform_2, window_bounds = array<i64: 1, 32>}, {transform_indices = @transform_3, window_bounds = array<i64: 64, 32>}]} {
    %c0 = arith.constant 0 : index
    %c0_0 = arith.constant 0 : index
    %0 = vector.load %arg1[%c0, %c0_0] : memref<64x48xbf16, #tpu.memory_space<vmem>>, vector<64x48xbf16>
    %c0_1 = arith.constant 0 : index
    %c0_2 = arith.constant 0 : index
    %1 = vector.load %arg2[%c0_1, %c0_2] : memref<48x32xbf16, #tpu.memory_space<vmem>>, vector<48x32xbf16>
    %cst = arith.constant dense<0.000000e+00> : vector<64x32xf32>
    %2 = tpu.matmul %0, %1, %cst {dimension_numbers = #tpu.dot_dimension_numbers<[1], [0], [0], [1], [0, 0, 1, 1], [], []>} : vector<64x48xbf16>, vector<48x32xbf16>, vector<64x32xf32> -> vector<64x32xf32>
    %c0_3 = arith.constant 0 : index
    %c0_4 = arith.constant 0 : index
    %3 = vector.load %arg3[%c0_3, %c0_4] : memref<1x32xf32, #tpu.memory_space<vmem>>, vector<1x32xf32>
    %4 = vector.broadcast %3 : vector<1x32xf32> to vector<64x32xf32>
    %5 = arith.addf %2, %4 : vector<64x32xf32>
    %6 = arith.truncf %5 : vector<64x32xf32> to vector<64x32xbf16>
    %c0_5 = arith.constant 0 : index
    %c0_6 = arith.constant 0 : index
    %7 = vector.load %arg4[%c0_5, %c0_6] : memref<64x32xbf16, #tpu.memory_space<vmem>>, vector<64x32xbf16>
    tpu.vector_store %arg4[%c0_5, %c0_6], %6 {strides = array<i32>} : memref<64x32xbf16, #tpu.memory_space<vmem>>, vector<64x32xbf16>,
    return
  }
  func.func @transform_0(%arg0: i32) -> (i32, i32) {
    %c0_i32 = arith.constant 0 : i32
    %c0_i32_0 = arith.constant 0 : i32
    return %arg0, %c0_i32 : i32, i32
  }
  func.func @transform_1(%arg0: i32) -> (i32, i32) {
    %c0_i32 = arith.constant 0 : i32
    %c0_i32_0 = arith.constant 0 : i32
    %c0_i32_1 = arith.constant 0 : i32
    return %c0_i32, %c0_i32_0 : i32, i32
  }
  func.func @transform_2(%arg0: i32) -> (i32, i32) {
    %c0_i32 = arith.constant 0 : i32
    %c0_i32_0 = arith.constant 0 : i32
    %c0_i32_1 = arith.constant 0 : i32
    return %c0_i32, %c0_i32_0 : i32, i32
  }
  func.func @transform_3(%arg0: i32) -> (i32, i32) {
    %c0_i32 = arith.constant 0 : i32
    %c0_i32_0 = arith.constant 0 : i32
    return %arg0, %c0_i32 : i32, i32
  }
}

module attributes {stable_mosaic.version = 11 : i64} {
  func.func @kernel(%arg0: i32, %arg1: i32, %arg2: memref<1x64x32xbf16, #tpu.memory_space<vmem>>, %arg3: memref<64x32xf32, #tpu.memory_space<vmem>>, %arg4: memref<1x1x32xf32, #tpu.memory_space<vmem>>, %arg5: memref<1x1x32xf32, #tpu.memory_space<vmem>>, %arg6: memref<1x32x32xbf16, #tpu.memory_space<vmem>>, %arg7: memref<1x1x32xf32, #tpu.memory_space<vmem>>, %arg8: memref<1x32x32xbf16, #tpu.memory_space<vmem>>, %arg9: memref<1x1x32xf32, #tpu.memory_space<vmem>>, %arg10: memref<1x32x32xbf16, #tpu.memory_space<vmem>>, %arg11: memref<1x1x32xf32, #tpu.memory_space<vmem>>, %arg12: memref<1x32x32xbf16, #tpu.memory_space<vmem>>, %arg13: memref<1x1x32xf32, #tpu.memory_space<vmem>>, %arg14: memref<1x1x32xf32, #tpu.memory_space<vmem>>, %arg15: memref<1x1x32xf32, #tpu.memory_space<vmem>>, %arg16: memref<1x32x64xbf16, #tpu.memory_space<vmem>>, %arg17: memref<1x1x64xf32, #tpu.memory_space<vmem>>, %arg18: memref<1x64x32xbf16, #tpu.memory_space<vmem>>, %arg19: memref<1x1x32xf32, #tpu.memory_space<vmem>>, %arg20: memref<1x64x32xbf16, #tpu.memory_space<vmem>>, %arg21: memref<64x32xf32, #tpu.memory_space<vmem>>) attributes {dimension_semantics = [#tpu.dimension_semantics<parallel>, #tpu.dimension_semantics<arbitrary>], iteration_bounds = array<i64: 2, 2>, scalar_prefetch = 0 : i64, scratch_operands = 1 : i64, tpu.core_type = #tpu.core_type<tc>, window_params = [{transform_indices = @transform_0, window_bounds = array<i64: 1, 64, 32>}, {pipeline_mode = #tpu.pipeline_mode<synchronous>, transform_indices = @transform_1, window_bounds = array<i64: 64, 32>}, {transform_indices = @transform_2, window_bounds = array<i64: 1, 1, 32>}, {transform_indices = @transform_3, window_bounds = array<i64: 1, 1, 32>}, {transform_indices = @transform_4, window_bounds = array<i64: 1, 32, 32>}, {transform_indices = @transform_5, window_bounds = array<i64: 1, 1, 32>}, {transform_indices = @transform_6, window_bounds = array<i64: 1, 32, 32>}, {transform_indices = @transform_7, window_bounds = array<i64: 1, 1, 32>}, {transform_indices = @transform_8, window_bounds = array<i64: 1, 32, 32>}, {transform_indices = @transform_9, window_bounds = array<i64: 1, 1, 32>}, {transform_indices = @transform_10, window_bounds = array<i64: 1, 32, 32>}, {transform_indices = @transform_11, window_bounds = array<i64: 1, 1, 32>}, {transform_indices = @transform_12, window_bounds = array<i64: 1, 1, 32>}, {transform_indices = @transform_13, window_bounds = array<i64: 1, 1, 32>}, {transform_indices = @transform_14, window_bounds = array<i64: 1, 32, 64>}, {transform_indices = @transform_15, window_bounds = array<i64: 1, 1, 64>}, {transform_indices = @transform_16, window_bounds = array<i64: 1, 64, 32>}, {transform_indices = @transform_17, window_bounds = array<i64: 1, 1, 32>}, {transform_indices = @transform_18, window_bounds = array<i64: 1, 64, 32>}]} {
    %c0_i32 = arith.constant 0 : i32
    %0 = arith.cmpi eq, %arg1, %c0_i32 : i32
    %1 = arith.extui %0 : i1 to i32
    %c0_i32_0 = arith.constant 0 : i32
    %2 = arith.cmpi ne, %1, %c0_i32_0 : i32
    scf.if %2 {
      %c0_76 = arith.constant 0 : index
      %c0_77 = arith.constant 0 : index
      %c0_78 = arith.constant 0 : index
      %170 = vector.load %arg2[%c0_76, %c0_77, %c0_78] : memref<1x64x32xbf16, #tpu.memory_space<vmem>>, vector<1x64x32xbf16>
      %171 = vector.shape_cast %170 : vector<1x64x32xbf16> to vector<64x32xbf16>
      %172 = arith.extf %171 : vector<64x32xbf16> to vector<64x32xf32>
      %c0_79 = arith.constant 0 : index
      %c0_80 = arith.constant 0 : index
      %173 = vector.load %arg3[%c0_79, %c0_80] : memref<64x32xf32, #tpu.memory_space<vmem>>, vector<64x32xf32>
      %174 = arith.addf %172, %173 : vector<64x32xf32>
      %c0_81 = arith.constant 0 : index
      %c0_82 = arith.constant 0 : index
      %175 = vector.load %arg21[%c0_81, %c0_82] : memref<64x32xf32, #tpu.memory_space<vmem>>, vector<64x32xf32>
      tpu.vector_store %arg21[%c0_81, %c0_82], %174 {strides = array<i32>} : memref<64x32xf32, #tpu.memory_space<vmem>>, vector<64x32xf32>,
    } else {
    }
    %c0 = arith.constant 0 : index
    %c0_1 = arith.constant 0 : index
    %3 = vector.load %arg21[%c0, %c0_1] : memref<64x32xf32, #tpu.memory_space<vmem>>, vector<64x32xf32>
    %c0_2 = arith.constant 0 : index
    %c0_3 = arith.constant 0 : index
    %c0_4 = arith.constant 0 : index
    %4 = vector.load %arg4[%c0_2, %c0_3, %c0_4] : memref<1x1x32xf32, #tpu.memory_space<vmem>>, vector<1x1x32xf32>
    %5 = vector.shape_cast %4 : vector<1x1x32xf32> to vector<1x32xf32>
    %c0_5 = arith.constant 0 : index
    %c0_6 = arith.constant 0 : index
    %c0_7 = arith.constant 0 : index
    %6 = vector.load %arg5[%c0_5, %c0_6, %c0_7] : memref<1x1x32xf32, #tpu.memory_space<vmem>>, vector<1x1x32xf32>
    %7 = vector.shape_cast %6 : vector<1x1x32xf32> to vector<1x32xf32>
    %cst = arith.constant dense<0.000000e+00> : vector<64xf32>
    %8 = vector.multi_reduction <add>, %3, %cst [1] : vector<64x32xf32> to vector<64xf32>
    %9 = vector.shape_cast %8 : vector<64xf32> to vector<64x1xf32>
    %cst_8 = arith.constant 3.200000e+01 : f32
    %10 = vector.broadcast %cst_8 : f32 to vector<64x1xf32>
    %11 = arith.divf %9, %10 : vector<64x1xf32>
    %12 = vector.broadcast %11 : vector<64x1xf32> to vector<64x32xf32>
    %13 = arith.subf %3, %12 : vector<64x32xf32>
    %14 = arith.mulf %13, %13 : vector<64x32xf32>
    %cst_9 = arith.constant dense<0.000000e+00> : vector<64xf32>
    %15 = vector.multi_reduction <add>, %14, %cst_9 [1] : vector<64x32xf32> to vector<64xf32>
    %16 = vector.shape_cast %15 : vector<64xf32> to vector<64x1xf32>
    %cst_10 = arith.constant 3.200000e+01 : f32
    %17 = vector.broadcast %cst_10 : f32 to vector<64x1xf32>
    %18 = arith.divf %16, %17 : vector<64x1xf32>
    %19 = vector.broadcast %11 : vector<64x1xf32> to vector<64x32xf32>
    %20 = arith.subf %3, %19 : vector<64x32xf32>
    %cst_11 = arith.constant 9.99999974E-6 : f32
    %21 = vector.broadcast %cst_11 : f32 to vector<64x1xf32>
    %22 = arith.addf %18, %21 : vector<64x1xf32>
    %23 = math.rsqrt %22 : vector<64x1xf32>
    %24 = vector.broadcast %23 : vector<64x1xf32> to vector<64x32xf32>
    %25 = arith.mulf %20, %24 : vector<64x32xf32>
    %26 = vector.broadcast %5 : vector<1x32xf32> to vector<64x32xf32>
    %27 = arith.mulf %25, %26 : vector<64x32xf32>
    %28 = vector.broadcast %7 : vector<1x32xf32> to vector<64x32xf32>
    %29 = arith.addf %27, %28 : vector<64x32xf32>
    %30 = arith.truncf %29 : vector<64x32xf32> to vector<64x32xbf16>
    %c0_12 = arith.constant 0 : index
    %c0_13 = arith.constant 0 : index
    %c0_14 = arith.constant 0 : index
    %31 = vector.load %arg6[%c0_12, %c0_13, %c0_14] : memref<1x32x32xbf16, #tpu.memory_space<vmem>>, vector<1x32x32xbf16>
    %32 = vector.shape_cast %31 : vector<1x32x32xbf16> to vector<32x32xbf16>
    %cst_15 = arith.constant dense<0.000000e+00> : vector<64x32xf32>
    %33 = tpu.matmul %30, %32, %cst_15 {dimension_numbers = #tpu.dot_dimension_numbers<[1], [0], [0], [1], [0, 0, 1, 1], [], []>} : vector<64x32xbf16>, vector<32x32xbf16>, vector<64x32xf32> -> vector<64x32xf32>
    %c0_16 = arith.constant 0 : index
    %c0_17 = arith.constant 0 : index
    %c0_18 = arith.constant 0 : index
    %34 = vector.load %arg7[%c0_16, %c0_17, %c0_18] : memref<1x1x32xf32, #tpu.memory_space<vmem>>, vector<1x1x32xf32>
    %35 = vector.shape_cast %34 : vector<1x1x32xf32> to vector<1x32xf32>
    %36 = vector.broadcast %35 : vector<1x32xf32> to vector<64x32xf32>
    %37 = arith.addf %33, %36 : vector<64x32xf32>
    %cst_19 = arith.constant 0.353553385 : f32
    %38 = vector.broadcast %cst_19 : f32 to vector<64x32xf32>
    %39 = arith.mulf %37, %38 : vector<64x32xf32>
    %c0_20 = arith.constant 0 : index
    %c0_21 = arith.constant 0 : index
    %c0_22 = arith.constant 0 : index
    %40 = vector.load %arg8[%c0_20, %c0_21, %c0_22] : memref<1x32x32xbf16, #tpu.memory_space<vmem>>, vector<1x32x32xbf16>
    %41 = vector.shape_cast %40 : vector<1x32x32xbf16> to vector<32x32xbf16>
    %cst_23 = arith.constant dense<0.000000e+00> : vector<64x32xf32>
    %42 = tpu.matmul %30, %41, %cst_23 {dimension_numbers = #tpu.dot_dimension_numbers<[1], [0], [0], [1], [0, 0, 1, 1], [], []>} : vector<64x32xbf16>, vector<32x32xbf16>, vector<64x32xf32> -> vector<64x32xf32>
    %c0_24 = arith.constant 0 : index
    %c0_25 = arith.constant 0 : index
    %c0_26 = arith.constant 0 : index
    %43 = vector.load %arg9[%c0_24, %c0_25, %c0_26] : memref<1x1x32xf32, #tpu.memory_space<vmem>>, vector<1x1x32xf32>
    %44 = vector.shape_cast %43 : vector<1x1x32xf32> to vector<1x32xf32>
    %45 = vector.broadcast %44 : vector<1x32xf32> to vector<64x32xf32>
    %46 = arith.addf %42, %45 : vector<64x32xf32>
    %c0_27 = arith.constant 0 : index
    %c0_28 = arith.constant 0 : index
    %c0_29 = arith.constant 0 : index
    %47 = vector.load %arg10[%c0_27, %c0_28, %c0_29] : memref<1x32x32xbf16, #tpu.memory_space<vmem>>, vector<1x32x32xbf16>
    %48 = vector.shape_cast %47 : vector<1x32x32xbf16> to vector<32x32xbf16>
    %cst_30 = arith.constant dense<0.000000e+00> : vector<64x32xf32>
    %49 = tpu.matmul %30, %48, %cst_30 {dimension_numbers = #tpu.dot_dimension_numbers<[1], [0], [0], [1], [0, 0, 1, 1], [], []>} : vector<64x32xbf16>, vector<32x32xbf16>, vector<64x32xf32> -> vector<64x32xf32>
    %c0_31 = arith.constant 0 : index
    %c0_32 = arith.constant 0 : index
    %c0_33 = arith.constant 0 : index
    %50 = vector.load %arg11[%c0_31, %c0_32, %c0_33] : memref<1x1x32xf32, #tpu.memory_space<vmem>>, vector<1x1x32xf32>
    %51 = vector.shape_cast %50 : vector<1x1x32xf32> to vector<1x32xf32>
    %52 = vector.broadcast %51 : vector<1x32xf32> to vector<64x32xf32>
    %53 = arith.addf %49, %52 : vector<64x32xf32>
    %54 = vector.extract_strided_slice %39 {offsets = [0, 0], sizes = [64, 8], strides = [1, 1]} : vector<64x32xf32> to vector<64x8xf32>
    %55 = vector.extract_strided_slice %39 {offsets = [0, 8], sizes = [64, 8], strides = [1, 1]} : vector<64x32xf32> to vector<64x8xf32>
    %56 = vector.extract_strided_slice %39 {offsets = [0, 16], sizes = [64, 8], strides = [1, 1]} : vector<64x32xf32> to vector<64x8xf32>
    %57 = vector.extract_strided_slice %39 {offsets = [0, 24], sizes = [64, 8], strides = [1, 1]} : vector<64x32xf32> to vector<64x8xf32>
    %58 = vector.shape_cast %54 : vector<64x8xf32> to vector<1x64x8xf32>
    %59 = vector.shape_cast %55 : vector<64x8xf32> to vector<1x64x8xf32>
    %60 = vector.shape_cast %56 : vector<64x8xf32> to vector<1x64x8xf32>
    %61 = vector.shape_cast %57 : vector<64x8xf32> to vector<1x64x8xf32>
    %62 = tpu.concatenate %58, %59, %60, %61 in 0 : vector<1x64x8xf32>, vector<1x64x8xf32>, vector<1x64x8xf32>, vector<1x64x8xf32> -> vector<4x64x8xf32>
    %63 = arith.truncf %62 : vector<4x64x8xf32> to vector<4x64x8xbf16>
    %64 = vector.extract_strided_slice %46 {offsets = [0, 0], sizes = [64, 8], strides = [1, 1]} : vector<64x32xf32> to vector<64x8xf32>
    %65 = vector.extract_strided_slice %46 {offsets = [0, 8], sizes = [64, 8], strides = [1, 1]} : vector<64x32xf32> to vector<64x8xf32>
    %66 = vector.extract_strided_slice %46 {offsets = [0, 16], sizes = [64, 8], strides = [1, 1]} : vector<64x32xf32> to vector<64x8xf32>
    %67 = vector.extract_strided_slice %46 {offsets = [0, 24], sizes = [64, 8], strides = [1, 1]} : vector<64x32xf32> to vector<64x8xf32>
    %68 = vector.shape_cast %64 : vector<64x8xf32> to vector<1x64x8xf32>
    %69 = vector.shape_cast %65 : vector<64x8xf32> to vector<1x64x8xf32>
    %70 = vector.shape_cast %66 : vector<64x8xf32> to vector<1x64x8xf32>
    %71 = vector.shape_cast %67 : vector<64x8xf32> to vector<1x64x8xf32>
    %72 = tpu.concatenate %68, %69, %70, %71 in 0 : vector<1x64x8xf32>, vector<1x64x8xf32>, vector<1x64x8xf32>, vector<1x64x8xf32> -> vector<4x64x8xf32>
    %73 = arith.truncf %72 : vector<4x64x8xf32> to vector<4x64x8xbf16>
    %74 = vector.extract_strided_slice %53 {offsets = [0, 0], sizes = [64, 8], strides = [1, 1]} : vector<64x32xf32> to vector<64x8xf32>
    %75 = vector.extract_strided_slice %53 {offsets = [0, 8], sizes = [64, 8], strides = [1, 1]} : vector<64x32xf32> to vector<64x8xf32>
    %76 = vector.extract_strided_slice %53 {offsets = [0, 16], sizes = [64, 8], strides = [1, 1]} : vector<64x32xf32> to vector<64x8xf32>
    %77 = vector.extract_strided_slice %53 {offsets = [0, 24], sizes = [64, 8], strides = [1, 1]} : vector<64x32xf32> to vector<64x8xf32>
    %78 = vector.shape_cast %74 : vector<64x8xf32> to vector<1x64x8xf32>
    %79 = vector.shape_cast %75 : vector<64x8xf32> to vector<1x64x8xf32>
    %80 = vector.shape_cast %76 : vector<64x8xf32> to vector<1x64x8xf32>
    %81 = vector.shape_cast %77 : vector<64x8xf32> to vector<1x64x8xf32>
    %82 = tpu.concatenate %78, %79, %80, %81 in 0 : vector<1x64x8xf32>, vector<1x64x8xf32>, vector<1x64x8xf32>, vector<1x64x8xf32> -> vector<4x64x8xf32>
    %83 = arith.truncf %82 : vector<4x64x8xf32> to vector<4x64x8xbf16>
    "tpu.trace_start"() <{level = 10 : i32, message = "hqd,hkd->hqk"}> : () -> ()
    %cst_34 = arith.constant dense<0.000000e+00> : vector<4x64x64xf32>
    %84 = tpu.matmul %63, %73, %cst_34 {dimension_numbers = #tpu.dot_dimension_numbers<[2], [2], [1], [1], [0, 0, 0, 1, 1, 1], [0], [0]>} : vector<4x64x8xbf16>, vector<4x64x8xbf16>, vector<4x64x64xf32> -> vector<4x64x64xf32>
    "tpu.trace_stop"() : () -> ()
    %cst_35 = arith.constant dense<0xFF800000> : vector<4x64xf32>
    %85 = vector.multi_reduction <maximumf>, %84, %cst_35 [2] : vector<4x64x64xf32> to vector<4x64xf32>
    %86 = vector.shape_cast %85 : vector<4x64xf32> to vector<4x64x1xf32>
    %87 = vector.broadcast %86 : vector<4x64x1xf32> to vector<4x64x64xf32>
    %88 = arith.subf %84, %87 : vector<4x64x64xf32>
    %89 = math.exp %88 : vector<4x64x64xf32>
    %cst_36 = arith.constant dense<0.000000e+00> : vector<4x64xf32>
    %90 = vector.multi_reduction <add>, %89, %cst_36 [2] : vector<4x64x64xf32> to vector<4x64xf32>
    %91 = vector.shape_cast %90 : vector<4x64xf32> to vector<4x64x1xf32>
    %92 = tpu.reciprocal %91 {approx = true} : vector<4x64x1xf32> -> vector<4x64x1xf32>
    %93 = vector.broadcast %92 : vector<4x64x1xf32> to vector<4x64x64xf32>
    %94 = arith.mulf %89, %93 : vector<4x64x64xf32>
    %95 = arith.truncf %94 : vector<4x64x64xf32> to vector<4x64x64xbf16>
    "tpu.trace_start"() <{level = 10 : i32, message = "hqk,hkd->hqd"}> : () -> ()
    %cst_37 = arith.constant dense<0.000000e+00> : vector<4x64x8xf32>
    %96 = tpu.matmul %95, %83, %cst_37 {dimension_numbers = #tpu.dot_dimension_numbers<[2], [1], [1], [2], [0, 0, 0, 1, 1, 2], [0], [0]>} : vector<4x64x64xbf16>, vector<4x64x8xbf16>, vector<4x64x8xf32> -> vector<4x64x8xf32>
    "tpu.trace_stop"() : () -> ()
    %97 = vector.extract_strided_slice %96 {offsets = [0, 0, 0], sizes = [1, 64, 8], strides = [1, 1, 1]} : vector<4x64x8xf32> to vector<1x64x8xf32>
    %98 = vector.shape_cast %97 : vector<1x64x8xf32> to vector<64x8xf32>
    %99 = vector.extract_strided_slice %96 {offsets = [1, 0, 0], sizes = [1, 64, 8], strides = [1, 1, 1]} : vector<4x64x8xf32> to vector<1x64x8xf32>
    %100 = vector.shape_cast %99 : vector<1x64x8xf32> to vector<64x8xf32>
    %101 = vector.extract_strided_slice %96 {offsets = [2, 0, 0], sizes = [1, 64, 8], strides = [1, 1, 1]} : vector<4x64x8xf32> to vector<1x64x8xf32>
    %102 = vector.shape_cast %101 : vector<1x64x8xf32> to vector<64x8xf32>
    %103 = vector.extract_strided_slice %96 {offsets = [3, 0, 0], sizes = [1, 64, 8], strides = [1, 1, 1]} : vector<4x64x8xf32> to vector<1x64x8xf32>
    %104 = vector.shape_cast %103 : vector<1x64x8xf32> to vector<64x8xf32>
    %105 = tpu.concatenate %98, %100, %102, %104 in 1 : vector<64x8xf32>, vector<64x8xf32>, vector<64x8xf32>, vector<64x8xf32> -> vector<64x32xf32>
    %106 = arith.truncf %105 : vector<64x32xf32> to vector<64x32xbf16>
    %c0_38 = arith.constant 0 : index
    %c0_39 = arith.constant 0 : index
    %c0_40 = arith.constant 0 : index
    %107 = vector.load %arg12[%c0_38, %c0_39, %c0_40] : memref<1x32x32xbf16, #tpu.memory_space<vmem>>, vector<1x32x32xbf16>
    %108 = vector.shape_cast %107 : vector<1x32x32xbf16> to vector<32x32xbf16>
    %cst_41 = arith.constant dense<0.000000e+00> : vector<64x32xf32>
    %109 = tpu.matmul %106, %108, %cst_41 {dimension_numbers = #tpu.dot_dimension_numbers<[1], [0], [0], [1], [0, 0, 1, 1], [], []>} : vector<64x32xbf16>, vector<32x32xbf16>, vector<64x32xf32> -> vector<64x32xf32>
    %c0_42 = arith.constant 0 : index
    %c0_43 = arith.constant 0 : index
    %c0_44 = arith.constant 0 : index
    %110 = vector.load %arg13[%c0_42, %c0_43, %c0_44] : memref<1x1x32xf32, #tpu.memory_space<vmem>>, vector<1x1x32xf32>
    %111 = vector.shape_cast %110 : vector<1x1x32xf32> to vector<1x32xf32>
    %112 = vector.broadcast %111 : vector<1x32xf32> to vector<64x32xf32>
    %113 = arith.addf %109, %112 : vector<64x32xf32>
    %114 = arith.addf %3, %113 : vector<64x32xf32>
    %c0_45 = arith.constant 0 : index
    %c0_46 = arith.constant 0 : index
    %c0_47 = arith.constant 0 : index
    %115 = vector.load %arg14[%c0_45, %c0_46, %c0_47] : memref<1x1x32xf32, #tpu.memory_space<vmem>>, vector<1x1x32xf32>
    %116 = vector.shape_cast %115 : vector<1x1x32xf32> to vector<1x32xf32>
    %c0_48 = arith.constant 0 : index
    %c0_49 = arith.constant 0 : index
    %c0_50 = arith.constant 0 : index
    %117 = vector.load %arg15[%c0_48, %c0_49, %c0_50] : memref<1x1x32xf32, #tpu.memory_space<vmem>>, vector<1x1x32xf32>
    %118 = vector.shape_cast %117 : vector<1x1x32xf32> to vector<1x32xf32>
    %cst_51 = arith.constant dense<0.000000e+00> : vector<64xf32>
    %119 = vector.multi_reduction <add>, %114, %cst_51 [1] : vector<64x32xf32> to vector<64xf32>
    %120 = vector.shape_cast %119 : vector<64xf32> to vector<64x1xf32>
    %cst_52 = arith.constant 3.200000e+01 : f32
    %121 = vector.broadcast %cst_52 : f32 to vector<64x1xf32>
    %122 = arith.divf %120, %121 : vector<64x1xf32>
    %123 = vector.broadcast %122 : vector<64x1xf32> to vector<64x32xf32>
    %124 = arith.subf %114, %123 : vector<64x32xf32>
    %125 = arith.mulf %124, %124 : vector<64x32xf32>
    %cst_53 = arith.constant dense<0.000000e+00> : vector<64xf32>
    %126 = vector.multi_reduction <add>, %125, %cst_53 [1] : vector<64x32xf32> to vector<64xf32>
    %127 = vector.shape_cast %126 : vector<64xf32> to vector<64x1xf32>
    %cst_54 = arith.constant 3.200000e+01 : f32
    %128 = vector.broadcast %cst_54 : f32 to vector<64x1xf32>
    %129 = arith.divf %127, %128 : vector<64x1xf32>
    %130 = vector.broadcast %122 : vector<64x1xf32> to vector<64x32xf32>
    %131 = arith.subf %114, %130 : vector<64x32xf32>
    %cst_55 = arith.constant 9.99999974E-6 : f32
    %132 = vector.broadcast %cst_55 : f32 to vector<64x1xf32>
    %133 = arith.addf %129, %132 : vector<64x1xf32>
    %134 = math.rsqrt %133 : vector<64x1xf32>
    %135 = vector.broadcast %134 : vector<64x1xf32> to vector<64x32xf32>
    %136 = arith.mulf %131, %135 : vector<64x32xf32>
    %137 = vector.broadcast %116 : vector<1x32xf32> to vector<64x32xf32>
    %138 = arith.mulf %136, %137 : vector<64x32xf32>
    %139 = vector.broadcast %118 : vector<1x32xf32> to vector<64x32xf32>
    %140 = arith.addf %138, %139 : vector<64x32xf32>
    %141 = arith.truncf %140 : vector<64x32xf32> to vector<64x32xbf16>
    %c0_56 = arith.constant 0 : index
    %c0_57 = arith.constant 0 : index
    %c0_58 = arith.constant 0 : index
    %142 = vector.load %arg16[%c0_56, %c0_57, %c0_58] : memref<1x32x64xbf16, #tpu.memory_space<vmem>>, vector<1x32x64xbf16>
    %143 = vector.shape_cast %142 : vector<1x32x64xbf16> to vector<32x64xbf16>
    %cst_59 = arith.constant dense<0.000000e+00> : vector<64x64xf32>
    %144 = tpu.matmul %141, %143, %cst_59 {dimension_numbers = #tpu.dot_dimension_numbers<[1], [0], [0], [1], [0, 0, 1, 1], [], []>} : vector<64x32xbf16>, vector<32x64xbf16>, vector<64x64xf32> -> vector<64x64xf32>
    %c0_60 = arith.constant 0 : index
    %c0_61 = arith.constant 0 : index
    %c0_62 = arith.constant 0 : index
    %145 = vector.load %arg17[%c0_60, %c0_61, %c0_62] : memref<1x1x64xf32, #tpu.memory_space<vmem>>, vector<1x1x64xf32>
    %146 = vector.shape_cast %145 : vector<1x1x64xf32> to vector<1x64xf32>
    %147 = vector.broadcast %146 : vector<1x64xf32> to vector<64x64xf32>
    %148 = arith.addf %144, %147 : vector<64x64xf32>
    %cst_63 = arith.constant 5.000000e-01 : f32
    %149 = vector.broadcast %cst_63 : f32 to vector<64x64xf32>
    %150 = arith.mulf %149, %148 : vector<64x64xf32>
    %cst_64 = arith.constant 0.707106769 : f32
    %151 = vector.broadcast %cst_64 : f32 to vector<64x64xf32>
    %152 = arith.mulf %148, %151 : vector<64x64xf32>
    %153 = math.erf %152 : vector<64x64xf32>
    %cst_65 = arith.constant 1.000000e+00 : f32
    %154 = vector.broadcast %cst_65 : f32 to vector<64x64xf32>
    %155 = arith.addf %154, %153 : vector<64x64xf32>
    %156 = arith.mulf %150, %155 : vector<64x64xf32>
    %157 = arith.truncf %156 : vector<64x64xf32> to vector<64x64xbf16>
    %c0_66 = arith.constant 0 : index
    %c0_67 = arith.constant 0 : index
    %c0_68 = arith.constant 0 : index
    %158 = vector.load %arg18[%c0_66, %c0_67, %c0_68] : memref<1x64x32xbf16, #tpu.memory_space<vmem>>, vector<1x64x32xbf16>
    %159 = vector.shape_cast %158 : vector<1x64x32xbf16> to vector<64x32xbf16>
    %cst_69 = arith.constant dense<0.000000e+00> : vector<64x32xf32>
    %160 = tpu.matmul %157, %159, %cst_69 {dimension_numbers = #tpu.dot_dimension_numbers<[1], [0], [0], [1], [0, 0, 1, 1], [], []>} : vector<64x64xbf16>, vector<64x32xbf16>, vector<64x32xf32> -> vector<64x32xf32>
    %c0_70 = arith.constant 0 : index
    %c0_71 = arith.constant 0 : index
    %c0_72 = arith.constant 0 : index
    %161 = vector.load %arg19[%c0_70, %c0_71, %c0_72] : memref<1x1x32xf32, #tpu.memory_space<vmem>>, vector<1x1x32xf32>
    %162 = vector.shape_cast %161 : vector<1x1x32xf32> to vector<1x32xf32>
    %163 = vector.broadcast %162 : vector<1x32xf32> to vector<64x32xf32>
    %164 = arith.addf %160, %163 : vector<64x32xf32>
    %165 = arith.addf %114, %164 : vector<64x32xf32>
    %c0_73 = arith.constant 0 : index
    %c0_74 = arith.constant 0 : index
    %166 = vector.load %arg21[%c0_73, %c0_74] : memref<64x32xf32, #tpu.memory_space<vmem>>, vector<64x32xf32>
    tpu.vector_store %arg21[%c0_73, %c0_74], %165 {strides = array<i32>} : memref<64x32xf32, #tpu.memory_space<vmem>>, vector<64x32xf32>,
    %c1_i32 = arith.constant 1 : i32
    %167 = arith.cmpi eq, %arg1, %c1_i32 : i32
    %168 = arith.extui %167 : i1 to i32
    %c0_i32_75 = arith.constant 0 : i32
    %169 = arith.cmpi ne, %168, %c0_i32_75 : i32
    scf.if %169 {
      %170 = arith.truncf %165 : vector<64x32xf32> to vector<64x32xbf16>
      %c0_76 = arith.constant 0 : index
      %c0_77 = arith.constant 0 : index
      %c0_78 = arith.constant 0 : index
      %171 = vector.load %arg20[%c0_76, %c0_77, %c0_78] : memref<1x64x32xbf16, #tpu.memory_space<vmem>>, vector<1x64x32xbf16>
      %172 = vector.shape_cast %171 : vector<1x64x32xbf16> to vector<64x32xbf16>
      %173 = vector.shape_cast %170 : vector<64x32xbf16> to vector<1x64x32xbf16>
      tpu.vector_store %arg20[%c0_76, %c0_77, %c0_78], %173 {strides = array<i32>} : memref<1x64x32xbf16, #tpu.memory_space<vmem>>, vector<1x64x32xbf16>,
    } else {
    }
    return
  }
  func.func @transform_0(%arg0: i32, %arg1: i32) -> (i32, i32, i32) {
    %c0_i32 = arith.constant 0 : i32
    %c0_i32_0 = arith.constant 0 : i32
    %c0_i32_1 = arith.constant 0 : i32
    return %arg0, %c0_i32, %c0_i32_0 : i32, i32, i32
  }
  func.func @transform_1(%arg0: i32, %arg1: i32) -> (i32, i32) {
    %c0_i32 = arith.constant 0 : i32
    %c0_i32_0 = arith.constant 0 : i32
    %c0_i32_1 = arith.constant 0 : i32
    return %c0_i32, %c0_i32_0 : i32, i32
  }
  func.func @transform_2(%arg0: i32, %arg1: i32) -> (i32, i32, i32) {
    %c0_i32 = arith.constant 0 : i32
    %c0_i32_0 = arith.constant 0 : i32
    %c0_i32_1 = arith.constant 0 : i32
    return %arg1, %c0_i32, %c0_i32_0 : i32, i32, i32
  }
  func.func @transform_3(%arg0: i32, %arg1: i32) -> (i32, i32, i32) {
    %c0_i32 = arith.constant 0 : i32
    %c0_i32_0 = arith.constant 0 : i32
    %c0_i32_1 = arith.constant 0 : i32
    return %arg1, %c0_i32, %c0_i32_0 : i32, i32, i32
  }
  func.func @transform_4(%arg0: i32, %arg1: i32) -> (i32, i32, i32) {
    %c0_i32 = arith.constant 0 : i32
    %c0_i32_0 = arith.constant 0 : i32
    %c0_i32_1 = arith.constant 0 : i32
    return %arg1, %c0_i32, %c0_i32_0 : i32, i32, i32
  }
  func.func @transform_5(%arg0: i32, %arg1: i32) -> (i32, i32, i32) {
    %c0_i32 = arith.constant 0 : i32
    %c0_i32_0 = arith.constant 0 : i32
    %c0_i32_1 = arith.constant 0 : i32
    return %arg1, %c0_i32, %c0_i32_0 : i32, i32, i32
  }
  func.func @transform_6(%arg0: i32, %arg1: i32) -> (i32, i32, i32) {
    %c0_i32 = arith.constant 0 : i32
    %c0_i32_0 = arith.constant 0 : i32
    %c0_i32_1 = arith.constant 0 : i32
    return %arg1, %c0_i32, %c0_i32_0 : i32, i32, i32
  }
  func.func @transform_7(%arg0: i32, %arg1: i32) -> (i32, i32, i32) {
    %c0_i32 = arith.constant 0 : i32
    %c0_i32_0 = arith.constant 0 : i32
    %c0_i32_1 = arith.constant 0 : i32
    return %arg1, %c0_i32, %c0_i32_0 : i32, i32, i32
  }
  func.func @transform_8(%arg0: i32, %arg1: i32) -> (i32, i32, i32) {
    %c0_i32 = arith.constant 0 : i32
    %c0_i32_0 = arith.constant 0 : i32
    %c0_i32_1 = arith.constant 0 : i32
    return %arg1, %c0_i32, %c0_i32_0 : i32, i32, i32
  }
  func.func @transform_9(%arg0: i32, %arg1: i32) -> (i32, i32, i32) {
    %c0_i32 = arith.constant 0 : i32
    %c0_i32_0 = arith.constant 0 : i32
    %c0_i32_1 = arith.constant 0 : i32
    return %arg1, %c0_i32, %c0_i32_0 : i32, i32, i32
  }
  func.func @transform_10(%arg0: i32, %arg1: i32) -> (i32, i32, i32) {
    %c0_i32 = arith.constant 0 : i32
    %c0_i32_0 = arith.constant 0 : i32
    %c0_i32_1 = arith.constant 0 : i32
    return %arg1, %c0_i32, %c0_i32_0 : i32, i32, i32
  }
  func.func @transform_11(%arg0: i32, %arg1: i32) -> (i32, i32, i32) {
    %c0_i32 = arith.constant 0 : i32
    %c0_i32_0 = arith.constant 0 : i32
    %c0_i32_1 = arith.constant 0 : i32
    return %arg1, %c0_i32, %c0_i32_0 : i32, i32, i32
  }
  func.func @transform_12(%arg0: i32, %arg1: i32) -> (i32, i32, i32) {
    %c0_i32 = arith.constant 0 : i32
    %c0_i32_0 = arith.constant 0 : i32
    %c0_i32_1 = arith.constant 0 : i32
    return %arg1, %c0_i32, %c0_i32_0 : i32, i32, i32
  }
  func.func @transform_13(%arg0: i32, %arg1: i32) -> (i32, i32, i32) {
    %c0_i32 = arith.constant 0 : i32
    %c0_i32_0 = arith.constant 0 : i32
    %c0_i32_1 = arith.constant 0 : i32
    return %arg1, %c0_i32, %c0_i32_0 : i32, i32, i32
  }
  func.func @transform_14(%arg0: i32, %arg1: i32) -> (i32, i32, i32) {
    %c0_i32 = arith.constant 0 : i32
    %c0_i32_0 = arith.constant 0 : i32
    %c0_i32_1 = arith.constant 0 : i32
    return %arg1, %c0_i32, %c0_i32_0 : i32, i32, i32
  }
  func.func @transform_15(%arg0: i32, %arg1: i32) -> (i32, i32, i32) {
    %c0_i32 = arith.constant 0 : i32
    %c0_i32_0 = arith.constant 0 : i32
    %c0_i32_1 = arith.constant 0 : i32
    return %arg1, %c0_i32, %c0_i32_0 : i32, i32, i32
  }
  func.func @transform_16(%arg0: i32, %arg1: i32) -> (i32, i32, i32) {
    %c0_i32 = arith.constant 0 : i32
    %c0_i32_0 = arith.constant 0 : i32
    %c0_i32_1 = arith.constant 0 : i32
    return %arg1, %c0_i32, %c0_i32_0 : i32, i32, i32
  }
  func.func @transform_17(%arg0: i32, %arg1: i32) -> (i32, i32, i32) {
    %c0_i32 = arith.constant 0 : i32
    %c0_i32_0 = arith.constant 0 : i32
    %c0_i32_1 = arith.constant 0 : i32
    return %arg1, %c0_i32, %c0_i32_0 : i32, i32, i32
  }
  func.func @transform_18(%arg0: i32, %arg1: i32) -> (i32, i32, i32) {
    %c0_i32 = arith.constant 0 : i32
    %c0_i32_0 = arith.constant 0 : i32
    %c0_i32_1 = arith.constant 0 : i32
    return %arg0, %c0_i32, %c0_i32_0 : i32, i32, i32
  }
}

module attributes {stable_mosaic.version = 11 : i64} {
  func.func @_matmul_bias_kernel(%arg0: i32, %arg1: memref<16x128xbf16, #tpu.memory_space<vmem>>, %arg2: memref<128x32xbf16, #tpu.memory_space<vmem>>, %arg3: memref<1x32xf32, #tpu.memory_space<vmem>>, %arg4: memref<16x32xbf16, #tpu.memory_space<vmem>>) attributes {dimension_semantics = [#tpu.dimension_semantics<parallel>], iteration_bounds = array<i64: 2>, scalar_prefetch = 0 : i64, scratch_operands = 0 : i64, tpu.core_type = #tpu.core_type<tc>, window_params = [{transform_indices = @transform_0, window_bounds = array<i64: 16, 128>}, {pipeline_mode = #tpu.pipeline_mode<synchronous>, transform_indices = @transform_1, window_bounds = array<i64: 128, 32>}, {pipeline_mode = #tpu.pipeline_mode<synchronous>, transform_indices = @transform_2, window_bounds = array<i64: 1, 32>}, {transform_indices = @transform_3, window_bounds = array<i64: 16, 32>}]} {
    %c0 = arith.constant 0 : index
    %c0_0 = arith.constant 0 : index
    %0 = vector.load %arg1[%c0, %c0_0] : memref<16x128xbf16, #tpu.memory_space<vmem>>, vector<16x128xbf16>
    %c0_1 = arith.constant 0 : index
    %c0_2 = arith.constant 0 : index
    %1 = vector.load %arg2[%c0_1, %c0_2] : memref<128x32xbf16, #tpu.memory_space<vmem>>, vector<128x32xbf16>
    %cst = arith.constant dense<0.000000e+00> : vector<16x32xf32>
    %2 = tpu.matmul %0, %1, %cst {dimension_numbers = #tpu.dot_dimension_numbers<[1], [0], [0], [1], [0, 0, 1, 1], [], []>} : vector<16x128xbf16>, vector<128x32xbf16>, vector<16x32xf32> -> vector<16x32xf32>
    %c0_3 = arith.constant 0 : index
    %c0_4 = arith.constant 0 : index
    %3 = vector.load %arg3[%c0_3, %c0_4] : memref<1x32xf32, #tpu.memory_space<vmem>>, vector<1x32xf32>
    %4 = vector.broadcast %3 : vector<1x32xf32> to vector<16x32xf32>
    %5 = arith.addf %2, %4 : vector<16x32xf32>
    %6 = arith.truncf %5 : vector<16x32xf32> to vector<16x32xbf16>
    %c0_5 = arith.constant 0 : index
    %c0_6 = arith.constant 0 : index
    %7 = vector.load %arg4[%c0_5, %c0_6] : memref<16x32xbf16, #tpu.memory_space<vmem>>, vector<16x32xbf16>
    tpu.vector_store %arg4[%c0_5, %c0_6], %6 {strides = array<i32>} : memref<16x32xbf16, #tpu.memory_space<vmem>>, vector<16x32xbf16>,
    return
  }
  func.func @transform_0(%arg0: i32) -> (i32, i32) {
    %c0_i32 = arith.constant 0 : i32
    %c0_i32_0 = arith.constant 0 : i32
    return %arg0, %c0_i32 : i32, i32
  }
  func.func @transform_1(%arg0: i32) -> (i32, i32) {
    %c0_i32 = arith.constant 0 : i32
    %c0_i32_0 = arith.constant 0 : i32
    %c0_i32_1 = arith.constant 0 : i32
    return %c0_i32, %c0_i32_0 : i32, i32
  }
  func.func @transform_2(%arg0: i32) -> (i32, i32) {
    %c0_i32 = arith.constant 0 : i32
    %c0_i32_0 = arith.constant 0 : i32
    %c0_i32_1 = arith.constant 0 : i32
    return %c0_i32, %c0_i32_0 : i32, i32
  }
  func.func @transform_3(%arg0: i32) -> (i32, i32) {
    %c0_i32 = arith.constant 0 : i32
    %c0_i32_0 = arith.constant 0 : i32
    return %arg0, %c0_i32 : i32, i32
  }
}

module attributes {stable_mosaic.version = 11 : i64} {
  func.func @kernel(%arg0: i32, %arg1: i32, %arg2: memref<1x16x32xbf16, #tpu.memory_space<vmem>>, %arg3: memref<16x32xf32, #tpu.memory_space<vmem>>, %arg4: memref<1x1x32xf32, #tpu.memory_space<vmem>>, %arg5: memref<1x1x32xf32, #tpu.memory_space<vmem>>, %arg6: memref<1x32x32xbf16, #tpu.memory_space<vmem>>, %arg7: memref<1x1x32xf32, #tpu.memory_space<vmem>>, %arg8: memref<1x32x32xbf16, #tpu.memory_space<vmem>>, %arg9: memref<1x1x32xf32, #tpu.memory_space<vmem>>, %arg10: memref<1x32x32xbf16, #tpu.memory_space<vmem>>, %arg11: memref<1x1x32xf32, #tpu.memory_space<vmem>>, %arg12: memref<1x32x32xbf16, #tpu.memory_space<vmem>>, %arg13: memref<1x1x32xf32, #tpu.memory_space<vmem>>, %arg14: memref<1x1x32xf32, #tpu.memory_space<vmem>>, %arg15: memref<1x1x32xf32, #tpu.memory_space<vmem>>, %arg16: memref<1x32x64xbf16, #tpu.memory_space<vmem>>, %arg17: memref<1x1x64xf32, #tpu.memory_space<vmem>>, %arg18: memref<1x64x32xbf16, #tpu.memory_space<vmem>>, %arg19: memref<1x1x32xf32, #tpu.memory_space<vmem>>, %arg20: memref<1x16x32xbf16, #tpu.memory_space<vmem>>, %arg21: memref<16x32xf32, #tpu.memory_space<vmem>>) attributes {dimension_semantics = [#tpu.dimension_semantics<parallel>, #tpu.dimension_semantics<arbitrary>], iteration_bounds = array<i64: 2, 2>, scalar_prefetch = 0 : i64, scratch_operands = 1 : i64, tpu.core_type = #tpu.core_type<tc>, window_params = [{transform_indices = @transform_0, window_bounds = array<i64: 1, 16, 32>}, {pipeline_mode = #tpu.pipeline_mode<synchronous>, transform_indices = @transform_1, window_bounds = array<i64: 16, 32>}, {transform_indices = @transform_2, window_bounds = array<i64: 1, 1, 32>}, {transform_indices = @transform_3, window_bounds = array<i64: 1, 1, 32>}, {transform_indices = @transform_4, window_bounds = array<i64: 1, 32, 32>}, {transform_indices = @transform_5, window_bounds = array<i64: 1, 1, 32>}, {transform_indices = @transform_6, window_bounds = array<i64: 1, 32, 32>}, {transform_indices = @transform_7, window_bounds = array<i64: 1, 1, 32>}, {transform_indices = @transform_8, window_bounds = array<i64: 1, 32, 32>}, {transform_indices = @transform_9, window_bounds = array<i64: 1, 1, 32>}, {transform_indices = @transform_10, window_bounds = array<i64: 1, 32, 32>}, {transform_indices = @transform_11, window_bounds = array<i64: 1, 1, 32>}, {transform_indices = @transform_12, window_bounds = array<i64: 1, 1, 32>}, {transform_indices = @transform_13, window_bounds = array<i64: 1, 1, 32>}, {transform_indices = @transform_14, window_bounds = array<i64: 1, 32, 64>}, {transform_indices = @transform_15, window_bounds = array<i64: 1, 1, 64>}, {transform_indices = @transform_16, window_bounds = array<i64: 1, 64, 32>}, {transform_indices = @transform_17, window_bounds = array<i64: 1, 1, 32>}, {transform_indices = @transform_18, window_bounds = array<i64: 1, 16, 32>}]} {
    %c0_i32 = arith.constant 0 : i32
    %0 = arith.cmpi eq, %arg1, %c0_i32 : i32
    %1 = arith.extui %0 : i1 to i32
    %c0_i32_0 = arith.constant 0 : i32
    %2 = arith.cmpi ne, %1, %c0_i32_0 : i32
    scf.if %2 {
      %c0_76 = arith.constant 0 : index
      %c0_77 = arith.constant 0 : index
      %c0_78 = arith.constant 0 : index
      %170 = vector.load %arg2[%c0_76, %c0_77, %c0_78] : memref<1x16x32xbf16, #tpu.memory_space<vmem>>, vector<1x16x32xbf16>
      %171 = vector.shape_cast %170 : vector<1x16x32xbf16> to vector<16x32xbf16>
      %172 = arith.extf %171 : vector<16x32xbf16> to vector<16x32xf32>
      %c0_79 = arith.constant 0 : index
      %c0_80 = arith.constant 0 : index
      %173 = vector.load %arg3[%c0_79, %c0_80] : memref<16x32xf32, #tpu.memory_space<vmem>>, vector<16x32xf32>
      %174 = arith.addf %172, %173 : vector<16x32xf32>
      %c0_81 = arith.constant 0 : index
      %c0_82 = arith.constant 0 : index
      %175 = vector.load %arg21[%c0_81, %c0_82] : memref<16x32xf32, #tpu.memory_space<vmem>>, vector<16x32xf32>
      tpu.vector_store %arg21[%c0_81, %c0_82], %174 {strides = array<i32>} : memref<16x32xf32, #tpu.memory_space<vmem>>, vector<16x32xf32>,
    } else {
    }
    %c0 = arith.constant 0 : index
    %c0_1 = arith.constant 0 : index
    %3 = vector.load %arg21[%c0, %c0_1] : memref<16x32xf32, #tpu.memory_space<vmem>>, vector<16x32xf32>
    %c0_2 = arith.constant 0 : index
    %c0_3 = arith.constant 0 : index
    %c0_4 = arith.constant 0 : index
    %4 = vector.load %arg4[%c0_2, %c0_3, %c0_4] : memref<1x1x32xf32, #tpu.memory_space<vmem>>, vector<1x1x32xf32>
    %5 = vector.shape_cast %4 : vector<1x1x32xf32> to vector<1x32xf32>
    %c0_5 = arith.constant 0 : index
    %c0_6 = arith.constant 0 : index
    %c0_7 = arith.constant 0 : index
    %6 = vector.load %arg5[%c0_5, %c0_6, %c0_7] : memref<1x1x32xf32, #tpu.memory_space<vmem>>, vector<1x1x32xf32>
    %7 = vector.shape_cast %6 : vector<1x1x32xf32> to vector<1x32xf32>
    %cst = arith.constant dense<0.000000e+00> : vector<16xf32>
    %8 = vector.multi_reduction <add>, %3, %cst [1] : vector<16x32xf32> to vector<16xf32>
    %9 = vector.shape_cast %8 : vector<16xf32> to vector<16x1xf32>
    %cst_8 = arith.constant 3.200000e+01 : f32
    %10 = vector.broadcast %cst_8 : f32 to vector<16x1xf32>
    %11 = arith.divf %9, %10 : vector<16x1xf32>
    %12 = vector.broadcast %11 : vector<16x1xf32> to vector<16x32xf32>
    %13 = arith.subf %3, %12 : vector<16x32xf32>
    %14 = arith.mulf %13, %13 : vector<16x32xf32>
    %cst_9 = arith.constant dense<0.000000e+00> : vector<16xf32>
    %15 = vector.multi_reduction <add>, %14, %cst_9 [1] : vector<16x32xf32> to vector<16xf32>
    %16 = vector.shape_cast %15 : vector<16xf32> to vector<16x1xf32>
    %cst_10 = arith.constant 3.200000e+01 : f32
    %17 = vector.broadcast %cst_10 : f32 to vector<16x1xf32>
    %18 = arith.divf %16, %17 : vector<16x1xf32>
    %19 = vector.broadcast %11 : vector<16x1xf32> to vector<16x32xf32>
    %20 = arith.subf %3, %19 : vector<16x32xf32>
    %cst_11 = arith.constant 9.99999974E-6 : f32
    %21 = vector.broadcast %cst_11 : f32 to vector<16x1xf32>
    %22 = arith.addf %18, %21 : vector<16x1xf32>
    %23 = math.rsqrt %22 : vector<16x1xf32>
    %24 = vector.broadcast %23 : vector<16x1xf32> to vector<16x32xf32>
    %25 = arith.mulf %20, %24 : vector<16x32xf32>
    %26 = vector.broadcast %5 : vector<1x32xf32> to vector<16x32xf32>
    %27 = arith.mulf %25, %26 : vector<16x32xf32>
    %28 = vector.broadcast %7 : vector<1x32xf32> to vector<16x32xf32>
    %29 = arith.addf %27, %28 : vector<16x32xf32>
    %30 = arith.truncf %29 : vector<16x32xf32> to vector<16x32xbf16>
    %c0_12 = arith.constant 0 : index
    %c0_13 = arith.constant 0 : index
    %c0_14 = arith.constant 0 : index
    %31 = vector.load %arg6[%c0_12, %c0_13, %c0_14] : memref<1x32x32xbf16, #tpu.memory_space<vmem>>, vector<1x32x32xbf16>
    %32 = vector.shape_cast %31 : vector<1x32x32xbf16> to vector<32x32xbf16>
    %cst_15 = arith.constant dense<0.000000e+00> : vector<16x32xf32>
    %33 = tpu.matmul %30, %32, %cst_15 {dimension_numbers = #tpu.dot_dimension_numbers<[1], [0], [0], [1], [0, 0, 1, 1], [], []>} : vector<16x32xbf16>, vector<32x32xbf16>, vector<16x32xf32> -> vector<16x32xf32>
    %c0_16 = arith.constant 0 : index
    %c0_17 = arith.constant 0 : index
    %c0_18 = arith.constant 0 : index
    %34 = vector.load %arg7[%c0_16, %c0_17, %c0_18] : memref<1x1x32xf32, #tpu.memory_space<vmem>>, vector<1x1x32xf32>
    %35 = vector.shape_cast %34 : vector<1x1x32xf32> to vector<1x32xf32>
    %36 = vector.broadcast %35 : vector<1x32xf32> to vector<16x32xf32>
    %37 = arith.addf %33, %36 : vector<16x32xf32>
    %cst_19 = arith.constant 0.353553385 : f32
    %38 = vector.broadcast %cst_19 : f32 to vector<16x32xf32>
    %39 = arith.mulf %37, %38 : vector<16x32xf32>
    %c0_20 = arith.constant 0 : index
    %c0_21 = arith.constant 0 : index
    %c0_22 = arith.constant 0 : index
    %40 = vector.load %arg8[%c0_20, %c0_21, %c0_22] : memref<1x32x32xbf16, #tpu.memory_space<vmem>>, vector<1x32x32xbf16>
    %41 = vector.shape_cast %40 : vector<1x32x32xbf16> to vector<32x32xbf16>
    %cst_23 = arith.constant dense<0.000000e+00> : vector<16x32xf32>
    %42 = tpu.matmul %30, %41, %cst_23 {dimension_numbers = #tpu.dot_dimension_numbers<[1], [0], [0], [1], [0, 0, 1, 1], [], []>} : vector<16x32xbf16>, vector<32x32xbf16>, vector<16x32xf32> -> vector<16x32xf32>
    %c0_24 = arith.constant 0 : index
    %c0_25 = arith.constant 0 : index
    %c0_26 = arith.constant 0 : index
    %43 = vector.load %arg9[%c0_24, %c0_25, %c0_26] : memref<1x1x32xf32, #tpu.memory_space<vmem>>, vector<1x1x32xf32>
    %44 = vector.shape_cast %43 : vector<1x1x32xf32> to vector<1x32xf32>
    %45 = vector.broadcast %44 : vector<1x32xf32> to vector<16x32xf32>
    %46 = arith.addf %42, %45 : vector<16x32xf32>
    %c0_27 = arith.constant 0 : index
    %c0_28 = arith.constant 0 : index
    %c0_29 = arith.constant 0 : index
    %47 = vector.load %arg10[%c0_27, %c0_28, %c0_29] : memref<1x32x32xbf16, #tpu.memory_space<vmem>>, vector<1x32x32xbf16>
    %48 = vector.shape_cast %47 : vector<1x32x32xbf16> to vector<32x32xbf16>
    %cst_30 = arith.constant dense<0.000000e+00> : vector<16x32xf32>
    %49 = tpu.matmul %30, %48, %cst_30 {dimension_numbers = #tpu.dot_dimension_numbers<[1], [0], [0], [1], [0, 0, 1, 1], [], []>} : vector<16x32xbf16>, vector<32x32xbf16>, vector<16x32xf32> -> vector<16x32xf32>
    %c0_31 = arith.constant 0 : index
    %c0_32 = arith.constant 0 : index
    %c0_33 = arith.constant 0 : index
    %50 = vector.load %arg11[%c0_31, %c0_32, %c0_33] : memref<1x1x32xf32, #tpu.memory_space<vmem>>, vector<1x1x32xf32>
    %51 = vector.shape_cast %50 : vector<1x1x32xf32> to vector<1x32xf32>
    %52 = vector.broadcast %51 : vector<1x32xf32> to vector<16x32xf32>
    %53 = arith.addf %49, %52 : vector<16x32xf32>
    %54 = vector.extract_strided_slice %39 {offsets = [0, 0], sizes = [16, 8], strides = [1, 1]} : vector<16x32xf32> to vector<16x8xf32>
    %55 = vector.extract_strided_slice %39 {offsets = [0, 8], sizes = [16, 8], strides = [1, 1]} : vector<16x32xf32> to vector<16x8xf32>
    %56 = vector.extract_strided_slice %39 {offsets = [0, 16], sizes = [16, 8], strides = [1, 1]} : vector<16x32xf32> to vector<16x8xf32>
    %57 = vector.extract_strided_slice %39 {offsets = [0, 24], sizes = [16, 8], strides = [1, 1]} : vector<16x32xf32> to vector<16x8xf32>
    %58 = vector.shape_cast %54 : vector<16x8xf32> to vector<1x16x8xf32>
    %59 = vector.shape_cast %55 : vector<16x8xf32> to vector<1x16x8xf32>
    %60 = vector.shape_cast %56 : vector<16x8xf32> to vector<1x16x8xf32>
    %61 = vector.shape_cast %57 : vector<16x8xf32> to vector<1x16x8xf32>
    %62 = tpu.concatenate %58, %59, %60, %61 in 0 : vector<1x16x8xf32>, vector<1x16x8xf32>, vector<1x16x8xf32>, vector<1x16x8xf32> -> vector<4x16x8xf32>
    %63 = arith.truncf %62 : vector<4x16x8xf32> to vector<4x16x8xbf16>
    %64 = vector.extract_strided_slice %46 {offsets = [0, 0], sizes = [16, 8], strides = [1, 1]} : vector<16x32xf32> to vector<16x8xf32>
    %65 = vector.extract_strided_slice %46 {offsets = [0, 8], sizes = [16, 8], strides = [1, 1]} : vector<16x32xf32> to vector<16x8xf32>
    %66 = vector.extract_strided_slice %46 {offsets = [0, 16], sizes = [16, 8], strides = [1, 1]} : vector<16x32xf32> to vector<16x8xf32>
    %67 = vector.extract_strided_slice %46 {offsets = [0, 24], sizes = [16, 8], strides = [1, 1]} : vector<16x32xf32> to vector<16x8xf32>
    %68 = vector.shape_cast %64 : vector<16x8xf32> to vector<1x16x8xf32>
    %69 = vector.shape_cast %65 : vector<16x8xf32> to vector<1x16x8xf32>
    %70 = vector.shape_cast %66 : vector<16x8xf32> to vector<1x16x8xf32>
    %71 = vector.shape_cast %67 : vector<16x8xf32> to vector<1x16x8xf32>
    %72 = tpu.concatenate %68, %69, %70, %71 in 0 : vector<1x16x8xf32>, vector<1x16x8xf32>, vector<1x16x8xf32>, vector<1x16x8xf32> -> vector<4x16x8xf32>
    %73 = arith.truncf %72 : vector<4x16x8xf32> to vector<4x16x8xbf16>
    %74 = vector.extract_strided_slice %53 {offsets = [0, 0], sizes = [16, 8], strides = [1, 1]} : vector<16x32xf32> to vector<16x8xf32>
    %75 = vector.extract_strided_slice %53 {offsets = [0, 8], sizes = [16, 8], strides = [1, 1]} : vector<16x32xf32> to vector<16x8xf32>
    %76 = vector.extract_strided_slice %53 {offsets = [0, 16], sizes = [16, 8], strides = [1, 1]} : vector<16x32xf32> to vector<16x8xf32>
    %77 = vector.extract_strided_slice %53 {offsets = [0, 24], sizes = [16, 8], strides = [1, 1]} : vector<16x32xf32> to vector<16x8xf32>
    %78 = vector.shape_cast %74 : vector<16x8xf32> to vector<1x16x8xf32>
    %79 = vector.shape_cast %75 : vector<16x8xf32> to vector<1x16x8xf32>
    %80 = vector.shape_cast %76 : vector<16x8xf32> to vector<1x16x8xf32>
    %81 = vector.shape_cast %77 : vector<16x8xf32> to vector<1x16x8xf32>
    %82 = tpu.concatenate %78, %79, %80, %81 in 0 : vector<1x16x8xf32>, vector<1x16x8xf32>, vector<1x16x8xf32>, vector<1x16x8xf32> -> vector<4x16x8xf32>
    %83 = arith.truncf %82 : vector<4x16x8xf32> to vector<4x16x8xbf16>
    "tpu.trace_start"() <{level = 10 : i32, message = "hqd,hkd->hqk"}> : () -> ()
    %cst_34 = arith.constant dense<0.000000e+00> : vector<4x16x16xf32>
    %84 = tpu.matmul %63, %73, %cst_34 {dimension_numbers = #tpu.dot_dimension_numbers<[2], [2], [1], [1], [0, 0, 0, 1, 1, 1], [0], [0]>} : vector<4x16x8xbf16>, vector<4x16x8xbf16>, vector<4x16x16xf32> -> vector<4x16x16xf32>
    "tpu.trace_stop"() : () -> ()
    %cst_35 = arith.constant dense<0xFF800000> : vector<4x16xf32>
    %85 = vector.multi_reduction <maximumf>, %84, %cst_35 [2] : vector<4x16x16xf32> to vector<4x16xf32>
    %86 = vector.shape_cast %85 : vector<4x16xf32> to vector<4x16x1xf32>
    %87 = vector.broadcast %86 : vector<4x16x1xf32> to vector<4x16x16xf32>
    %88 = arith.subf %84, %87 : vector<4x16x16xf32>
    %89 = math.exp %88 : vector<4x16x16xf32>
    %cst_36 = arith.constant dense<0.000000e+00> : vector<4x16xf32>
    %90 = vector.multi_reduction <add>, %89, %cst_36 [2] : vector<4x16x16xf32> to vector<4x16xf32>
    %91 = vector.shape_cast %90 : vector<4x16xf32> to vector<4x16x1xf32>
    %92 = tpu.reciprocal %91 {approx = true} : vector<4x16x1xf32> -> vector<4x16x1xf32>
    %93 = vector.broadcast %92 : vector<4x16x1xf32> to vector<4x16x16xf32>
    %94 = arith.mulf %89, %93 : vector<4x16x16xf32>
    %95 = arith.truncf %94 : vector<4x16x16xf32> to vector<4x16x16xbf16>
    "tpu.trace_start"() <{level = 10 : i32, message = "hqk,hkd->hqd"}> : () -> ()
    %cst_37 = arith.constant dense<0.000000e+00> : vector<4x16x8xf32>
    %96 = tpu.matmul %95, %83, %cst_37 {dimension_numbers = #tpu.dot_dimension_numbers<[2], [1], [1], [2], [0, 0, 0, 1, 1, 2], [0], [0]>} : vector<4x16x16xbf16>, vector<4x16x8xbf16>, vector<4x16x8xf32> -> vector<4x16x8xf32>
    "tpu.trace_stop"() : () -> ()
    %97 = vector.extract_strided_slice %96 {offsets = [0, 0, 0], sizes = [1, 16, 8], strides = [1, 1, 1]} : vector<4x16x8xf32> to vector<1x16x8xf32>
    %98 = vector.shape_cast %97 : vector<1x16x8xf32> to vector<16x8xf32>
    %99 = vector.extract_strided_slice %96 {offsets = [1, 0, 0], sizes = [1, 16, 8], strides = [1, 1, 1]} : vector<4x16x8xf32> to vector<1x16x8xf32>
    %100 = vector.shape_cast %99 : vector<1x16x8xf32> to vector<16x8xf32>
    %101 = vector.extract_strided_slice %96 {offsets = [2, 0, 0], sizes = [1, 16, 8], strides = [1, 1, 1]} : vector<4x16x8xf32> to vector<1x16x8xf32>
    %102 = vector.shape_cast %101 : vector<1x16x8xf32> to vector<16x8xf32>
    %103 = vector.extract_strided_slice %96 {offsets = [3, 0, 0], sizes = [1, 16, 8], strides = [1, 1, 1]} : vector<4x16x8xf32> to vector<1x16x8xf32>
    %104 = vector.shape_cast %103 : vector<1x16x8xf32> to vector<16x8xf32>
    %105 = tpu.concatenate %98, %100, %102, %104 in 1 : vector<16x8xf32>, vector<16x8xf32>, vector<16x8xf32>, vector<16x8xf32> -> vector<16x32xf32>
    %106 = arith.truncf %105 : vector<16x32xf32> to vector<16x32xbf16>
    %c0_38 = arith.constant 0 : index
    %c0_39 = arith.constant 0 : index
    %c0_40 = arith.constant 0 : index
    %107 = vector.load %arg12[%c0_38, %c0_39, %c0_40] : memref<1x32x32xbf16, #tpu.memory_space<vmem>>, vector<1x32x32xbf16>
    %108 = vector.shape_cast %107 : vector<1x32x32xbf16> to vector<32x32xbf16>
    %cst_41 = arith.constant dense<0.000000e+00> : vector<16x32xf32>
    %109 = tpu.matmul %106, %108, %cst_41 {dimension_numbers = #tpu.dot_dimension_numbers<[1], [0], [0], [1], [0, 0, 1, 1], [], []>} : vector<16x32xbf16>, vector<32x32xbf16>, vector<16x32xf32> -> vector<16x32xf32>
    %c0_42 = arith.constant 0 : index
    %c0_43 = arith.constant 0 : index
    %c0_44 = arith.constant 0 : index
    %110 = vector.load %arg13[%c0_42, %c0_43, %c0_44] : memref<1x1x32xf32, #tpu.memory_space<vmem>>, vector<1x1x32xf32>
    %111 = vector.shape_cast %110 : vector<1x1x32xf32> to vector<1x32xf32>
    %112 = vector.broadcast %111 : vector<1x32xf32> to vector<16x32xf32>
    %113 = arith.addf %109, %112 : vector<16x32xf32>
    %114 = arith.addf %3, %113 : vector<16x32xf32>
    %c0_45 = arith.constant 0 : index
    %c0_46 = arith.constant 0 : index
    %c0_47 = arith.constant 0 : index
    %115 = vector.load %arg14[%c0_45, %c0_46, %c0_47] : memref<1x1x32xf32, #tpu.memory_space<vmem>>, vector<1x1x32xf32>
    %116 = vector.shape_cast %115 : vector<1x1x32xf32> to vector<1x32xf32>
    %c0_48 = arith.constant 0 : index
    %c0_49 = arith.constant 0 : index
    %c0_50 = arith.constant 0 : index
    %117 = vector.load %arg15[%c0_48, %c0_49, %c0_50] : memref<1x1x32xf32, #tpu.memory_space<vmem>>, vector<1x1x32xf32>
    %118 = vector.shape_cast %117 : vector<1x1x32xf32> to vector<1x32xf32>
    %cst_51 = arith.constant dense<0.000000e+00> : vector<16xf32>
    %119 = vector.multi_reduction <add>, %114, %cst_51 [1] : vector<16x32xf32> to vector<16xf32>
    %120 = vector.shape_cast %119 : vector<16xf32> to vector<16x1xf32>
    %cst_52 = arith.constant 3.200000e+01 : f32
    %121 = vector.broadcast %cst_52 : f32 to vector<16x1xf32>
    %122 = arith.divf %120, %121 : vector<16x1xf32>
    %123 = vector.broadcast %122 : vector<16x1xf32> to vector<16x32xf32>
    %124 = arith.subf %114, %123 : vector<16x32xf32>
    %125 = arith.mulf %124, %124 : vector<16x32xf32>
    %cst_53 = arith.constant dense<0.000000e+00> : vector<16xf32>
    %126 = vector.multi_reduction <add>, %125, %cst_53 [1] : vector<16x32xf32> to vector<16xf32>
    %127 = vector.shape_cast %126 : vector<16xf32> to vector<16x1xf32>
    %cst_54 = arith.constant 3.200000e+01 : f32
    %128 = vector.broadcast %cst_54 : f32 to vector<16x1xf32>
    %129 = arith.divf %127, %128 : vector<16x1xf32>
    %130 = vector.broadcast %122 : vector<16x1xf32> to vector<16x32xf32>
    %131 = arith.subf %114, %130 : vector<16x32xf32>
    %cst_55 = arith.constant 9.99999974E-6 : f32
    %132 = vector.broadcast %cst_55 : f32 to vector<16x1xf32>
    %133 = arith.addf %129, %132 : vector<16x1xf32>
    %134 = math.rsqrt %133 : vector<16x1xf32>
    %135 = vector.broadcast %134 : vector<16x1xf32> to vector<16x32xf32>
    %136 = arith.mulf %131, %135 : vector<16x32xf32>
    %137 = vector.broadcast %116 : vector<1x32xf32> to vector<16x32xf32>
    %138 = arith.mulf %136, %137 : vector<16x32xf32>
    %139 = vector.broadcast %118 : vector<1x32xf32> to vector<16x32xf32>
    %140 = arith.addf %138, %139 : vector<16x32xf32>
    %141 = arith.truncf %140 : vector<16x32xf32> to vector<16x32xbf16>
    %c0_56 = arith.constant 0 : index
    %c0_57 = arith.constant 0 : index
    %c0_58 = arith.constant 0 : index
    %142 = vector.load %arg16[%c0_56, %c0_57, %c0_58] : memref<1x32x64xbf16, #tpu.memory_space<vmem>>, vector<1x32x64xbf16>
    %143 = vector.shape_cast %142 : vector<1x32x64xbf16> to vector<32x64xbf16>
    %cst_59 = arith.constant dense<0.000000e+00> : vector<16x64xf32>
    %144 = tpu.matmul %141, %143, %cst_59 {dimension_numbers = #tpu.dot_dimension_numbers<[1], [0], [0], [1], [0, 0, 1, 1], [], []>} : vector<16x32xbf16>, vector<32x64xbf16>, vector<16x64xf32> -> vector<16x64xf32>
    %c0_60 = arith.constant 0 : index
    %c0_61 = arith.constant 0 : index
    %c0_62 = arith.constant 0 : index
    %145 = vector.load %arg17[%c0_60, %c0_61, %c0_62] : memref<1x1x64xf32, #tpu.memory_space<vmem>>, vector<1x1x64xf32>
    %146 = vector.shape_cast %145 : vector<1x1x64xf32> to vector<1x64xf32>
    %147 = vector.broadcast %146 : vector<1x64xf32> to vector<16x64xf32>
    %148 = arith.addf %144, %147 : vector<16x64xf32>
    %cst_63 = arith.constant 5.000000e-01 : f32
    %149 = vector.broadcast %cst_63 : f32 to vector<16x64xf32>
    %150 = arith.mulf %149, %148 : vector<16x64xf32>
    %cst_64 = arith.constant 0.707106769 : f32
    %151 = vector.broadcast %cst_64 : f32 to vector<16x64xf32>
    %152 = arith.mulf %148, %151 : vector<16x64xf32>
    %153 = math.erf %152 : vector<16x64xf32>
    %cst_65 = arith.constant 1.000000e+00 : f32
    %154 = vector.broadcast %cst_65 : f32 to vector<16x64xf32>
    %155 = arith.addf %154, %153 : vector<16x64xf32>
    %156 = arith.mulf %150, %155 : vector<16x64xf32>
    %157 = arith.truncf %156 : vector<16x64xf32> to vector<16x64xbf16>
    %c0_66 = arith.constant 0 : index
    %c0_67 = arith.constant 0 : index
    %c0_68 = arith.constant 0 : index
    %158 = vector.load %arg18[%c0_66, %c0_67, %c0_68] : memref<1x64x32xbf16, #tpu.memory_space<vmem>>, vector<1x64x32xbf16>
    %159 = vector.shape_cast %158 : vector<1x64x32xbf16> to vector<64x32xbf16>
    %cst_69 = arith.constant dense<0.000000e+00> : vector<16x32xf32>
    %160 = tpu.matmul %157, %159, %cst_69 {dimension_numbers = #tpu.dot_dimension_numbers<[1], [0], [0], [1], [0, 0, 1, 1], [], []>} : vector<16x64xbf16>, vector<64x32xbf16>, vector<16x32xf32> -> vector<16x32xf32>
    %c0_70 = arith.constant 0 : index
    %c0_71 = arith.constant 0 : index
    %c0_72 = arith.constant 0 : index
    %161 = vector.load %arg19[%c0_70, %c0_71, %c0_72] : memref<1x1x32xf32, #tpu.memory_space<vmem>>, vector<1x1x32xf32>
    %162 = vector.shape_cast %161 : vector<1x1x32xf32> to vector<1x32xf32>
    %163 = vector.broadcast %162 : vector<1x32xf32> to vector<16x32xf32>
    %164 = arith.addf %160, %163 : vector<16x32xf32>
    %165 = arith.addf %114, %164 : vector<16x32xf32>
    %c0_73 = arith.constant 0 : index
    %c0_74 = arith.constant 0 : index
    %166 = vector.load %arg21[%c0_73, %c0_74] : memref<16x32xf32, #tpu.memory_space<vmem>>, vector<16x32xf32>
    tpu.vector_store %arg21[%c0_73, %c0_74], %165 {strides = array<i32>} : memref<16x32xf32, #tpu.memory_space<vmem>>, vector<16x32xf32>,
    %c1_i32 = arith.constant 1 : i32
    %167 = arith.cmpi eq, %arg1, %c1_i32 : i32
    %168 = arith.extui %167 : i1 to i32
    %c0_i32_75 = arith.constant 0 : i32
    %169 = arith.cmpi ne, %168, %c0_i32_75 : i32
    scf.if %169 {
      %170 = arith.truncf %165 : vector<16x32xf32> to vector<16x32xbf16>
      %c0_76 = arith.constant 0 : index
      %c0_77 = arith.constant 0 : index
      %c0_78 = arith.constant 0 : index
      %171 = vector.load %arg20[%c0_76, %c0_77, %c0_78] : memref<1x16x32xbf16, #tpu.memory_space<vmem>>, vector<1x16x32xbf16>
      %172 = vector.shape_cast %171 : vector<1x16x32xbf16> to vector<16x32xbf16>
      %173 = vector.shape_cast %170 : vector<16x32xbf16> to vector<1x16x32xbf16>
      tpu.vector_store %arg20[%c0_76, %c0_77, %c0_78], %173 {strides = array<i32>} : memref<1x16x32xbf16, #tpu.memory_space<vmem>>, vector<1x16x32xbf16>,
    } else {
    }
    return
  }
  func.func @transform_0(%arg0: i32, %arg1: i32) -> (i32, i32, i32) {
    %c0_i32 = arith.constant 0 : i32
    %c0_i32_0 = arith.constant 0 : i32
    %c0_i32_1 = arith.constant 0 : i32
    return %arg0, %c0_i32, %c0_i32_0 : i32, i32, i32
  }
  func.func @transform_1(%arg0: i32, %arg1: i32) -> (i32, i32) {
    %c0_i32 = arith.constant 0 : i32
    %c0_i32_0 = arith.constant 0 : i32
    %c0_i32_1 = arith.constant 0 : i32
    return %c0_i32, %c0_i32_0 : i32, i32
  }
  func.func @transform_2(%arg0: i32, %arg1: i32) -> (i32, i32, i32) {
    %c0_i32 = arith.constant 0 : i32
    %c0_i32_0 = arith.constant 0 : i32
    %c0_i32_1 = arith.constant 0 : i32
    return %arg1, %c0_i32, %c0_i32_0 : i32, i32, i32
  }
  func.func @transform_3(%arg0: i32, %arg1: i32) -> (i32, i32, i32) {
    %c0_i32 = arith.constant 0 : i32
    %c0_i32_0 = arith.constant 0 : i32
    %c0_i32_1 = arith.constant 0 : i32
    return %arg1, %c0_i32, %c0_i32_0 : i32, i32, i32
  }
  func.func @transform_4(%arg0: i32, %arg1: i32) -> (i32, i32, i32) {
    %c0_i32 = arith.constant 0 : i32
    %c0_i32_0 = arith.constant 0 : i32
    %c0_i32_1 = arith.constant 0 : i32
    return %arg1, %c0_i32, %c0_i32_0 : i32, i32, i32
  }
  func.func @transform_5(%arg0: i32, %arg1: i32) -> (i32, i32, i32) {
    %c0_i32 = arith.constant 0 : i32
    %c0_i32_0 = arith.constant 0 : i32
    %c0_i32_1 = arith.constant 0 : i32
    return %arg1, %c0_i32, %c0_i32_0 : i32, i32, i32
  }
  func.func @transform_6(%arg0: i32, %arg1: i32) -> (i32, i32, i32) {
    %c0_i32 = arith.constant 0 : i32
    %c0_i32_0 = arith.constant 0 : i32
    %c0_i32_1 = arith.constant 0 : i32
    return %arg1, %c0_i32, %c0_i32_0 : i32, i32, i32
  }
  func.func @transform_7(%arg0: i32, %arg1: i32) -> (i32, i32, i32) {
    %c0_i32 = arith.constant 0 : i32
    %c0_i32_0 = arith.constant 0 : i32
    %c0_i32_1 = arith.constant 0 : i32
    return %arg1, %c0_i32, %c0_i32_0 : i32, i32, i32
  }
  func.func @transform_8(%arg0: i32, %arg1: i32) -> (i32, i32, i32) {
    %c0_i32 = arith.constant 0 : i32
    %c0_i32_0 = arith.constant 0 : i32
    %c0_i32_1 = arith.constant 0 : i32
    return %arg1, %c0_i32, %c0_i32_0 : i32, i32, i32
  }
  func.func @transform_9(%arg0: i32, %arg1: i32) -> (i32, i32, i32) {
    %c0_i32 = arith.constant 0 : i32
    %c0_i32_0 = arith.constant 0 : i32
    %c0_i32_1 = arith.constant 0 : i32
    return %arg1, %c0_i32, %c0_i32_0 : i32, i32, i32
  }
  func.func @transform_10(%arg0: i32, %arg1: i32) -> (i32, i32, i32) {
    %c0_i32 = arith.constant 0 : i32
    %c0_i32_0 = arith.constant 0 : i32
    %c0_i32_1 = arith.constant 0 : i32
    return %arg1, %c0_i32, %c0_i32_0 : i32, i32, i32
  }
  func.func @transform_11(%arg0: i32, %arg1: i32) -> (i32, i32, i32) {
    %c0_i32 = arith.constant 0 : i32
    %c0_i32_0 = arith.constant 0 : i32
    %c0_i32_1 = arith.constant 0 : i32
    return %arg1, %c0_i32, %c0_i32_0 : i32, i32, i32
  }
  func.func @transform_12(%arg0: i32, %arg1: i32) -> (i32, i32, i32) {
    %c0_i32 = arith.constant 0 : i32
    %c0_i32_0 = arith.constant 0 : i32
    %c0_i32_1 = arith.constant 0 : i32
    return %arg1, %c0_i32, %c0_i32_0 : i32, i32, i32
  }
  func.func @transform_13(%arg0: i32, %arg1: i32) -> (i32, i32, i32) {
    %c0_i32 = arith.constant 0 : i32
    %c0_i32_0 = arith.constant 0 : i32
    %c0_i32_1 = arith.constant 0 : i32
    return %arg1, %c0_i32, %c0_i32_0 : i32, i32, i32
  }
  func.func @transform_14(%arg0: i32, %arg1: i32) -> (i32, i32, i32) {
    %c0_i32 = arith.constant 0 : i32
    %c0_i32_0 = arith.constant 0 : i32
    %c0_i32_1 = arith.constant 0 : i32
    return %arg1, %c0_i32, %c0_i32_0 : i32, i32, i32
  }
  func.func @transform_15(%arg0: i32, %arg1: i32) -> (i32, i32, i32) {
    %c0_i32 = arith.constant 0 : i32
    %c0_i32_0 = arith.constant 0 : i32
    %c0_i32_1 = arith.constant 0 : i32
    return %arg1, %c0_i32, %c0_i32_0 : i32, i32, i32
  }
  func.func @transform_16(%arg0: i32, %arg1: i32) -> (i32, i32, i32) {
    %c0_i32 = arith.constant 0 : i32
    %c0_i32_0 = arith.constant 0 : i32
    %c0_i32_1 = arith.constant 0 : i32
    return %arg1, %c0_i32, %c0_i32_0 : i32, i32, i32
  }
  func.func @transform_17(%arg0: i32, %arg1: i32) -> (i32, i32, i32) {
    %c0_i32 = arith.constant 0 : i32
    %c0_i32_0 = arith.constant 0 : i32
    %c0_i32_1 = arith.constant 0 : i32
    return %arg1, %c0_i32, %c0_i32_0 : i32, i32, i32
  }
  func.func @transform_18(%arg0: i32, %arg1: i32) -> (i32, i32, i32) {
    %c0_i32 = arith.constant 0 : i32
    %c0_i32_0 = arith.constant 0 : i32
    %c0_i32_1 = arith.constant 0 : i32
    return %arg0, %c0_i32, %c0_i32_0 : i32, i32, i32
  }
}

module attributes {stable_mosaic.version = 11 : i64} {
  func.func @_matmul_bias_kernel(%arg0: i32, %arg1: memref<8x128xbf16, #tpu.memory_space<vmem>>, %arg2: memref<128x32xbf16, #tpu.memory_space<vmem>>, %arg3: memref<1x32xf32, #tpu.memory_space<vmem>>, %arg4: memref<8x32xbf16, #tpu.memory_space<vmem>>) attributes {dimension_semantics = [#tpu.dimension_semantics<parallel>], iteration_bounds = array<i64: 1>, scalar_prefetch = 0 : i64, scratch_operands = 0 : i64, tpu.core_type = #tpu.core_type<tc>, window_params = [{transform_indices = @transform_0, window_bounds = array<i64: 8, 128>}, {pipeline_mode = #tpu.pipeline_mode<synchronous>, transform_indices = @transform_1, window_bounds = array<i64: 128, 32>}, {pipeline_mode = #tpu.pipeline_mode<synchronous>, transform_indices = @transform_2, window_bounds = array<i64: 1, 32>}, {transform_indices = @transform_3, window_bounds = array<i64: 8, 32>}]} {
    %c0 = arith.constant 0 : index
    %c0_0 = arith.constant 0 : index
    %0 = vector.load %arg1[%c0, %c0_0] : memref<8x128xbf16, #tpu.memory_space<vmem>>, vector<8x128xbf16>
    %c0_1 = arith.constant 0 : index
    %c0_2 = arith.constant 0 : index
    %1 = vector.load %arg2[%c0_1, %c0_2] : memref<128x32xbf16, #tpu.memory_space<vmem>>, vector<128x32xbf16>
    %cst = arith.constant dense<0.000000e+00> : vector<8x32xf32>
    %2 = tpu.matmul %0, %1, %cst {dimension_numbers = #tpu.dot_dimension_numbers<[1], [0], [0], [1], [0, 0, 1, 1], [], []>} : vector<8x128xbf16>, vector<128x32xbf16>, vector<8x32xf32> -> vector<8x32xf32>
    %c0_3 = arith.constant 0 : index
    %c0_4 = arith.constant 0 : index
    %3 = vector.load %arg3[%c0_3, %c0_4] : memref<1x32xf32, #tpu.memory_space<vmem>>, vector<1x32xf32>
    %4 = vector.broadcast %3 : vector<1x32xf32> to vector<8x32xf32>
    %5 = arith.addf %2, %4 : vector<8x32xf32>
    %6 = arith.truncf %5 : vector<8x32xf32> to vector<8x32xbf16>
    %c0_5 = arith.constant 0 : index
    %c0_6 = arith.constant 0 : index
    %7 = vector.load %arg4[%c0_5, %c0_6] : memref<8x32xbf16, #tpu.memory_space<vmem>>, vector<8x32xbf16>
    tpu.vector_store %arg4[%c0_5, %c0_6], %6 {strides = array<i32>} : memref<8x32xbf16, #tpu.memory_space<vmem>>, vector<8x32xbf16>,
    return
  }
  func.func @transform_0(%arg0: i32) -> (i32, i32) {
    %c0_i32 = arith.constant 0 : i32
    %c0_i32_0 = arith.constant 0 : i32
    return %arg0, %c0_i32 : i32, i32
  }
  func.func @transform_1(%arg0: i32) -> (i32, i32) {
    %c0_i32 = arith.constant 0 : i32
    %c0_i32_0 = arith.constant 0 : i32
    %c0_i32_1 = arith.constant 0 : i32
    return %c0_i32, %c0_i32_0 : i32, i32
  }
  func.func @transform_2(%arg0: i32) -> (i32, i32) {
    %c0_i32 = arith.constant 0 : i32
    %c0_i32_0 = arith.constant 0 : i32
    %c0_i32_1 = arith.constant 0 : i32
    return %c0_i32, %c0_i32_0 : i32, i32
  }
  func.func @transform_3(%arg0: i32) -> (i32, i32) {
    %c0_i32 = arith.constant 0 : i32
    %c0_i32_0 = arith.constant 0 : i32
    return %arg0, %c0_i32 : i32, i32
  }
}

module attributes {stable_mosaic.version = 11 : i64} {
  func.func @kernel(%arg0: i32, %arg1: i32, %arg2: memref<1x4x32xbf16, #tpu.memory_space<vmem>>, %arg3: memref<4x32xf32, #tpu.memory_space<vmem>>, %arg4: memref<1x1x32xf32, #tpu.memory_space<vmem>>, %arg5: memref<1x1x32xf32, #tpu.memory_space<vmem>>, %arg6: memref<1x32x32xbf16, #tpu.memory_space<vmem>>, %arg7: memref<1x1x32xf32, #tpu.memory_space<vmem>>, %arg8: memref<1x32x32xbf16, #tpu.memory_space<vmem>>, %arg9: memref<1x1x32xf32, #tpu.memory_space<vmem>>, %arg10: memref<1x32x32xbf16, #tpu.memory_space<vmem>>, %arg11: memref<1x1x32xf32, #tpu.memory_space<vmem>>, %arg12: memref<1x32x32xbf16, #tpu.memory_space<vmem>>, %arg13: memref<1x1x32xf32, #tpu.memory_space<vmem>>, %arg14: memref<1x1x32xf32, #tpu.memory_space<vmem>>, %arg15: memref<1x1x32xf32, #tpu.memory_space<vmem>>, %arg16: memref<1x32x64xbf16, #tpu.memory_space<vmem>>, %arg17: memref<1x1x64xf32, #tpu.memory_space<vmem>>, %arg18: memref<1x64x32xbf16, #tpu.memory_space<vmem>>, %arg19: memref<1x1x32xf32, #tpu.memory_space<vmem>>, %arg20: memref<1x4x32xbf16, #tpu.memory_space<vmem>>, %arg21: memref<4x32xf32, #tpu.memory_space<vmem>>) attributes {dimension_semantics = [#tpu.dimension_semantics<parallel>, #tpu.dimension_semantics<arbitrary>], iteration_bounds = array<i64: 2, 2>, scalar_prefetch = 0 : i64, scratch_operands = 1 : i64, tpu.core_type = #tpu.core_type<tc>, window_params = [{transform_indices = @transform_0, window_bounds = array<i64: 1, 4, 32>}, {pipeline_mode = #tpu.pipeline_mode<synchronous>, transform_indices = @transform_1, window_bounds = array<i64: 4, 32>}, {transform_indices = @transform_2, window_bounds = array<i64: 1, 1, 32>}, {transform_indices = @transform_3, window_bounds = array<i64: 1, 1, 32>}, {transform_indices = @transform_4, window_bounds = array<i64: 1, 32, 32>}, {transform_indices = @transform_5, window_bounds = array<i64: 1, 1, 32>}, {transform_indices = @transform_6, window_bounds = array<i64: 1, 32, 32>}, {transform_indices = @transform_7, window_bounds = array<i64: 1, 1, 32>}, {transform_indices = @transform_8, window_bounds = array<i64: 1, 32, 32>}, {transform_indices = @transform_9, window_bounds = array<i64: 1, 1, 32>}, {transform_indices = @transform_10, window_bounds = array<i64: 1, 32, 32>}, {transform_indices = @transform_11, window_bounds = array<i64: 1, 1, 32>}, {transform_indices = @transform_12, window_bounds = array<i64: 1, 1, 32>}, {transform_indices = @transform_13, window_bounds = array<i64: 1, 1, 32>}, {transform_indices = @transform_14, window_bounds = array<i64: 1, 32, 64>}, {transform_indices = @transform_15, window_bounds = array<i64: 1, 1, 64>}, {transform_indices = @transform_16, window_bounds = array<i64: 1, 64, 32>}, {transform_indices = @transform_17, window_bounds = array<i64: 1, 1, 32>}, {transform_indices = @transform_18, window_bounds = array<i64: 1, 4, 32>}]} {
    %c0_i32 = arith.constant 0 : i32
    %0 = arith.cmpi eq, %arg1, %c0_i32 : i32
    %1 = arith.extui %0 : i1 to i32
    %c0_i32_0 = arith.constant 0 : i32
    %2 = arith.cmpi ne, %1, %c0_i32_0 : i32
    scf.if %2 {
      %c0_76 = arith.constant 0 : index
      %c0_77 = arith.constant 0 : index
      %c0_78 = arith.constant 0 : index
      %170 = vector.load %arg2[%c0_76, %c0_77, %c0_78] : memref<1x4x32xbf16, #tpu.memory_space<vmem>>, vector<1x4x32xbf16>
      %171 = vector.shape_cast %170 : vector<1x4x32xbf16> to vector<4x32xbf16>
      %172 = arith.extf %171 : vector<4x32xbf16> to vector<4x32xf32>
      %c0_79 = arith.constant 0 : index
      %c0_80 = arith.constant 0 : index
      %173 = vector.load %arg3[%c0_79, %c0_80] : memref<4x32xf32, #tpu.memory_space<vmem>>, vector<4x32xf32>
      %174 = arith.addf %172, %173 : vector<4x32xf32>
      %c0_81 = arith.constant 0 : index
      %c0_82 = arith.constant 0 : index
      %175 = vector.load %arg21[%c0_81, %c0_82] : memref<4x32xf32, #tpu.memory_space<vmem>>, vector<4x32xf32>
      tpu.vector_store %arg21[%c0_81, %c0_82], %174 {strides = array<i32>} : memref<4x32xf32, #tpu.memory_space<vmem>>, vector<4x32xf32>,
    } else {
    }
    %c0 = arith.constant 0 : index
    %c0_1 = arith.constant 0 : index
    %3 = vector.load %arg21[%c0, %c0_1] : memref<4x32xf32, #tpu.memory_space<vmem>>, vector<4x32xf32>
    %c0_2 = arith.constant 0 : index
    %c0_3 = arith.constant 0 : index
    %c0_4 = arith.constant 0 : index
    %4 = vector.load %arg4[%c0_2, %c0_3, %c0_4] : memref<1x1x32xf32, #tpu.memory_space<vmem>>, vector<1x1x32xf32>
    %5 = vector.shape_cast %4 : vector<1x1x32xf32> to vector<1x32xf32>
    %c0_5 = arith.constant 0 : index
    %c0_6 = arith.constant 0 : index
    %c0_7 = arith.constant 0 : index
    %6 = vector.load %arg5[%c0_5, %c0_6, %c0_7] : memref<1x1x32xf32, #tpu.memory_space<vmem>>, vector<1x1x32xf32>
    %7 = vector.shape_cast %6 : vector<1x1x32xf32> to vector<1x32xf32>
    %cst = arith.constant dense<0.000000e+00> : vector<4xf32>
    %8 = vector.multi_reduction <add>, %3, %cst [1] : vector<4x32xf32> to vector<4xf32>
    %9 = vector.shape_cast %8 : vector<4xf32> to vector<4x1xf32>
    %cst_8 = arith.constant 3.200000e+01 : f32
    %10 = vector.broadcast %cst_8 : f32 to vector<4x1xf32>
    %11 = arith.divf %9, %10 : vector<4x1xf32>
    %12 = vector.broadcast %11 : vector<4x1xf32> to vector<4x32xf32>
    %13 = arith.subf %3, %12 : vector<4x32xf32>
    %14 = arith.mulf %13, %13 : vector<4x32xf32>
    %cst_9 = arith.constant dense<0.000000e+00> : vector<4xf32>
    %15 = vector.multi_reduction <add>, %14, %cst_9 [1] : vector<4x32xf32> to vector<4xf32>
    %16 = vector.shape_cast %15 : vector<4xf32> to vector<4x1xf32>
    %cst_10 = arith.constant 3.200000e+01 : f32
    %17 = vector.broadcast %cst_10 : f32 to vector<4x1xf32>
    %18 = arith.divf %16, %17 : vector<4x1xf32>
    %19 = vector.broadcast %11 : vector<4x1xf32> to vector<4x32xf32>
    %20 = arith.subf %3, %19 : vector<4x32xf32>
    %cst_11 = arith.constant 9.99999974E-6 : f32
    %21 = vector.broadcast %cst_11 : f32 to vector<4x1xf32>
    %22 = arith.addf %18, %21 : vector<4x1xf32>
    %23 = math.rsqrt %22 : vector<4x1xf32>
    %24 = vector.broadcast %23 : vector<4x1xf32> to vector<4x32xf32>
    %25 = arith.mulf %20, %24 : vector<4x32xf32>
    %26 = vector.broadcast %5 : vector<1x32xf32> to vector<4x32xf32>
    %27 = arith.mulf %25, %26 : vector<4x32xf32>
    %28 = vector.broadcast %7 : vector<1x32xf32> to vector<4x32xf32>
    %29 = arith.addf %27, %28 : vector<4x32xf32>
    %30 = arith.truncf %29 : vector<4x32xf32> to vector<4x32xbf16>
    %c0_12 = arith.constant 0 : index
    %c0_13 = arith.constant 0 : index
    %c0_14 = arith.constant 0 : index
    %31 = vector.load %arg6[%c0_12, %c0_13, %c0_14] : memref<1x32x32xbf16, #tpu.memory_space<vmem>>, vector<1x32x32xbf16>
    %32 = vector.shape_cast %31 : vector<1x32x32xbf16> to vector<32x32xbf16>
    %cst_15 = arith.constant dense<0.000000e+00> : vector<4x32xf32>
    %33 = tpu.matmul %30, %32, %cst_15 {dimension_numbers = #tpu.dot_dimension_numbers<[1], [0], [0], [1], [0, 0, 1, 1], [], []>} : vector<4x32xbf16>, vector<32x32xbf16>, vector<4x32xf32> -> vector<4x32xf32>
    %c0_16 = arith.constant 0 : index
    %c0_17 = arith.constant 0 : index
    %c0_18 = arith.constant 0 : index
    %34 = vector.load %arg7[%c0_16, %c0_17, %c0_18] : memref<1x1x32xf32, #tpu.memory_space<vmem>>, vector<1x1x32xf32>
    %35 = vector.shape_cast %34 : vector<1x1x32xf32> to vector<1x32xf32>
    %36 = vector.broadcast %35 : vector<1x32xf32> to vector<4x32xf32>
    %37 = arith.addf %33, %36 : vector<4x32xf32>
    %cst_19 = arith.constant 0.353553385 : f32
    %38 = vector.broadcast %cst_19 : f32 to vector<4x32xf32>
    %39 = arith.mulf %37, %38 : vector<4x32xf32>
    %c0_20 = arith.constant 0 : index
    %c0_21 = arith.constant 0 : index
    %c0_22 = arith.constant 0 : index
    %40 = vector.load %arg8[%c0_20, %c0_21, %c0_22] : memref<1x32x32xbf16, #tpu.memory_space<vmem>>, vector<1x32x32xbf16>
    %41 = vector.shape_cast %40 : vector<1x32x32xbf16> to vector<32x32xbf16>
    %cst_23 = arith.constant dense<0.000000e+00> : vector<4x32xf32>
    %42 = tpu.matmul %30, %41, %cst_23 {dimension_numbers = #tpu.dot_dimension_numbers<[1], [0], [0], [1], [0, 0, 1, 1], [], []>} : vector<4x32xbf16>, vector<32x32xbf16>, vector<4x32xf32> -> vector<4x32xf32>
    %c0_24 = arith.constant 0 : index
    %c0_25 = arith.constant 0 : index
    %c0_26 = arith.constant 0 : index
    %43 = vector.load %arg9[%c0_24, %c0_25, %c0_26] : memref<1x1x32xf32, #tpu.memory_space<vmem>>, vector<1x1x32xf32>
    %44 = vector.shape_cast %43 : vector<1x1x32xf32> to vector<1x32xf32>
    %45 = vector.broadcast %44 : vector<1x32xf32> to vector<4x32xf32>
    %46 = arith.addf %42, %45 : vector<4x32xf32>
    %c0_27 = arith.constant 0 : index
    %c0_28 = arith.constant 0 : index
    %c0_29 = arith.constant 0 : index
    %47 = vector.load %arg10[%c0_27, %c0_28, %c0_29] : memref<1x32x32xbf16, #tpu.memory_space<vmem>>, vector<1x32x32xbf16>
    %48 = vector.shape_cast %47 : vector<1x32x32xbf16> to vector<32x32xbf16>
    %cst_30 = arith.constant dense<0.000000e+00> : vector<4x32xf32>
    %49 = tpu.matmul %30, %48, %cst_30 {dimension_numbers = #tpu.dot_dimension_numbers<[1], [0], [0], [1], [0, 0, 1, 1], [], []>} : vector<4x32xbf16>, vector<32x32xbf16>, vector<4x32xf32> -> vector<4x32xf32>
    %c0_31 = arith.constant 0 : index
    %c0_32 = arith.constant 0 : index
    %c0_33 = arith.constant 0 : index
    %50 = vector.load %arg11[%c0_31, %c0_32, %c0_33] : memref<1x1x32xf32, #tpu.memory_space<vmem>>, vector<1x1x32xf32>
    %51 = vector.shape_cast %50 : vector<1x1x32xf32> to vector<1x32xf32>
    %52 = vector.broadcast %51 : vector<1x32xf32> to vector<4x32xf32>
    %53 = arith.addf %49, %52 : vector<4x32xf32>
    %54 = vector.extract_strided_slice %39 {offsets = [0, 0], sizes = [4, 8], strides = [1, 1]} : vector<4x32xf32> to vector<4x8xf32>
    %55 = vector.extract_strided_slice %39 {offsets = [0, 8], sizes = [4, 8], strides = [1, 1]} : vector<4x32xf32> to vector<4x8xf32>
    %56 = vector.extract_strided_slice %39 {offsets = [0, 16], sizes = [4, 8], strides = [1, 1]} : vector<4x32xf32> to vector<4x8xf32>
    %57 = vector.extract_strided_slice %39 {offsets = [0, 24], sizes = [4, 8], strides = [1, 1]} : vector<4x32xf32> to vector<4x8xf32>
    %58 = vector.shape_cast %54 : vector<4x8xf32> to vector<1x4x8xf32>
    %59 = vector.shape_cast %55 : vector<4x8xf32> to vector<1x4x8xf32>
    %60 = vector.shape_cast %56 : vector<4x8xf32> to vector<1x4x8xf32>
    %61 = vector.shape_cast %57 : vector<4x8xf32> to vector<1x4x8xf32>
    %62 = tpu.concatenate %58, %59, %60, %61 in 0 : vector<1x4x8xf32>, vector<1x4x8xf32>, vector<1x4x8xf32>, vector<1x4x8xf32> -> vector<4x4x8xf32>
    %63 = arith.truncf %62 : vector<4x4x8xf32> to vector<4x4x8xbf16>
    %64 = vector.extract_strided_slice %46 {offsets = [0, 0], sizes = [4, 8], strides = [1, 1]} : vector<4x32xf32> to vector<4x8xf32>
    %65 = vector.extract_strided_slice %46 {offsets = [0, 8], sizes = [4, 8], strides = [1, 1]} : vector<4x32xf32> to vector<4x8xf32>
    %66 = vector.extract_strided_slice %46 {offsets = [0, 16], sizes = [4, 8], strides = [1, 1]} : vector<4x32xf32> to vector<4x8xf32>
    %67 = vector.extract_strided_slice %46 {offsets = [0, 24], sizes = [4, 8], strides = [1, 1]} : vector<4x32xf32> to vector<4x8xf32>
    %68 = vector.shape_cast %64 : vector<4x8xf32> to vector<1x4x8xf32>
    %69 = vector.shape_cast %65 : vector<4x8xf32> to vector<1x4x8xf32>
    %70 = vector.shape_cast %66 : vector<4x8xf32> to vector<1x4x8xf32>
    %71 = vector.shape_cast %67 : vector<4x8xf32> to vector<1x4x8xf32>
    %72 = tpu.concatenate %68, %69, %70, %71 in 0 : vector<1x4x8xf32>, vector<1x4x8xf32>, vector<1x4x8xf32>, vector<1x4x8xf32> -> vector<4x4x8xf32>
    %73 = arith.truncf %72 : vector<4x4x8xf32> to vector<4x4x8xbf16>
    %74 = vector.extract_strided_slice %53 {offsets = [0, 0], sizes = [4, 8], strides = [1, 1]} : vector<4x32xf32> to vector<4x8xf32>
    %75 = vector.extract_strided_slice %53 {offsets = [0, 8], sizes = [4, 8], strides = [1, 1]} : vector<4x32xf32> to vector<4x8xf32>
    %76 = vector.extract_strided_slice %53 {offsets = [0, 16], sizes = [4, 8], strides = [1, 1]} : vector<4x32xf32> to vector<4x8xf32>
    %77 = vector.extract_strided_slice %53 {offsets = [0, 24], sizes = [4, 8], strides = [1, 1]} : vector<4x32xf32> to vector<4x8xf32>
    %78 = vector.shape_cast %74 : vector<4x8xf32> to vector<1x4x8xf32>
    %79 = vector.shape_cast %75 : vector<4x8xf32> to vector<1x4x8xf32>
    %80 = vector.shape_cast %76 : vector<4x8xf32> to vector<1x4x8xf32>
    %81 = vector.shape_cast %77 : vector<4x8xf32> to vector<1x4x8xf32>
    %82 = tpu.concatenate %78, %79, %80, %81 in 0 : vector<1x4x8xf32>, vector<1x4x8xf32>, vector<1x4x8xf32>, vector<1x4x8xf32> -> vector<4x4x8xf32>
    %83 = arith.truncf %82 : vector<4x4x8xf32> to vector<4x4x8xbf16>
    "tpu.trace_start"() <{level = 10 : i32, message = "hqd,hkd->hqk"}> : () -> ()
    %cst_34 = arith.constant dense<0.000000e+00> : vector<4x4x4xf32>
    %84 = tpu.matmul %63, %73, %cst_34 {dimension_numbers = #tpu.dot_dimension_numbers<[2], [2], [1], [1], [0, 0, 0, 1, 1, 1], [0], [0]>} : vector<4x4x8xbf16>, vector<4x4x8xbf16>, vector<4x4x4xf32> -> vector<4x4x4xf32>
    "tpu.trace_stop"() : () -> ()
    %cst_35 = arith.constant dense<0xFF800000> : vector<4x4xf32>
    %85 = vector.multi_reduction <maximumf>, %84, %cst_35 [2] : vector<4x4x4xf32> to vector<4x4xf32>
    %86 = vector.shape_cast %85 : vector<4x4xf32> to vector<4x4x1xf32>
    %87 = vector.broadcast %86 : vector<4x4x1xf32> to vector<4x4x4xf32>
    %88 = arith.subf %84, %87 : vector<4x4x4xf32>
    %89 = math.exp %88 : vector<4x4x4xf32>
    %cst_36 = arith.constant dense<0.000000e+00> : vector<4x4xf32>
    %90 = vector.multi_reduction <add>, %89, %cst_36 [2] : vector<4x4x4xf32> to vector<4x4xf32>
    %91 = vector.shape_cast %90 : vector<4x4xf32> to vector<4x4x1xf32>
    %92 = tpu.reciprocal %91 {approx = true} : vector<4x4x1xf32> -> vector<4x4x1xf32>
    %93 = vector.broadcast %92 : vector<4x4x1xf32> to vector<4x4x4xf32>
    %94 = arith.mulf %89, %93 : vector<4x4x4xf32>
    %95 = arith.truncf %94 : vector<4x4x4xf32> to vector<4x4x4xbf16>
    "tpu.trace_start"() <{level = 10 : i32, message = "hqk,hkd->hqd"}> : () -> ()
    %cst_37 = arith.constant dense<0.000000e+00> : vector<4x4x8xf32>
    %96 = tpu.matmul %95, %83, %cst_37 {dimension_numbers = #tpu.dot_dimension_numbers<[2], [1], [1], [2], [0, 0, 0, 1, 1, 2], [0], [0]>} : vector<4x4x4xbf16>, vector<4x4x8xbf16>, vector<4x4x8xf32> -> vector<4x4x8xf32>
    "tpu.trace_stop"() : () -> ()
    %97 = vector.extract_strided_slice %96 {offsets = [0, 0, 0], sizes = [1, 4, 8], strides = [1, 1, 1]} : vector<4x4x8xf32> to vector<1x4x8xf32>
    %98 = vector.shape_cast %97 : vector<1x4x8xf32> to vector<4x8xf32>
    %99 = vector.extract_strided_slice %96 {offsets = [1, 0, 0], sizes = [1, 4, 8], strides = [1, 1, 1]} : vector<4x4x8xf32> to vector<1x4x8xf32>
    %100 = vector.shape_cast %99 : vector<1x4x8xf32> to vector<4x8xf32>
    %101 = vector.extract_strided_slice %96 {offsets = [2, 0, 0], sizes = [1, 4, 8], strides = [1, 1, 1]} : vector<4x4x8xf32> to vector<1x4x8xf32>
    %102 = vector.shape_cast %101 : vector<1x4x8xf32> to vector<4x8xf32>
    %103 = vector.extract_strided_slice %96 {offsets = [3, 0, 0], sizes = [1, 4, 8], strides = [1, 1, 1]} : vector<4x4x8xf32> to vector<1x4x8xf32>
    %104 = vector.shape_cast %103 : vector<1x4x8xf32> to vector<4x8xf32>
    %105 = tpu.concatenate %98, %100, %102, %104 in 1 : vector<4x8xf32>, vector<4x8xf32>, vector<4x8xf32>, vector<4x8xf32> -> vector<4x32xf32>
    %106 = arith.truncf %105 : vector<4x32xf32> to vector<4x32xbf16>
    %c0_38 = arith.constant 0 : index
    %c0_39 = arith.constant 0 : index
    %c0_40 = arith.constant 0 : index
    %107 = vector.load %arg12[%c0_38, %c0_39, %c0_40] : memref<1x32x32xbf16, #tpu.memory_space<vmem>>, vector<1x32x32xbf16>
    %108 = vector.shape_cast %107 : vector<1x32x32xbf16> to vector<32x32xbf16>
    %cst_41 = arith.constant dense<0.000000e+00> : vector<4x32xf32>
    %109 = tpu.matmul %106, %108, %cst_41 {dimension_numbers = #tpu.dot_dimension_numbers<[1], [0], [0], [1], [0, 0, 1, 1], [], []>} : vector<4x32xbf16>, vector<32x32xbf16>, vector<4x32xf32> -> vector<4x32xf32>
    %c0_42 = arith.constant 0 : index
    %c0_43 = arith.constant 0 : index
    %c0_44 = arith.constant 0 : index
    %110 = vector.load %arg13[%c0_42, %c0_43, %c0_44] : memref<1x1x32xf32, #tpu.memory_space<vmem>>, vector<1x1x32xf32>
    %111 = vector.shape_cast %110 : vector<1x1x32xf32> to vector<1x32xf32>
    %112 = vector.broadcast %111 : vector<1x32xf32> to vector<4x32xf32>
    %113 = arith.addf %109, %112 : vector<4x32xf32>
    %114 = arith.addf %3, %113 : vector<4x32xf32>
    %c0_45 = arith.constant 0 : index
    %c0_46 = arith.constant 0 : index
    %c0_47 = arith.constant 0 : index
    %115 = vector.load %arg14[%c0_45, %c0_46, %c0_47] : memref<1x1x32xf32, #tpu.memory_space<vmem>>, vector<1x1x32xf32>
    %116 = vector.shape_cast %115 : vector<1x1x32xf32> to vector<1x32xf32>
    %c0_48 = arith.constant 0 : index
    %c0_49 = arith.constant 0 : index
    %c0_50 = arith.constant 0 : index
    %117 = vector.load %arg15[%c0_48, %c0_49, %c0_50] : memref<1x1x32xf32, #tpu.memory_space<vmem>>, vector<1x1x32xf32>
    %118 = vector.shape_cast %117 : vector<1x1x32xf32> to vector<1x32xf32>
    %cst_51 = arith.constant dense<0.000000e+00> : vector<4xf32>
    %119 = vector.multi_reduction <add>, %114, %cst_51 [1] : vector<4x32xf32> to vector<4xf32>
    %120 = vector.shape_cast %119 : vector<4xf32> to vector<4x1xf32>
    %cst_52 = arith.constant 3.200000e+01 : f32
    %121 = vector.broadcast %cst_52 : f32 to vector<4x1xf32>
    %122 = arith.divf %120, %121 : vector<4x1xf32>
    %123 = vector.broadcast %122 : vector<4x1xf32> to vector<4x32xf32>
    %124 = arith.subf %114, %123 : vector<4x32xf32>
    %125 = arith.mulf %124, %124 : vector<4x32xf32>
    %cst_53 = arith.constant dense<0.000000e+00> : vector<4xf32>
    %126 = vector.multi_reduction <add>, %125, %cst_53 [1] : vector<4x32xf32> to vector<4xf32>
    %127 = vector.shape_cast %126 : vector<4xf32> to vector<4x1xf32>
    %cst_54 = arith.constant 3.200000e+01 : f32
    %128 = vector.broadcast %cst_54 : f32 to vector<4x1xf32>
    %129 = arith.divf %127, %128 : vector<4x1xf32>
    %130 = vector.broadcast %122 : vector<4x1xf32> to vector<4x32xf32>
    %131 = arith.subf %114, %130 : vector<4x32xf32>
    %cst_55 = arith.constant 9.99999974E-6 : f32
    %132 = vector.broadcast %cst_55 : f32 to vector<4x1xf32>
    %133 = arith.addf %129, %132 : vector<4x1xf32>
    %134 = math.rsqrt %133 : vector<4x1xf32>
    %135 = vector.broadcast %134 : vector<4x1xf32> to vector<4x32xf32>
    %136 = arith.mulf %131, %135 : vector<4x32xf32>
    %137 = vector.broadcast %116 : vector<1x32xf32> to vector<4x32xf32>
    %138 = arith.mulf %136, %137 : vector<4x32xf32>
    %139 = vector.broadcast %118 : vector<1x32xf32> to vector<4x32xf32>
    %140 = arith.addf %138, %139 : vector<4x32xf32>
    %141 = arith.truncf %140 : vector<4x32xf32> to vector<4x32xbf16>
    %c0_56 = arith.constant 0 : index
    %c0_57 = arith.constant 0 : index
    %c0_58 = arith.constant 0 : index
    %142 = vector.load %arg16[%c0_56, %c0_57, %c0_58] : memref<1x32x64xbf16, #tpu.memory_space<vmem>>, vector<1x32x64xbf16>
    %143 = vector.shape_cast %142 : vector<1x32x64xbf16> to vector<32x64xbf16>
    %cst_59 = arith.constant dense<0.000000e+00> : vector<4x64xf32>
    %144 = tpu.matmul %141, %143, %cst_59 {dimension_numbers = #tpu.dot_dimension_numbers<[1], [0], [0], [1], [0, 0, 1, 1], [], []>} : vector<4x32xbf16>, vector<32x64xbf16>, vector<4x64xf32> -> vector<4x64xf32>
    %c0_60 = arith.constant 0 : index
    %c0_61 = arith.constant 0 : index
    %c0_62 = arith.constant 0 : index
    %145 = vector.load %arg17[%c0_60, %c0_61, %c0_62] : memref<1x1x64xf32, #tpu.memory_space<vmem>>, vector<1x1x64xf32>
    %146 = vector.shape_cast %145 : vector<1x1x64xf32> to vector<1x64xf32>
    %147 = vector.broadcast %146 : vector<1x64xf32> to vector<4x64xf32>
    %148 = arith.addf %144, %147 : vector<4x64xf32>
    %cst_63 = arith.constant 5.000000e-01 : f32
    %149 = vector.broadcast %cst_63 : f32 to vector<4x64xf32>
    %150 = arith.mulf %149, %148 : vector<4x64xf32>
    %cst_64 = arith.constant 0.707106769 : f32
    %151 = vector.broadcast %cst_64 : f32 to vector<4x64xf32>
    %152 = arith.mulf %148, %151 : vector<4x64xf32>
    %153 = math.erf %152 : vector<4x64xf32>
    %cst_65 = arith.constant 1.000000e+00 : f32
    %154 = vector.broadcast %cst_65 : f32 to vector<4x64xf32>
    %155 = arith.addf %154, %153 : vector<4x64xf32>
    %156 = arith.mulf %150, %155 : vector<4x64xf32>
    %157 = arith.truncf %156 : vector<4x64xf32> to vector<4x64xbf16>
    %c0_66 = arith.constant 0 : index
    %c0_67 = arith.constant 0 : index
    %c0_68 = arith.constant 0 : index
    %158 = vector.load %arg18[%c0_66, %c0_67, %c0_68] : memref<1x64x32xbf16, #tpu.memory_space<vmem>>, vector<1x64x32xbf16>
    %159 = vector.shape_cast %158 : vector<1x64x32xbf16> to vector<64x32xbf16>
    %cst_69 = arith.constant dense<0.000000e+00> : vector<4x32xf32>
    %160 = tpu.matmul %157, %159, %cst_69 {dimension_numbers = #tpu.dot_dimension_numbers<[1], [0], [0], [1], [0, 0, 1, 1], [], []>} : vector<4x64xbf16>, vector<64x32xbf16>, vector<4x32xf32> -> vector<4x32xf32>
    %c0_70 = arith.constant 0 : index
    %c0_71 = arith.constant 0 : index
    %c0_72 = arith.constant 0 : index
    %161 = vector.load %arg19[%c0_70, %c0_71, %c0_72] : memref<1x1x32xf32, #tpu.memory_space<vmem>>, vector<1x1x32xf32>
    %162 = vector.shape_cast %161 : vector<1x1x32xf32> to vector<1x32xf32>
    %163 = vector.broadcast %162 : vector<1x32xf32> to vector<4x32xf32>
    %164 = arith.addf %160, %163 : vector<4x32xf32>
    %165 = arith.addf %114, %164 : vector<4x32xf32>
    %c0_73 = arith.constant 0 : index
    %c0_74 = arith.constant 0 : index
    %166 = vector.load %arg21[%c0_73, %c0_74] : memref<4x32xf32, #tpu.memory_space<vmem>>, vector<4x32xf32>
    tpu.vector_store %arg21[%c0_73, %c0_74], %165 {strides = array<i32>} : memref<4x32xf32, #tpu.memory_space<vmem>>, vector<4x32xf32>,
    %c1_i32 = arith.constant 1 : i32
    %167 = arith.cmpi eq, %arg1, %c1_i32 : i32
    %168 = arith.extui %167 : i1 to i32
    %c0_i32_75 = arith.constant 0 : i32
    %169 = arith.cmpi ne, %168, %c0_i32_75 : i32
    scf.if %169 {
      %170 = arith.truncf %165 : vector<4x32xf32> to vector<4x32xbf16>
      %c0_76 = arith.constant 0 : index
      %c0_77 = arith.constant 0 : index
      %c0_78 = arith.constant 0 : index
      %171 = vector.load %arg20[%c0_76, %c0_77, %c0_78] : memref<1x4x32xbf16, #tpu.memory_space<vmem>>, vector<1x4x32xbf16>
      %172 = vector.shape_cast %171 : vector<1x4x32xbf16> to vector<4x32xbf16>
      %173 = vector.shape_cast %170 : vector<4x32xbf16> to vector<1x4x32xbf16>
      tpu.vector_store %arg20[%c0_76, %c0_77, %c0_78], %173 {strides = array<i32>} : memref<1x4x32xbf16, #tpu.memory_space<vmem>>, vector<1x4x32xbf16>,
    } else {
    }
    return
  }
  func.func @transform_0(%arg0: i32, %arg1: i32) -> (i32, i32, i32) {
    %c0_i32 = arith.constant 0 : i32
    %c0_i32_0 = arith.constant 0 : i32
    %c0_i32_1 = arith.constant 0 : i32
    return %arg0, %c0_i32, %c0_i32_0 : i32, i32, i32
  }
  func.func @transform_1(%arg0: i32, %arg1: i32) -> (i32, i32) {
    %c0_i32 = arith.constant 0 : i32
    %c0_i32_0 = arith.constant 0 : i32
    %c0_i32_1 = arith.constant 0 : i32
    return %c0_i32, %c0_i32_0 : i32, i32
  }
  func.func @transform_2(%arg0: i32, %arg1: i32) -> (i32, i32, i32) {
    %c0_i32 = arith.constant 0 : i32
    %c0_i32_0 = arith.constant 0 : i32
    %c0_i32_1 = arith.constant 0 : i32
    return %arg1, %c0_i32, %c0_i32_0 : i32, i32, i32
  }
  func.func @transform_3(%arg0: i32, %arg1: i32) -> (i32, i32, i32) {
    %c0_i32 = arith.constant 0 : i32
    %c0_i32_0 = arith.constant 0 : i32
    %c0_i32_1 = arith.constant 0 : i32
    return %arg1, %c0_i32, %c0_i32_0 : i32, i32, i32
  }
  func.func @transform_4(%arg0: i32, %arg1: i32) -> (i32, i32, i32) {
    %c0_i32 = arith.constant 0 : i32
    %c0_i32_0 = arith.constant 0 : i32
    %c0_i32_1 = arith.constant 0 : i32
    return %arg1, %c0_i32, %c0_i32_0 : i32, i32, i32
  }
  func.func @transform_5(%arg0: i32, %arg1: i32) -> (i32, i32, i32) {
    %c0_i32 = arith.constant 0 : i32
    %c0_i32_0 = arith.constant 0 : i32
    %c0_i32_1 = arith.constant 0 : i32
    return %arg1, %c0_i32, %c0_i32_0 : i32, i32, i32
  }
  func.func @transform_6(%arg0: i32, %arg1: i32) -> (i32, i32, i32) {
    %c0_i32 = arith.constant 0 : i32
    %c0_i32_0 = arith.constant 0 : i32
    %c0_i32_1 = arith.constant 0 : i32
    return %arg1, %c0_i32, %c0_i32_0 : i32, i32, i32
  }
  func.func @transform_7(%arg0: i32, %arg1: i32) -> (i32, i32, i32) {
    %c0_i32 = arith.constant 0 : i32
    %c0_i32_0 = arith.constant 0 : i32
    %c0_i32_1 = arith.constant 0 : i32
    return %arg1, %c0_i32, %c0_i32_0 : i32, i32, i32
  }
  func.func @transform_8(%arg0: i32, %arg1: i32) -> (i32, i32, i32) {
    %c0_i32 = arith.constant 0 : i32
    %c0_i32_0 = arith.constant 0 : i32
    %c0_i32_1 = arith.constant 0 : i32
    return %arg1, %c0_i32, %c0_i32_0 : i32, i32, i32
  }
  func.func @transform_9(%arg0: i32, %arg1: i32) -> (i32, i32, i32) {
    %c0_i32 = arith.constant 0 : i32
    %c0_i32_0 = arith.constant 0 : i32
    %c0_i32_1 = arith.constant 0 : i32
    return %arg1, %c0_i32, %c0_i32_0 : i32, i32, i32
  }
  func.func @transform_10(%arg0: i32, %arg1: i32) -> (i32, i32, i32) {
    %c0_i32 = arith.constant 0 : i32
    %c0_i32_0 = arith.constant 0 : i32
    %c0_i32_1 = arith.constant 0 : i32
    return %arg1, %c0_i32, %c0_i32_0 : i32, i32, i32
  }
  func.func @transform_11(%arg0: i32, %arg1: i32) -> (i32, i32, i32) {
    %c0_i32 = arith.constant 0 : i32
    %c0_i32_0 = arith.constant 0 : i32
    %c0_i32_1 = arith.constant 0 : i32
    return %arg1, %c0_i32, %c0_i32_0 : i32, i32, i32
  }
  func.func @transform_12(%arg0: i32, %arg1: i32) -> (i32, i32, i32) {
    %c0_i32 = arith.constant 0 : i32
    %c0_i32_0 = arith.constant 0 : i32
    %c0_i32_1 = arith.constant 0 : i32
    return %arg1, %c0_i32, %c0_i32_0 : i32, i32, i32
  }
  func.func @transform_13(%arg0: i32, %arg1: i32) -> (i32, i32, i32) {
    %c0_i32 = arith.constant 0 : i32
    %c0_i32_0 = arith.constant 0 : i32
    %c0_i32_1 = arith.constant 0 : i32
    return %arg1, %c0_i32, %c0_i32_0 : i32, i32, i32
  }
  func.func @transform_14(%arg0: i32, %arg1: i32) -> (i32, i32, i32) {
    %c0_i32 = arith.constant 0 : i32
    %c0_i32_0 = arith.constant 0 : i32
    %c0_i32_1 = arith.constant 0 : i32
    return %arg1, %c0_i32, %c0_i32_0 : i32, i32, i32
  }
  func.func @transform_15(%arg0: i32, %arg1: i32) -> (i32, i32, i32) {
    %c0_i32 = arith.constant 0 : i32
    %c0_i32_0 = arith.constant 0 : i32
    %c0_i32_1 = arith.constant 0 : i32
    return %arg1, %c0_i32, %c0_i32_0 : i32, i32, i32
  }
  func.func @transform_16(%arg0: i32, %arg1: i32) -> (i32, i32, i32) {
    %c0_i32 = arith.constant 0 : i32
    %c0_i32_0 = arith.constant 0 : i32
    %c0_i32_1 = arith.constant 0 : i32
    return %arg1, %c0_i32, %c0_i32_0 : i32, i32, i32
  }
  func.func @transform_17(%arg0: i32, %arg1: i32) -> (i32, i32, i32) {
    %c0_i32 = arith.constant 0 : i32
    %c0_i32_0 = arith.constant 0 : i32
    %c0_i32_1 = arith.constant 0 : i32
    return %arg1, %c0_i32, %c0_i32_0 : i32, i32, i32
  }
  func.func @transform_18(%arg0: i32, %arg1: i32) -> (i32, i32, i32) {
    %c0_i32 = arith.constant 0 : i32
    %c0_i32_0 = arith.constant 0 : i32
    %c0_i32_1 = arith.constant 0 : i32
    return %arg0, %c0_i32, %c0_i32_0 : i32, i32, i32
  }
}

</mosaic_0001>

<bundles_post_ra>
// kernel: _lambda_.6
= control target key start
LH: loop header
LB: loop body
LE: loop exit
PB: predicated region body
PF: predicated region fallthrough
CT: control target
= control target key end

     0   :  { %s518_s12 = smov 0   ;;  %s558_s0 = inlined_call_operand.vmem [shape: bf16[128,48], index: 0, kind: input, shape index: {}]   ;;  %s559_s1 = inlined_call_operand.vmem [shape: bf16[48,32], index: 1, kind: input, shape index: {}]   ;;  %s560_s2 = inlined_call_operand.vmem [shape: f32[1,32], index: 2, kind: input, shape index: {}]   ;;  %s561_s3 = inlined_call_operand.vmem [shape: bf16[128,32], index: 3, kind: output, shape index: {}]  }
   0x1 LB: > { %s409_s13 = sadd.s32 4294967295, %s496_s12   ;;  %p413_p0 = scmp.ge.s32.totalorder %s496_s12, 1  ;;  %s496_s12 = sphi %s518_s12, %s13_s12  }
   0x2   : > { %p138_p1 = scmp.lt.s32.totalorder %s496_s12, 3 }
   0x4   : > { %p139_p2 = pnand %p413_p0, %p138_p1 }
   0x5   : > { %v483_v0 = vld [vmem:[%s559_s1] sm:$0xff] (!%p139_p2)   ;;  %s414_s16 = sshll.u32 (!%p139_p2), %s409_s13, 3  ;;  %v484_v1 = vld [vmem:[%s559_s1 + $0x8] sm:$0xff] (!%p139_p2)   ;;  %v485_v2 = vld [vmem:[%s559_s1 + $0x10] sm:$0xff] (!%p139_p2)   ;;  %vm234_vm0 = vcmask (!%p139_p2), 392192   ;;  %vm344_vm1 = vcmask (!%p139_p2), 257024  }
   0x6   : > { %142 = sbr.rel (%p139_p2) target bundleno = 238 (0xee), region = 32  ;;  %p163_p3 = scmp.lt.s32.totalorder (!%p139_p2), %s414_s16, 15  ;;  %455 = vmatprep.subr.bf16.mxu0 (!%p139_p2), %v483_v0  ;;  %469 = vmatprep.subr.bf16.mxu1 (!%p139_p2), %v483_v0  ;;  %v418_v7 = vld [vmem:[%s560_s2] ss:$0 sm:$0xff] (!%p139_p2) }
   0x7   : > { %456 = vmatpush3.bf16.msra.mxu0 (!%p139_p2), %v483_v0  ;;  %472 = vmatpush3.bf16.msra.mxu1 (!%p139_p2), %v483_v0 }
   0x8   : > { %457 = vmatprep.subr.bf16.mxu0 (!%p139_p2), %v484_v1  ;;  %470 = vmatprep.subr.bf16.mxu1 (!%p139_p2), %v484_v1 }
   0xb   : > { %458 = vmatpush3.bf16.msra.mxu0 (!%p139_p2), %v484_v1  ;;  %473 = vmatpush3.bf16.msra.mxu1 (!%p139_p2), %v484_v1 }
   0xc   : > { %459 = vmatprep.subr.bf16.mxu0 (!%p139_p2), %v485_v2  ;;  %471 = vmatprep.subr.bf16.mxu1 (!%p139_p2), %v485_v2 }
   0xd   : > { %s563_s16 = smov (!%p163_p3, %s414_s16), 15 }
   0xe   : > { %s415_s21 = sshll.u32 %s563_s16, 2 }
   0xf   : > { %s166_s24 = scalar_lea.vmem %s558_s0, %s415_s21  ;;  %460 = vmatpush3.bf16.msra.mxu0 %v485_v2  ;;  %474 = vmatpush3.bf16.msra.mxu1 %v485_v2  ;;  %s172_s29 = scalar_lea.vmem %s561_s3, %s415_s21 }
  0x10   : > { %v486_v3 = vld [vmem:[%s166_s24] sm:$0xff]   ;;  %v487_v4 = vld [vmem:[%s166_s24 + $0x10] sm:$0xff]   ;;  %v488_v5 = vld [vmem:[%s166_s24 + $0x8] sm:$0xff]  }
  0x11   : > { %461 = vmatprep.mubr.msk.bf16.mxu0 %vm234_vm0, %v486_v3  ;;  %465 = vmatprep.mubr.msk.bf16.mxu1 %vm234_vm0, %v487_v4  ;;  %v489_v6 = vld [vmem:[%s166_s24 + $0x18] sm:$0xff]  }
  0x12   : > { %462 = vmatmul.mubr.msk.bf16.vlgmr.msra.gmra.mrb[0].mxu0 %vm234_vm0, %v488_v5  ;;  %466 = vmatmul.mubr.msk.bf16.vlgmr.msra.gmra.mrb[0].mxu1 %vm234_vm0, %v489_v6 }
  0xe5   : > { %v463_v8 = vpop.f32.mrb[0].mxu0  ;;  %v467_v9 = vpop.f32.mrb[0].mxu1 }
  0xe6   : > { %v290_v10 = vadd.f32 %v463_v8, %v418_v7  ;;  %v306_v11 = vadd.f32 %v467_v9, %v418_v7  ;;  %v281_v12 = vpop.f32.mrb[1].mxu0  ;;  %v297_v13 = vpop.f32.mrb[1].mxu1 }
  0xe7   : > { %v282_v14 = vadd.f32 %v418_v7, %v281_v12  ;;  %v298_v15 = vadd.f32 %v418_v7, %v297_v13  ;;  %v464_v16 = vpop.f32.mrb[2].mxu0  ;;  %v468_v17 = vpop.f32.mrb[2].mxu1 }
  0xe8   : > { %v442_v18 = vpack.c.bf16 %v290_v10, %v290_v10  ;;  %v446_v19 = vpack.c.bf16 %v306_v11, %v306_v11  ;;  %v293_v20 = vadd.f32 %v464_v16, %v418_v7  ;;  %v309_v21 = vadd.f32 %v468_v17, %v418_v7  ;;  %v284_v22 = vpop.f32.mrb[3].mxu0  ;;  %v300_v23 = vpop.f32.mrb[3].mxu1 }
  0xe9   : > { %v440_v24 = vpack.c.bf16 %v282_v14, %v282_v14  ;;  %v444_v25 = vpack.c.bf16 %v298_v15, %v298_v15  ;;  %v285_v26 = vadd.f32 %v418_v7, %v284_v22  ;;  %v301_v27 = vadd.f32 %v418_v7, %v300_v23 }
  0xea   : > { %347 = vst.msk [vmem:[%s172_s29 + $0x8] sm:$0xf] %vm344_vm1, %v442_v18  ;;  %351 = vst.msk [vmem:[%s172_s29 + $0x18] sm:$0xf] %vm344_vm1, %v446_v19  ;;  %v443_v28 = vpack.c.bf16 %v293_v20, %v293_v20  ;;  %v447_v29 = vpack.c.bf16 %v309_v21, %v309_v21 }
  0xeb   : > { %345 = vst.msk [vmem:[%s172_s29] sm:$0xf] %vm344_vm1, %v440_v24  ;;  %349 = vst.msk [vmem:[%s172_s29 + $0x10] sm:$0xf] %vm344_vm1, %v444_v25  ;;  %v441_v30 = vpack.c.bf16 %v285_v26, %v285_v26  ;;  %v445_v31 = vpack.c.bf16 %v301_v27, %v301_v27 }
  0xec   : > { %348 = vst.msk [vmem:[%s172_s29 + $0xc] sm:$0xf] %vm344_vm1, %v443_v28  ;;  %352 = vst.msk [vmem:[%s172_s29 + $0x1c] sm:$0xf] %vm344_vm1, %v447_v29 }
  0xed   : > { %346 = vst.msk [vmem:[%s172_s29 + $0x4] sm:$0xf] %vm344_vm1, %v441_v30  ;;  %350 = vst.msk [vmem:[%s172_s29 + $0x14] sm:$0xf] %vm344_vm1, %v445_v31 }
  0xee PF: > { %s13_s12 = sadd.s32 1, %s496_s12  }
  0xef   : > { %p10_p4 = scmp.ge.s32.totalorder %s13_s12, 4  }
  0xf1   :  { %12 = sbr.rel (!%p10_p4) target bundleno = 1 (0x1), region = 62 }

// kernel: _lambda_.7
= control target key start
LH: loop header
LB: loop body
LE: loop exit
PB: predicated region body
PF: predicated region fallthrough
CT: control target
= control target key end

     0   :  { %s4664_s27 = smov 0   ;;  %s4666_s28 = smov 0   ;;  %s5650_s0 = inlined_call_operand.vmem [shape: bf16[2,64,32], index: 0, kind: input, shape index: {}]   ;;  %s5651_s1 = inlined_call_operand.vmem [shape: f32[64,32], index: 1, kind: input, shape index: {}]   ;;  %s5652_s2 = inlined_call_operand.vmem [shape: f32[2,1,32], index: 2, kind: input, shape index: {}]   ;;  %s5653_s3 = inlined_call_operand.vmem [shape: f32[2,1,32], index: 3, kind: input, shape index: {}]   ;;  %s5654_s4 = inlined_call_operand.vmem [shape: bf16[2,32,32], index: 4, kind: input, shape index: {}]   ;;  %s5655_s5 = inlined_call_operand.vmem [shape: f32[2,1,32], index: 5, kind: input, shape index: {}]   ;;  %s5656_s6 = inlined_call_operand.vmem [shape: bf16[2,32,32], index: 6, kind: input, shape index: {}]   ;;  %s5657_s7 = inlined_call_operand.vmem [shape: f32[2,1,32], index: 7, kind: input, shape index: {}]   ;;  %s5658_s8 = inlined_call_operand.vmem [shape: bf16[2,32,32], index: 8, kind: input, shape index: {}]   ;;  %s5659_s9 = inlined_call_operand.vmem [shape: f32[2,1,32], index: 9, kind: input, shape index: {}]   ;;  %s5660_s10 = inlined_call_operand.vmem [shape: bf16[2,32,32], index: 10, kind: input, shape index: {}]   ;;  %s5661_s11 = inlined_call_operand.vmem [shape: f32[2,1,32], index: 11, kind: input, shape index: {}]   ;;  %s5662_s12 = inlined_call_operand.vmem [shape: f32[2,1,32], index: 12, kind: input, shape index: {}]   ;;  %s5663_s13 = inlined_call_operand.vmem [shape: f32[2,1,32], index: 13, kind: input, shape index: {}]   ;;  %s5664_s14 = inlined_call_operand.vmem [shape: bf16[2,32,64], index: 14, kind: input, shape index: {}]   ;;  %s5665_s15 = inlined_call_operand.vmem [shape: f32[2,1,64], index: 15, kind: input, shape index: {}]   ;;  %s5666_s16 = inlined_call_operand.vmem [shape: bf16[2,64,32], index: 16, kind: input, shape index: {}]   ;;  %s5667_s17 = inlined_call_operand.vmem [shape: f32[2,1,32], index: 17, kind: input, shape index: {}]   ;;  %s5668_s18 = inlined_call_operand.vmem [shape: bf16[2,64,32], index: 18, kind: output, shape index: {}]  }
   0x1   :  { %5675 = sst [smem:[#allocation10_spill]] %s5650_s0  ;;  %s4668_s29 = smov 0  }
   0x2   :  { %5676 = sst [smem:[#allocation11_spill]] %s5651_s1  ;;  %s4670_s30 = smov 0  }
   0x3   :  { %5677 = sst [smem:[#allocation12_spill]] %s5652_s2  ;;  %s4672_s0 = smov 0  }
   0x4   :  { %5678 = sst [smem:[#allocation13_spill]] %s5654_s4 }
   0x5   :  { %5679 = sst [smem:[#allocation14_spill]] %s5656_s6 }
   0x6   :  { %5680 = sst [smem:[#allocation15_spill]] %s5657_s7 }
   0x7   :  { %5681 = sst [smem:[#allocation16_spill]] %s5658_s8 }
   0x8   :  { %5682 = sst [smem:[#allocation17_spill]] %s5660_s10 }
   0x9   :  { %5683 = sst [smem:[#allocation18_spill]] %s5661_s11 }
   0xa   :  { %5684 = sst [smem:[#allocation19_spill]] %s5662_s12 }
   0xb   :  { %5685 = sst [smem:[#allocation20_spill]] %s5666_s16 }
   0xc   :  { %5686 = sst [smem:[#allocation21_spill]] %s5667_s17 }
   0xd   :  { %5687 = sst [smem:[#allocation22_spill]] %s5668_s18 }
   0xe LB: > { %5688 = sst [smem:[#allocation3_spill]] %s4545_s27  ;;  %s37_s19 = sadd.s32 1, %s4553_s29  ;;  %s4561_s0 = sphi %s4672_s0, %s28_s0   ;;  %s4557_s30 = sphi %s4670_s30, %s5728_s30   ;;  %s4553_s29 = sphi %s4668_s29, %s5727_s29   ;;  %s4549_s28 = sphi %s4666_s28, %s5726_s28   ;;  %s4545_s27 = sphi %s4664_s27, %s5725_s27  }
   0xf   : > { %5689 = sst [smem:[#allocation4_spill]] %s4553_s29  ;;  %s40_s1 = sadd.s32 1, %s4557_s30 }
  0x10   : > { %5690 = sst [smem:[#allocation5_spill]] %s4557_s30  ;;  %p38_p0 = scmp.ge.s32.totalorder %s37_s19, 2 }
  0x11   : > { %5691 = sst [smem:[#allocation6_spill]] %s4561_s0  ;;  %p3573_p1 = scmp.ge.s32.totalorder %s4561_s0, 1 }
  0x12   : > { %p664_p2 = scmp.lt.s32.totalorder %s4561_s0, 5  ;;  %s5730_s19 = smov (%p38_p0, %s37_s19), 0 }
  0x13   : > { %5692 = sst [smem:[#allocation7_spill]] %s5730_s19  ;;  %s5732_s1 = smov (!%p38_p0, %s40_s1), %s4557_s30 }
  0x14   : > { %p665_p3 = pnand %p3573_p1, %p664_p2  ;;  %p42_p4 = scmp.ge.s32.totalorder %s5732_s1, 2 }
  0x16   : > { %s5734_s1 = smov (%p42_p4, %s5732_s1), 0  ;;  %668 = sbr.rel (%p665_p3) target bundleno = 2697 (0xa89), region = 92 }
  0x17   : > { %5693 = sst [smem:[#allocation8_spill]] %s5734_s1 }
  0x1d   : > { %p778_p5 = scmp.lt.s32.totalorder %s4549_s28, 1  ;;  %p783_p6 = scmp.lt.s32.totalorder %s4545_s27, 1 }
  0x1e   : > { %s5694_s23 = sld [smem:[#allocation10_spill]]  ;;  %s5697_s4 = sld [smem:[#allocation13_spill]] }
  0x1f   : > { %s5736_s28 = smov (!%p778_p5, %s4549_s28), 1  ;;  %s5698_s6 = sld [smem:[#allocation14_spill]] }
  0x20   : > { %s4698_s20 = scalar_select %p783_p6, %s4545_s27, 1 }
  0x21   : > { %s3682_s21 = sshll.u32 %s5736_s28, 5  ;;  %s5700_s8 = sld [smem:[#allocation16_spill]] }
  0x22   : > { %s3683_s27 = sshll.u32 %s4698_s20, 4  ;;  %s5701_s10 = sld [smem:[#allocation17_spill]] }
  0x23   : > { %s4761_s18 = scalar_lea.vmem %s5664_s14, %s3683_s27  ;;  %s5705_s29 = sld [smem:[#allocation20_spill]] }
  0x24   : > { %s4703_s24 = scalar_lea.vmem %s5694_s23, %s3682_s21  ;;  %s4717_s28 = scalar_lea.vmem %s5697_s4, %s3683_s27 }
  0x25   : > { %5695 = sst [smem:[#allocation9_spill]] %s4703_s24  ;;  %s4726_s25 = scalar_lea.vmem %s5698_s6, %s3683_s27 }
  0x26   : > { %s834_s4 = scalar_lea.vmem %s5665_s15, %s4698_s20  ;;  %s5704_s6 = sld [smem:[#allocation21_spill]] }
  0x27   : > { %s4735_s19 = scalar_lea.vmem %s5700_s8, %s3683_s27  ;;  %s5706_s8 = sld [smem:[#allocation22_spill]] }
  0x28   : > { %s4744_s23 = scalar_lea.vmem %s5701_s10, %s3683_s27  ;;  %s3688_s10 = sshll.u32 %s4698_s20, 5 }
  0x29   : > { %s4775_s12 = scalar_lea.vmem %s5705_s29, %s3688_s10  ;;  %s5707_s27 = sld [smem:[#allocation3_spill]] }
  0x2c   : > { %s842_s11 = scalar_lea.vmem %s5704_s6, %s4698_s20 }
  0x2d   : > { %s4780_s7 = scalar_lea.vmem %s5706_s8, %s3682_s21 }
  0x2f   : > { %p3590_p7 = scmp.ne.s32.totalorder %s5707_s27, 0 }
  0x30   : > { %s5708_s16 = sld [smem:[#allocation9_spill]] (!%p3590_p7)  ;;  %s5709_s6 = sld [smem:[#allocation11_spill]] (!%p3590_p7)  ;;  %vm885_vm0 = vcmask (!%p3590_p7), 261120  }
  0x31   : > { %852 = sbr.rel (%p3590_p7) target bundleno = 63 (0x3f), region = 96 }
  0x36   : > { %v3699_v0 = vld [vmem:[%s5708_s16] sm:$0xff] (!%p3590_p7)   ;;  %v870_v2 = vld [vmem:[%s5709_s6 + $0x8] sm:$0xff] (!%p3590_p7)  ;;  %v871_v6 = vld [vmem:[%s5709_s6 + $0x10] sm:$0xff] (!%p3590_p7) }
  0x37   : > { %v869_v1 = vld [vmem:[%s5709_s6] sm:$0xff] (!%p3590_p7)  ;;  %v3700_v3 = vunpack.c.l.bf16 (!%p3590_p7), %v3699_v0  ;;  %v3701_v4 = vunpack.c.h.bf16 (!%p3590_p7), %v3699_v0  ;;  %v3714_v5 = vld [vmem:[%s5708_s16 + $0x8] sm:$0xff] (!%p3590_p7)   ;;  %v872_v7 = vld [vmem:[%s5709_s6 + $0x18] sm:$0xff] (!%p3590_p7) }
  0x38   : > { %v3704_v8 = vunpack.c.l.bf16 %v3714_v5  ;;  %v3705_v9 = vunpack.c.h.bf16 %v3714_v5  ;;  %v3715_v10 = vld [vmem:[%s5708_s16 + $0x10] sm:$0xff]   ;;  %v873_v11 = vld [vmem:[%s5709_s6 + $0x20] sm:$0xff]  ;;  %v874_v12 = vld [vmem:[%s5709_s6 + $0x28] sm:$0xff] }
  0x39   : > { %v877_v13 = vadd.f32 %v3700_v3, %v869_v1  ;;  %v878_v14 = vadd.f32 %v3701_v4, %v870_v2  ;;  %v3708_v15 = vunpack.c.l.bf16 %v3715_v10  ;;  %v3709_v16 = vunpack.c.h.bf16 %v3715_v10  ;;  %v3716_v17 = vld [vmem:[%s5708_s16 + $0x18] sm:$0xff]   ;;  %v875_v18 = vld [vmem:[%s5709_s6 + $0x30] sm:$0xff] }
  0x3a   : > { %v876_v19 = vld [vmem:[%s5709_s6 + $0x38] sm:$0xff]  ;;  %v879_v20 = vadd.f32 %v3704_v8, %v871_v6  ;;  %v880_v21 = vadd.f32 %v3705_v9, %v872_v7  ;;  %v3712_v22 = vunpack.c.l.bf16 %v3716_v17  ;;  %v3713_v23 = vunpack.c.h.bf16 %v3716_v17 }
  0x3b   : > { %886 = vst.msk [vmem:[#allocation2] sm:$0xff] %vm885_vm0, %v877_v13  ;;  %887 = vst.msk [vmem:[#allocation2 + $0x8] sm:$0xff] %vm885_vm0, %v878_v14  ;;  %v881_v24 = vadd.f32 %v3708_v15, %v873_v11  ;;  %v882_v25 = vadd.f32 %v3709_v16, %v874_v12 }
  0x3c   : > { %888 = vst.msk [vmem:[#allocation2 + $0x10] sm:$0xff] %vm885_vm0, %v879_v20  ;;  %889 = vst.msk [vmem:[#allocation2 + $0x18] sm:$0xff] %vm885_vm0, %v880_v21  ;;  %v883_v26 = vadd.f32 %v3712_v22, %v875_v18  ;;  %v884_v27 = vadd.f32 %v3713_v23, %v876_v19 }
  0x3d   : > { %890 = vst.msk [vmem:[#allocation2 + $0x20] sm:$0xff] %vm885_vm0, %v881_v24  ;;  %891 = vst.msk [vmem:[#allocation2 + $0x28] sm:$0xff] %vm885_vm0, %v882_v25 }
  0x3e   : > { %892 = vst.msk [vmem:[#allocation2 + $0x30] sm:$0xff] %vm885_vm0, %v883_v26  ;;  %893 = vst.msk [vmem:[#allocation2 + $0x38] sm:$0xff] %vm885_vm0, %v884_v27 }
  0x3f PF: > { %vm904_vm1 = vcmask 261120   ;;  %v4325_v20 = vld [vmem:[%s4717_s28] sm:$0xff]   ;;  %v4327_v22 = vld [vmem:[%s4717_s28 + $0x8] sm:$0xff]   ;;  %s5710_s16 = sld [smem:[#allocation12_spill]]  ;;  %s5712_s21 = scalar_lea.vmem %s5653_s3, %s4698_s20  ;;  %vm1614_vm2 = vcmask 64512   ;;  %vm1971_vm3 = vcmask 523264  }
  0x40   : > { %v4326_v21 = vld [vmem:[%s4726_s25] sm:$0xff]   ;;  %3819 = vmatprep.subr.bf16.mxu0 %v4325_v20  ;;  %v4328_v23 = vld [vmem:[%s4726_s25 + $0x8] sm:$0xff]   ;;  %s5713_s1 = scalar_lea.vmem %s5655_s5, %s4698_s20  ;;  %s5714_s30 = sld [smem:[#allocation15_spill]]  ;;  %vm2752_vm4 = vcmask 130048   ;;  %vm2761_vm5 = vcmask 195584  }
  0x41   : > { %3831 = vmatprep.subr.bf16.mxu1 %v4326_v21  ;;  %3820 = vmatpush3.bf16.msra.mxu0 %v4325_v20  ;;  %v4872_v24 = vld [vmem:[%s4735_s19] sm:$0xff]   ;;  %s4563_s22 = smov 120   ;;  %s4564_s2 = smov 112  }
  0x42   : > { %v894_v28 = vld [vmem:[#allocation2] sm:$0xff]  ;;  %v895_v30 = vld [vmem:[#allocation2 + $0x8] sm:$0xff]  ;;  %3832 = vmatpush3.bf16.msra.mxu1 %v4326_v21  ;;  %3821 = vmatprep.subr.bf16.mxu0 %v4327_v22  ;;  %s4565_s17 = smov 104   ;;  %s4567_s8 = smov 16  }
  0x43   : > { %v896_v29 = vld [vmem:[#allocation2 + $0x10] sm:$0xff]  ;;  %v905_v31 = vsel %vm904_vm1, %v894_v28, 0.0  ;;  %v897_v33 = vld [vmem:[#allocation2 + $0x18] sm:$0xff]  ;;  %v908_v36 = vsel %vm904_vm1, %v895_v30, 0.0  ;;  %3833 = vmatprep.subr.bf16.mxu1 %v4328_v23  ;;  %s5719_s26 = sld [smem:[#allocation19_spill]] }
  0x44   : > { %v911_v32 = vsel %vm904_vm1, %v896_v29, 0.0  ;;  %v898_v34 = vld [vmem:[#allocation2 + $0x20] sm:$0xff]  ;;  %v899_v35 = vld [vmem:[#allocation2 + $0x28] sm:$0xff]  ;;  %906 = vadd.xlane.f32.xlu0 %v905_v31  ;;  %v914_v37 = vsel %vm904_vm1, %v897_v33, 0.0 }
  0x45   : > { %912 = vadd.xlane.f32.xlu1 %v911_v32  ;;  %v917_v38 = vsel %vm904_vm1, %v898_v34, 0.0  ;;  %v920_v39 = vsel %vm904_vm1, %v899_v35, 0.0  ;;  %v900_v40 = vld [vmem:[#allocation2 + $0x30] sm:$0xff]  ;;  %v901_v41 = vld [vmem:[#allocation2 + $0x38] sm:$0xff]  ;;  %3822 = vmatpush3.bf16.msra.mxu0 %v4327_v22  ;;  %s5711_s24 = scalar_lea.vmem %s5710_s16, %s4698_s20  ;;  %s5716_s16 = scalar_lea.vmem %s5659_s9, %s4698_s20 }
  0x46   : > { %v923_v42 = vsel %vm904_vm1, %v900_v40, 0.0  ;;  %v926_v43 = vsel %vm904_vm1, %v901_v41, 0.0  ;;  %3834 = vmatpush3.bf16.msra.mxu1 %v4328_v23  ;;  %3843 = vmatprep.subr.bf16.mxu0 %v4872_v24  ;;  %s5715_s27 = scalar_lea.vmem %s5714_s30, %s4698_s20 }
  0x48   : > { %909 = vadd.xlane.f32.xlu0 %v908_v36 }
  0x49   : > { %915 = vadd.xlane.f32.xlu1 %v914_v37  ;;  %s5720_s0 = scalar_lea.vmem %s5719_s26, %s4698_s20 }
  0x4c   : > { %918 = vadd.xlane.f32.xlu0 %v917_v38 }
  0x4d   : > { %921 = vadd.xlane.f32.xlu1 %v920_v39 }
  0x50   : > { %924 = vadd.xlane.f32.xlu0 %v923_v42 }
  0x51   : > { %927 = vadd.xlane.f32.xlu1 %v926_v43 }
  0xd1   : > { %v907_v44 = vpop.xlane.xlu0 %906 }
  0xd2   : > { %v913_v45 = vpop.xlane.xlu1 %912  ;;  %v930_v46 = vmul.f32 0.03125, %v907_v44 }
  0xd3   : > { %v932_v47 = vmul.f32 0.03125, %v913_v45 }
  0xd4   : > { %v4827_v48 = vsub.f32 %v894_v28, %v930_v46 }
  0xd5   : > { %v4829_v49 = vsub.f32 %v896_v29, %v932_v47  ;;  %v910_v50 = vpop.xlane.xlu0 %909 }
  0xd6   : > { %v916_v51 = vpop.xlane.xlu1 %915  ;;  %v931_v52 = vmul.f32 0.03125, %v910_v50  ;;  %v946_v54 = vmul.f32 %v4827_v48, %v4827_v48 }
  0xd7   : > { %v933_v53 = vmul.f32 0.03125, %v916_v51  ;;  %v948_v55 = vmul.f32 %v4829_v49, %v4829_v49 }
  0xd8   : > { %v4835_v56 = vsub.f32 %v895_v30, %v931_v52  ;;  %v954_v58 = vsel %vm904_vm1, %v946_v54, 0.0  ;;  %v3591_v52 = vld [vmem:[%s5711_s24] ss:$0 sm:$0xff]  ;;  %s4566_s24 = smov 8  }
  0xd9   : > { %v4837_v57 = vsub.f32 %v897_v33, %v933_v53  ;;  %955 = vadd.xlane.f32.xlu0 %v954_v58  ;;  %v919_v59 = vpop.xlane.xlu0 %918  ;;  %v960_v61 = vsel %vm904_vm1, %v948_v55, 0.0 }
  0xda   : > { %v922_v60 = vpop.xlane.xlu1 %921  ;;  %v934_v62 = vmul.f32 0.03125, %v919_v59  ;;  %v947_v0 = vmul.f32 %v4835_v56, %v4835_v56 }
  0xdb   : > { %v935_v63 = vmul.f32 0.03125, %v922_v60  ;;  %v949_v1 = vmul.f32 %v4837_v57, %v4837_v57 }
  0xdc   : > { %v4845_v2 = vsub.f32 %v898_v34, %v934_v62  ;;  %v957_v4 = vsel %vm904_vm1, %v947_v0, 0.0 }
  0xdd   : > { %v4847_v3 = vsub.f32 %v899_v35, %v935_v63  ;;  %961 = vadd.xlane.f32.xlu0 %v960_v61  ;;  %958 = vadd.xlane.f32.xlu1 %v957_v4  ;;  %v925_v5 = vpop.xlane.xlu0 %924  ;;  %v963_v7 = vsel %vm904_vm1, %v949_v1, 0.0 }
  0xde   : > { %v928_v6 = vpop.xlane.xlu1 %927  ;;  %v936_v8 = vmul.f32 0.03125, %v925_v5  ;;  %v950_v10 = vmul.f32 %v4845_v2, %v4845_v2 }
  0xdf   : > { %v937_v9 = vmul.f32 0.03125, %v928_v6  ;;  %v951_v11 = vmul.f32 %v4847_v3, %v4847_v3 }
  0xe0   : > { %v4855_v12 = vsub.f32 %v900_v40, %v936_v8  ;;  %v966_v14 = vsel %vm904_vm1, %v950_v10, 0.0 }
  0xe1   : > { %v4857_v13 = vsub.f32 %v901_v41, %v937_v9  ;;  %964 = vadd.xlane.f32.xlu1 %v963_v7  ;;  %967 = vadd.xlane.f32.xlu0 %v966_v14  ;;  %v969_v15 = vsel %vm904_vm1, %v951_v11, 0.0 }
  0xe2   : > { %v952_v16 = vmul.f32 %v4855_v12, %v4855_v12 }
  0xe3   : > { %v953_v17 = vmul.f32 %v4857_v13, %v4857_v13 }
  0xe4   : > { %v972_v18 = vsel %vm904_vm1, %v952_v16, 0.0 }
  0xe5   : > { %970 = vadd.xlane.f32.xlu1 %v969_v15  ;;  %973 = vadd.xlane.f32.xlu0 %v972_v18  ;;  %v975_v19 = vsel %vm904_vm1, %v953_v17, 0.0  ;;  %v4330_v17 = vld [vmem:[%s4735_s19 + $0x8] sm:$0xff]   ;;  %s5717_s19 = sld [smem:[#allocation18_spill]] }
  0xe9   : > { %976 = vadd.xlane.f32.xlu1 %v975_v19 }
  0xeb   : > { %s5718_s29 = scalar_lea.vmem %s5717_s19, %s4698_s20 }
 0x166   : > { %v956_v25 = vpop.xlane.xlu0 %955 }
 0x167   : > { %v978_v26 = vmul.f32 0.03125, %v956_v25 }
 0x169   : > { %v986_v27 = vadd.f32 1e-05, %v978_v26 }
 0x16a   : > { %v959_v28 = vpop.xlane.xlu1 %958  ;;  %v962_v29 = vpop.xlane.xlu0 %961 }
 0x16b   : > { %4339 = vrsqrt.f32 %v986_v27  ;;  %v979_v30 = vmul.f32 0.03125, %v959_v28  ;;  %v980_v31 = vmul.f32 0.03125, %v962_v29  ;;  %v3600_v27 = vld [vmem:[%s5715_s27] ss:$0 sm:$0xff] }
 0x16d   : > { %v987_v32 = vadd.f32 1e-05, %v979_v30  ;;  %v988_v33 = vadd.f32 1e-05, %v980_v31 }
 0x16e   : > { %v965_v34 = vpop.xlane.xlu1 %964  ;;  %v968_v35 = vpop.xlane.xlu0 %967 }
 0x16f   : > { %4341 = vrsqrt.f32 %v987_v32  ;;  %v981_v36 = vmul.f32 0.03125, %v965_v34  ;;  %v982_v37 = vmul.f32 0.03125, %v968_v35 }
 0x170   : > { %4343 = vrsqrt.f32 %v988_v33 }
 0x171   : > { %v989_v38 = vadd.f32 1e-05, %v981_v36  ;;  %v990_v39 = vadd.f32 1e-05, %v982_v37 }
 0x172   : > { %v971_v40 = vpop.xlane.xlu1 %970  ;;  %v974_v41 = vpop.xlane.xlu0 %973 }
 0x173   : > { %4345 = vrsqrt.f32 %v989_v38  ;;  %v983_v42 = vmul.f32 0.03125, %v971_v40  ;;  %v984_v43 = vmul.f32 0.03125, %v974_v41 }
 0x174   : > { %4347 = vrsqrt.f32 %v990_v39 }
 0x175   : > { %v4340_v44 = vpop.eup %4339  ;;  %v991_v45 = vadd.f32 1e-05, %v983_v42  ;;  %v992_v46 = vadd.f32 1e-05, %v984_v43 }
 0x176   : > { %v977_v47 = vpop.xlane.xlu1 %976  ;;  %v1002_v50 = vmul.f32 %v4340_v44, %v4827_v48  ;;  %v3592_v48 = vld [vmem:[%s5712_s21] ss:$0 sm:$0xff] }
 0x177   : > { %4349 = vrsqrt.f32 %v991_v45  ;;  %v985_v51 = vmul.f32 0.03125, %v977_v47 }
 0x178   : > { %4351 = vrsqrt.f32 %v992_v46  ;;  %v1016_v59 = vmul.f32 %v3591_v52, %v1002_v50 }
 0x179   : > { %v4342_v53 = vpop.eup %4341  ;;  %v993_v54 = vadd.f32 1e-05, %v985_v51 }
 0x17a   : > { %v4344_v55 = vpop.eup %4343  ;;  %v1003_v58 = vmul.f32 %v4342_v53, %v4835_v56  ;;  %v1030_v0 = vadd.f32 %v3592_v48, %v1016_v59 }
 0x17b   : > { %4353 = vrsqrt.f32 %v993_v54  ;;  %v1004_v60 = vmul.f32 %v4344_v55, %v4829_v49 }
 0x17c   : > { %v1017_v61 = vmul.f32 %v3591_v52, %v1003_v58 }
 0x17d   : > { %v4346_v62 = vpop.eup %4345  ;;  %v1018_v5 = vmul.f32 %v3591_v52, %v1004_v60 }
 0x17e   : > { %v4348_v63 = vpop.eup %4347  ;;  %v1031_v1 = vadd.f32 %v3592_v48, %v1017_v61  ;;  %v1005_v4 = vmul.f32 %v4346_v62, %v4837_v57 }
 0x17f   : > { %v1006_v56 = vmul.f32 %v4348_v63, %v4845_v2  ;;  %v1032_v49 = vadd.f32 %v3592_v48, %v1018_v5 }
 0x180   : > { %v1038_v6 = vpack.c.bf16 %v1031_v1, %v1030_v0  ;;  %v1019_v7 = vmul.f32 %v3591_v52, %v1005_v4 }
 0x181   : > { %v4350_v8 = vpop.eup %4349  ;;  %v1020_v9 = vmul.f32 %v3591_v52, %v1006_v56 }
 0x182   : > { %v4352_v10 = vpop.eup %4351  ;;  %3823 = vmatprep.mubr.msk.bf16.mxu0 %vm904_vm1, %v1038_v6  ;;  %3835 = vmatprep.mubr.msk.bf16.mxu1 %vm904_vm1, %v1038_v6  ;;  %v1033_v11 = vadd.f32 %v3592_v48, %v1019_v7  ;;  %v1007_v14 = vmul.f32 %v4350_v8, %v4847_v3 }
 0x183   : > { %v1008_v15 = vmul.f32 %v4352_v10, %v4855_v12  ;;  %v1034_v2 = vadd.f32 %v3592_v48, %v1020_v9 }
 0x184   : > { %v1039_v57 = vpack.c.bf16 %v1033_v11, %v1032_v49  ;;  %v1021_v16 = vmul.f32 %v3591_v52, %v1007_v14 }
 0x185   : > { %v4354_v18 = vpop.eup %4353  ;;  %v1022_v21 = vmul.f32 %v3591_v52, %v1008_v15 }
 0x186   : > { %3824 = vmatmul.mubr.msk.bf16.vlgmr.msra.gmra.mrb[0].mxu0 %vm904_vm1, %v1039_v57  ;;  %3836 = vmatmul.mubr.msk.bf16.vlgmr.msra.gmra.mrb[0].mxu1 %vm904_vm1, %v1039_v57  ;;  %v1035_v19 = vadd.f32 %v3592_v48, %v1021_v16  ;;  %v1009_v20 = vmul.f32 %v4354_v18, %v4857_v13  ;;  %v3593_v13 = vld [vmem:[%s5713_s1] ss:$0 sm:$0xff] }
 0x187   : > { %3844 = vmatpush3.bf16.msra.mxu0 %v4872_v24  ;;  %v1036_v12 = vadd.f32 %v3592_v48, %v1022_v21 }
 0x188   : > { %v1040_v22 = vpack.c.bf16 %v1035_v19, %v1034_v2  ;;  %v1023_v3 = vmul.f32 %v3591_v52, %v1009_v20  ;;  %3845 = vmatprep.subr.bf16.mxu0 %v4330_v17  ;;  %v3607_v20 = vld [vmem:[%s5716_s16] ss:$0 sm:$0xff] }
 0x18a   : > { %3827 = vmatprep.mubr.msk.bf16.mxu0 %vm904_vm1, %v1040_v22  ;;  %3839 = vmatprep.mubr.msk.bf16.mxu1 %vm904_vm1, %v1040_v22  ;;  %v1037_v23 = vadd.f32 %v3592_v48, %v1023_v3 }
 0x18b   : > { %3846 = vmatpush3.bf16.msra.mxu0 %v4330_v17 }
 0x18c   : > { %v1041_v25 = vpack.c.bf16 %v1037_v23, %v1036_v12 }
 0x18e   : > { %3828 = vmatmul.mubr.msk.bf16.gmra.mrb[4].mxu0 %vm904_vm1, %v1041_v25  ;;  %3840 = vmatmul.mubr.msk.bf16.gmra.mrb[4].mxu1 %vm904_vm1, %v1041_v25 }
 0x18f   : > { %3847 = vmatprep.mubr.msk.bf16.mxu0 %vm904_vm1, %v1038_v6 }
 0x196   : > { %3848 = vmatmul.mubr.msk.bf16.vlgmr.msra.gmra.mrb[8].mxu0 %vm904_vm1, %v1039_v57 }
 0x197   : > { %3851 = vmatprep.mubr.msk.bf16.mxu0 %vm904_vm1, %v1040_v22 }
 0x19e   : > { %3852 = vmatmul.mubr.msk.bf16.gmra.mrb[12].mxu0 %vm904_vm1, %v1041_v25 }
 0x259   : > { %v3825_v24 = vpop.f32.mrb[0].mxu0  ;;  %v3837_v26 = vpop.f32.mrb[0].mxu1 }
 0x25a   : > { %v1120_v28 = vadd.f32 %v3825_v24, %v3593_v13  ;;  %v1111_v29 = vpop.f32.mrb[1].mxu0  ;;  %v1207_v30 = vpop.f32.mrb[1].mxu1  ;;  %v1216_v34 = vadd.f32 %v3837_v26, %v3600_v27 }
 0x25b   : > { %v1112_v31 = vadd.f32 %v3593_v13, %v1111_v29  ;;  %v3826_v32 = vpop.f32.mrb[2].mxu0  ;;  %v3838_v33 = vpop.f32.mrb[2].mxu1  ;;  %v1208_v35 = vadd.f32 %v3600_v27, %v1207_v30 }
 0x25c   : > { %v1123_v36 = vadd.f32 %v3826_v32, %v3593_v13  ;;  %v1219_v37 = vadd.f32 %v3838_v33, %v3600_v27  ;;  %v1114_v38 = vpop.f32.mrb[3].mxu0  ;;  %v1210_v39 = vpop.f32.mrb[3].mxu1  ;;  %v4917_v40 = vmul.f32 0.35355338, %v1120_v28 }
 0x25d   : > { %v1142_v41 = vmul.f32 0.35355338, %v1112_v31  ;;  %v1115_v42 = vadd.f32 %v3593_v13, %v1114_v38  ;;  %v1211_v43 = vadd.f32 %v3600_v27, %v1210_v39 }
 0x25e   : > { %v4919_v44 = vmul.f32 0.35355338, %v1123_v36  ;;  %v4921_v45 = vpack.i.bf16 %v1219_v37, %v1216_v34  ;;  %v1503_v46 = vpack.c.bf16 %v1219_v37, %v1216_v34 }
 0x25f   : > { %v1143_v47 = vmul.f32 0.35355338, %v1115_v42  ;;  %v4085_v50 = vpack.i.bf16 %v1211_v43, %v1208_v35  ;;  %v1502_v51 = vpack.c.bf16 %v1211_v43, %v1208_v35 }
 0x260   : > { %v1407_v52 = vpack.c.bf16 %v4919_v44, %v4917_v40  ;;  %4091 = vrot.lane.b32.xlu1 %v4921_v45, %s4563_s22  ;;  %v4929_v53 = vpack.i.bf16 %v4919_v44, %v4917_v40  ;;  %v1631_v21 = vsel %vm1614_vm2, %v1503_v46, 0 }
 0x261   : > { %4086 = vrot.lane.b32.xlu0 %v4085_v50, %s4563_s22  ;;  %v3829_v54 = vpop.f32.mrb[4].mxu0  ;;  %v3841_v55 = vpop.f32.mrb[4].mxu1  ;;  %4023 = vmatprep.subr.msk.bf16.mxu1 %vm1614_vm2, %v1502_v51  ;;  %v1628_v58 = vsel %vm1614_vm2, %v1502_v51, 0  ;;  %v1406_v59 = vpack.c.bf16 %v1143_v47, %v1142_v41  ;;  %v4934_v48 = vpack.i.bf16 %v1143_v47, %v1142_v41 }
 0x262   : > { %v1136_v60 = vadd.f32 %v3829_v54, %v3593_v13  ;;  %v1127_v61 = vpop.f32.mrb[5].mxu0  ;;  %v1223_v62 = vpop.f32.mrb[5].mxu1  ;;  %3856 = vmatpush3.bf16.xpose.msra.mxu1 %v1628_v58  ;;  %v1232_v63 = vadd.f32 %v3841_v55, %v3600_v27 }
 0x263   : > { %v1128_v0 = vadd.f32 %v3593_v13, %v1127_v61  ;;  %v3830_v1 = vpop.f32.mrb[6].mxu0  ;;  %v3842_v4 = vpop.f32.mrb[6].mxu1  ;;  %4024 = vmatprep.subr.msk.bf16.mxu1 %vm1614_vm2, %v1503_v46  ;;  %3863 = vmatprep.mubr.msk.bf16.mxu1 %vm1614_vm2, %v1406_v59  ;;  %v1224_v5 = vadd.f32 %v3600_v27, %v1223_v62 }
 0x264   : > { %v1139_v56 = vadd.f32 %v3830_v1, %v3593_v13  ;;  %v1235_v6 = vadd.f32 %v3842_v4, %v3600_v27  ;;  %v1130_v7 = vpop.f32.mrb[7].mxu0  ;;  %v1226_v8 = vpop.f32.mrb[7].mxu1  ;;  %v4938_v9 = vmul.f32 0.35355338, %v1136_v60 }
 0x265   : > { %v4940_v10 = vmul.f32 0.35355338, %v1128_v0  ;;  %v1131_v49 = vadd.f32 %v3593_v13, %v1130_v7  ;;  %v1227_v11 = vadd.f32 %v3600_v27, %v1226_v8  ;;  %4106 = vrot.lane.b32.xlu0 %v4085_v50, %s4564_s2 }
 0x266   : > { %v4943_v14 = vmul.f32 0.35355338, %v1139_v56  ;;  %v4100_v15 = vpack.i.bf16 %v1235_v6, %v1232_v63  ;;  %v1505_v57 = vpack.c.bf16 %v1235_v6, %v1232_v63 }
 0x267   : > { %v1147_v16 = vmul.f32 0.35355338, %v1131_v49  ;;  %v4095_v17 = vpack.i.bf16 %v1227_v11, %v1224_v5  ;;  %v1504_v18 = vpack.c.bf16 %v1227_v11, %v1224_v5 }
 0x268   : > { %v4155_v2 = vpack.i.bf16 %v4943_v14, %v4938_v9  ;;  %v1409_v23 = vpack.c.bf16 %v4943_v14, %v4938_v9  ;;  %v1637_v51 = vsel %vm1614_vm2, %v1505_v57, 0 }
 0x269   : > { %4116 = vrot.lane.b32.xlu0 %v4085_v50, %s4565_s17  ;;  %4096 = vrot.lane.b32.xlu1 %v4095_v17, %s4563_s22  ;;  %v3849_v19 = vpop.f32.mrb[8].mxu0  ;;  %v4160_v22 = vpack.i.bf16 %v1147_v16, %v4940_v10  ;;  %v1408_v3 = vpack.c.bf16 %v1147_v16, %v4940_v10  ;;  %v1634_v34 = vsel %vm1614_vm2, %v1504_v18, 0 }
 0x26a   : > { %v1295_v12 = vpop.f32.mrb[9].mxu0  ;;  %3858 = vmatpush3.bf16.xpose.msra.mxu1 %v1631_v21  ;;  %v1304_v13 = vadd.f32 %v3849_v19, %v3607_v20 }
 0x26b   : > { %v3850_v25 = vpop.f32.mrb[10].mxu0  ;;  %4025 = vmatprep.subr.msk.bf16.mxu1 %vm1614_vm2, %v1504_v18  ;;  %v1296_v27 = vadd.f32 %v3607_v20, %v1295_v12 }
 0x26c   : > { %v1307_v24 = vadd.f32 %v3850_v25, %v3607_v20  ;;  %v1298_v26 = vpop.f32.mrb[11].mxu0 }
 0x26d   : > { %v1299_v28 = vadd.f32 %v3607_v20, %v1298_v26  ;;  %4126 = vrot.lane.b32.xlu0 %v4921_v45, %s4564_s2  ;;  %4101 = vrot.lane.b32.xlu1 %v4100_v15, %s4563_s22 }
 0x26e   : > { %v4205_v29 = vpack.i.bf16 %v1307_v24, %v1304_v13  ;;  %v4963_v30 = vpack.c.bf16 %v1307_v24, %v1304_v13 }
 0x26f   : > { %v4220_v31 = vpack.i.bf16 %v1299_v28, %v1296_v27  ;;  %v4965_v32 = vpack.c.bf16 %v1299_v28, %v1296_v27 }
 0x271   : > { %4136 = vrot.lane.b32.xlu0 %v4095_v17, %s4564_s2  ;;  %4111 = vrot.lane.b32.xlu1 %v4934_v48, %s4563_s22  ;;  %v3853_v33 = vpop.f32.mrb[12].mxu0 }
 0x272   : > { %v1311_v35 = vpop.f32.mrb[13].mxu0  ;;  %3860 = vmatpush3.bf16.xpose.msra.mxu1 %v1634_v34  ;;  %v1320_v37 = vadd.f32 %v3853_v33, %v3607_v20 }
 0x273   : > { %v3854_v36 = vpop.f32.mrb[14].mxu0  ;;  %4026 = vmatprep.subr.msk.bf16.mxu1 %vm1614_vm2, %v1505_v57  ;;  %v1312_v41 = vadd.f32 %v3607_v20, %v1311_v35 }
 0x274   : > { %v1323_v38 = vadd.f32 %v3854_v36, %v3607_v20  ;;  %v1314_v39 = vpop.f32.mrb[15].mxu0 }
 0x275   : > { %v1315_v42 = vadd.f32 %v3607_v20, %v1314_v39  ;;  %4121 = vrot.lane.b32.xlu1 %v4929_v53, %s4563_s22  ;;  %4156 = vrot.lane.b32.xlu0 %v4155_v2, %s4563_s22 }
 0x276   : > { %v4975_v43 = vpack.i.bf16 %v1323_v38, %v1320_v37  ;;  %v4977_v46 = vpack.c.bf16 %v1323_v38, %v1320_v37 }
 0x277   : > { %v4979_v47 = vpack.i.bf16 %v1315_v42, %v1312_v41  ;;  %v4981_v50 = vpack.c.bf16 %v1315_v42, %v1312_v41 }
 0x279   : > { %4131 = vrot.lane.b32.xlu1 %v4921_v45, %s4565_s17  ;;  %4161 = vrot.lane.b32.xlu0 %v4160_v22, %s4563_s22 }
 0x27a   : > { %3862 = vmatpush3.bf16.xpose.msra.mxu1 %v1637_v51 }
 0x27d   : > { %4141 = vrot.lane.b32.xlu1 %v4095_v17, %s4565_s17  ;;  %4166 = vrot.lane.b32.xlu0 %v4934_v48, %s4564_s2 }
 0x281   : > { %4146 = vrot.lane.b32.xlu1 %v4100_v15, %s4564_s2  ;;  %3864 = vmatmul.mubr.msk.bf16.vlgmr.msra.gmra.mrb[8].mxu1 %vm1614_vm2, %v1407_v52 }
 0x282   : > { %4176 = vrot.lane.b32.xlu0 %v4934_v48, %s4565_s17  ;;  %3867 = vmatprep.mubr.msk.bf16.mxu1 %vm1614_vm2, %v1408_v3 }
 0x285   : > { %4151 = vrot.lane.b32.xlu1 %v4100_v15, %s4565_s17 }
 0x286   : > { %4191 = vrot.lane.b32.xlu0 %v4160_v22, %s4564_s2 }
 0x289   : > { %4171 = vrot.lane.b32.xlu1 %v4929_v53, %s4564_s2  ;;  %3868 = vmatmul.mubr.msk.bf16.gmra.mrb[12].mxu1 %vm1614_vm2, %v1409_v23 }
 0x28a   : > { %4196 = vrot.lane.b32.xlu0 %v4160_v22, %s4565_s17 }
 0x28d   : > { %4181 = vrot.lane.b32.xlu1 %v4929_v53, %s4565_s17 }
 0x28e   : > { %4221 = vrot.lane.b32.xlu0 %v4220_v31, %s4563_s22 }
 0x291   : > { %4186 = vrot.lane.b32.xlu1 %v4155_v2, %s4564_s2 }
 0x292   : > { %4226 = vrot.lane.b32.xlu0 %v4220_v31, %s4564_s2 }
 0x295   : > { %4201 = vrot.lane.b32.xlu1 %v4155_v2, %s4565_s17 }
 0x296   : > { %4241 = vrot.lane.b32.xlu0 %v4979_v47, %s4563_s22 }
 0x299   : > { %4206 = vrot.lane.b32.xlu1 %v4205_v29, %s4563_s22 }
 0x29d   : > { %4211 = vrot.lane.b32.xlu1 %v4205_v29, %s4564_s2 }
 0x2a1   : > { %4216 = vrot.lane.b32.xlu1 %v4205_v29, %s4565_s17 }
 0x2a5   : > { %4231 = vrot.lane.b32.xlu1 %v4220_v31, %s4565_s17 }
 0x2a9   : > { %4236 = vrot.lane.b32.xlu1 %v4975_v43, %s4563_s22  ;;  %s5721_s22 = scalar_lea.vmem %s5663_s13, %s4698_s20 }
 0x2d2   : > { %v4092_v40 = vpop.permute.xlu1 %4091 }
 0x2d3   : > { %v4087_v44 = vpop.permute.xlu0 %4086  ;;  %v4094_v45 = vunpack.i.h.bf16 %v4092_v40  ;;  %v4093_v52 = vunpack.i.l.bf16 %v4092_v40 }
 0x2d4   : > { %v4089_v53 = vunpack.i.h.bf16 %v4087_v44  ;;  %v4088_v54 = vunpack.i.l.bf16 %v4087_v44 }
 0x2d5   : > { %v1507_v59 = vpack.c.bf16 %v4094_v45, %v4093_v52 }
 0x2d6   : > { %v1506_v55 = vpack.c.bf16 %v4089_v53, %v4088_v54 }
 0x2d7   : > { %v4107_v58 = vpop.permute.xlu0 %4106  ;;  %v1720_v10 = vsel %vm1614_vm2, %v1507_v59, 0 }
 0x2d8   : > { %v4109_v48 = vunpack.i.h.bf16 %v4107_v58  ;;  %v4108_v60 = vunpack.i.l.bf16 %v4107_v58  ;;  %4027 = vmatprep.subr.msk.bf16.mxu0 %vm1614_vm2, %v1506_v55  ;;  %v1717_v61 = vsel %vm1614_vm2, %v1506_v55, 0 }
 0x2d9   : > { %3872 = vmatpush3.bf16.xpose.msra.mxu0 %v1717_v61 }
 0x2da   : > { %v1510_v62 = vpack.c.bf16 %v4109_v48, %v4108_v60  ;;  %4028 = vmatprep.subr.msk.bf16.mxu0 %vm1614_vm2, %v1507_v59 }
 0x2db   : > { %v4097_v63 = vpop.permute.xlu1 %4096  ;;  %v4117_v0 = vpop.permute.xlu0 %4116 }
 0x2dc   : > { %v4099_v1 = vunpack.i.h.bf16 %v4097_v63  ;;  %v4098_v4 = vunpack.i.l.bf16 %v4097_v63  ;;  %4031 = vmatprep.subr.msk.bf16.mxu1 %vm1614_vm2, %v1510_v62  ;;  %v1806_v5 = vsel %vm1614_vm2, %v1510_v62, 0  ;;  %v4119_v24 = vunpack.i.h.bf16 %v4117_v0 }
 0x2dd   : > { %3888 = vmatpush3.bf16.xpose.msra.mxu1 %v1806_v5  ;;  %v4118_v26 = vunpack.i.l.bf16 %v4117_v0 }
 0x2de   : > { %v1508_v7 = vpack.c.bf16 %v4099_v1, %v4098_v4 }
 0x2df   : > { %v4102_v56 = vpop.permute.xlu1 %4101  ;;  %v4127_v6 = vpop.permute.xlu0 %4126  ;;  %v1514_v31 = vpack.c.bf16 %v4119_v24, %v4118_v26 }
 0x2e0   : > { %v4129_v8 = vunpack.i.h.bf16 %v4127_v6  ;;  %v4128_v9 = vunpack.i.l.bf16 %v4127_v6  ;;  %v4104_v11 = vunpack.i.h.bf16 %v4102_v56  ;;  %v4103_v14 = vunpack.i.l.bf16 %v4102_v56 }
 0x2e1   : > { %3874 = vmatpush3.bf16.xpose.msra.mxu0 %v1720_v10  ;;  %v1723_v23 = vsel %vm1614_vm2, %v1508_v7, 0  ;;  %v1895_v61 = vsel %vm1614_vm2, %v1514_v31, 0 }
 0x2e2   : > { %v1511_v49 = vpack.c.bf16 %v4129_v8, %v4128_v9  ;;  %4029 = vmatprep.subr.msk.bf16.mxu0 %vm1614_vm2, %v1508_v7  ;;  %v1509_v12 = vpack.c.bf16 %v4104_v11, %v4103_v14 }
 0x2e3   : > { %v4112_v15 = vpop.permute.xlu1 %4111  ;;  %v4137_v57 = vpop.permute.xlu0 %4136 }
 0x2e4   : > { %v4114_v16 = vunpack.i.h.bf16 %v4112_v15  ;;  %v4113_v17 = vunpack.i.l.bf16 %v4112_v15  ;;  %v4139_v18 = vunpack.i.h.bf16 %v4137_v57  ;;  %v4138_v2 = vunpack.i.l.bf16 %v4137_v57  ;;  %4032 = vmatprep.subr.msk.bf16.mxu1 %vm1614_vm2, %v1511_v49 }
 0x2e5   : > { %v1809_v19 = vsel %vm1614_vm2, %v1511_v49, 0  ;;  %v1726_v35 = vsel %vm1614_vm2, %v1509_v12, 0 }
 0x2e6   : > { %v1410_v20 = vpack.c.bf16 %v4114_v16, %v4113_v17  ;;  %v1512_v21 = vpack.c.bf16 %v4139_v18, %v4138_v2  ;;  %3890 = vmatpush3.bf16.xpose.msra.mxu1 %v1809_v19 }
 0x2e7   : > { %v4122_v22 = vpop.permute.xlu1 %4121  ;;  %v4157_v3 = vpop.permute.xlu0 %4156 }
 0x2e8   : > { %3879 = vmatprep.mubr.msk.bf16.mxu0 %vm1614_vm2, %v1410_v20  ;;  %4033 = vmatprep.subr.msk.bf16.mxu1 %vm1614_vm2, %v1512_v21  ;;  %v1812_v27 = vsel %vm1614_vm2, %v1512_v21, 0  ;;  %v4124_v36 = vunpack.i.h.bf16 %v4122_v22  ;;  %v4123_v37 = vunpack.i.l.bf16 %v4122_v22  ;;  %v4159_v62 = vunpack.i.h.bf16 %v4157_v3 }
 0x2e9   : > { %3876 = vmatpush3.bf16.xpose.msra.mxu0 %v1723_v23  ;;  %v4158_v63 = vunpack.i.l.bf16 %v4157_v3 }
 0x2ea   : > { %4030 = vmatprep.subr.msk.bf16.mxu0 %vm1614_vm2, %v1509_v12  ;;  %v1411_v53 = vpack.c.bf16 %v4124_v36, %v4123_v37 }
 0x2eb   : > { %v4132_v25 = vpop.permute.xlu1 %4131  ;;  %v4162_v13 = vpop.permute.xlu0 %4161  ;;  %v1413_v49 = vpack.c.bf16 %v4159_v62, %v4158_v63 }
 0x2ec   : > { %v4164_v39 = vunpack.i.h.bf16 %v4162_v13  ;;  %v4163_v41 = vunpack.i.l.bf16 %v4162_v13  ;;  %v4134_v45 = vunpack.i.h.bf16 %v4132_v25  ;;  %v4133_v52 = vunpack.i.l.bf16 %v4132_v25 }
 0x2ee   : > { %3892 = vmatpush3.bf16.xpose.msra.mxu1 %v1812_v27  ;;  %v1412_v55 = vpack.c.bf16 %v4164_v39, %v4163_v41  ;;  %v1515_v60 = vpack.c.bf16 %v4134_v45, %v4133_v52 }
 0x2ef   : > { %v4142_v28 = vpop.permute.xlu1 %4141  ;;  %v4167_v29 = vpop.permute.xlu0 %4166 }
 0x2f0   : > { %v4169_v33 = vunpack.i.h.bf16 %v4167_v29  ;;  %v4168_v34 = vunpack.i.l.bf16 %v4167_v29  ;;  %v4144_v9 = vunpack.i.h.bf16 %v4142_v28  ;;  %v4143_v10 = vunpack.i.l.bf16 %v4142_v28 }
 0x2f1   : > { %3878 = vmatpush3.bf16.xpose.msra.mxu0 %v1726_v35  ;;  %v1898_v18 = vsel %vm1614_vm2, %v1515_v60, 0 }
 0x2f2   : > { %v1414_v38 = vpack.c.bf16 %v4169_v33, %v4168_v34  ;;  %4035 = vmatprep.subr.msk.bf16.mxu0 %vm1614_vm2, %v1514_v31  ;;  %v1516_v17 = vpack.c.bf16 %v4144_v9, %v4143_v10 }
 0x2f3   : > { %v4147_v42 = vpop.permute.xlu1 %4146 }
 0x2f4   : > { %v4149_v51 = vunpack.i.h.bf16 %v4147_v42  ;;  %v4148_v40 = vunpack.i.l.bf16 %v4147_v42  ;;  %v4177_v44 = vpop.permute.xlu0 %4176  ;;  %3895 = vmatprep.mubr.msk.bf16.mxu1 %vm1614_vm2, %v1414_v38  ;;  %v1901_v24 = vsel %vm1614_vm2, %v1516_v17, 0 }
 0x2f5   : > { %v4179_v0 = vunpack.i.h.bf16 %v4177_v44  ;;  %v4178_v1 = vunpack.i.l.bf16 %v4177_v44 }
 0x2f6   : > { %v1513_v54 = vpack.c.bf16 %v4149_v51, %v4148_v40 }
 0x2f7   : > { %v4152_v58 = vpop.permute.xlu1 %4151  ;;  %v1418_v14 = vpack.c.bf16 %v4179_v0, %v4178_v1 }
 0x2f8   : > { %v4192_v59 = vpop.permute.xlu0 %4191  ;;  %3880 = vmatmul.mubr.msk.bf16.vlgmr.msra.gmra.mrb[16].mxu0 %vm1614_vm2, %v1411_v53  ;;  %4034 = vmatprep.subr.msk.bf16.mxu1 %vm1614_vm2, %v1513_v54  ;;  %v1815_v48 = vsel %vm1614_vm2, %v1513_v54, 0  ;;  %v4154_v21 = vunpack.i.h.bf16 %v4152_v58  ;;  %v4153_v22 = vunpack.i.l.bf16 %v4152_v58 }
 0x2f9   : > { %3883 = vmatprep.mubr.msk.bf16.mxu0 %vm1614_vm2, %v1412_v55  ;;  %3894 = vmatpush3.bf16.xpose.msra.mxu1 %v1815_v48  ;;  %v4194_v4 = vunpack.i.h.bf16 %v4192_v59  ;;  %v4193_v5 = vunpack.i.l.bf16 %v4192_v59 }
 0x2fa   : > { %3904 = vmatpush3.bf16.xpose.msra.mxu0 %v1895_v61  ;;  %3919 = vmatprep.subr.bf16.mxu1 %v4965_v32  ;;  %v1517_v25 = vpack.c.bf16 %v4154_v21, %v4153_v22 }
 0x2fb   : > { %4036 = vmatprep.subr.msk.bf16.mxu0 %vm1614_vm2, %v1515_v60  ;;  %v4172_v56 = vpop.permute.xlu1 %4171  ;;  %v1416_v15 = vpack.c.bf16 %v4194_v4, %v4193_v5 }
 0x2fc   : > { %v4174_v6 = vunpack.i.h.bf16 %v4172_v56  ;;  %v4173_v7 = vunpack.i.l.bf16 %v4172_v56  ;;  %v4197_v8 = vpop.permute.xlu0 %4196  ;;  %v1904_v31 = vsel %vm1614_vm2, %v1517_v25, 0 }
 0x2fd   : > { %v4199_v36 = vunpack.i.h.bf16 %v4197_v8  ;;  %v4198_v37 = vunpack.i.l.bf16 %v4197_v8 }
 0x2fe   : > { %v1415_v11 = vpack.c.bf16 %v4174_v6, %v4173_v7 }
 0x2ff   : > { %v4182_v57 = vpop.permute.xlu1 %4181  ;;  %v1420_v51 = vpack.c.bf16 %v4199_v36, %v4198_v37 }
 0x300   : > { %v4222_v16 = vpop.permute.xlu0 %4221  ;;  %3884 = vmatmul.mubr.msk.bf16.gmra.mrb[20].mxu0 %vm1614_vm2, %v1413_v49  ;;  %3896 = vmatmul.mubr.msk.bf16.vlgmr.msra.gmra.mrb[16].mxu1 %vm1614_vm2, %v1415_v11  ;;  %v4183_v34 = vunpack.i.l.bf16 %v4182_v57 }
 0x301   : > { %3899 = vmatprep.mubr.msk.bf16.mxu1 %vm1614_vm2, %v1416_v15  ;;  %3911 = vmatprep.mubr.msk.bf16.mxu0 %vm1614_vm2, %v1418_v14  ;;  %v4224_v27 = vunpack.i.h.bf16 %v4222_v16 }
 0x302   : > { %3906 = vmatpush3.bf16.xpose.msra.mxu0 %v1898_v18  ;;  %3920 = vmatpush3.bf16.msra.mxu1 %v4965_v32 }
 0x303   : > { %4037 = vmatprep.subr.msk.bf16.mxu0 %vm1614_vm2, %v1516_v17  ;;  %3921 = vmatprep.subr.bf16.mxu1 %v4963_v30  ;;  %v4187_v2 = vpop.permute.xlu1 %4186 }
 0x304   : > { %v4189_v19 = vunpack.i.h.bf16 %v4187_v2  ;;  %v4188_v20 = vunpack.i.l.bf16 %v4187_v2  ;;  %v4227_v12 = vpop.permute.xlu0 %4226 }
 0x305   : > { %v4229_v32 = vunpack.i.h.bf16 %v4227_v12  ;;  %v4228_v13 = vunpack.i.l.bf16 %v4227_v12 }
 0x306   : > { %v1417_v3 = vpack.c.bf16 %v4189_v19, %v4188_v20  ;;  %3922 = vmatpush3.bf16.msra.mxu1 %v4963_v30  ;;  %v4223_v30 = vunpack.i.l.bf16 %v4222_v16 }
 0x307   : > { %3923 = vmatprep.subr.bf16.mxu1 %v4981_v50  ;;  %v4202_v23 = vpop.permute.xlu1 %4201  ;;  %v5057_v28 = vpack.c.bf16 %v4229_v32, %v4228_v13 }
 0x308   : > { %3900 = vmatmul.mubr.msk.bf16.gmra.mrb[20].mxu1 %vm1614_vm2, %v1417_v3  ;;  %v1602_v33 = vpack.c.bf16 %v4224_v27, %v4223_v30  ;;  %v4242_v41 = vpop.permute.xlu0 %4241  ;;  %v4204_v52 = vunpack.i.h.bf16 %v4202_v23  ;;  %v4203_v53 = vunpack.i.l.bf16 %v4202_v23 }
 0x309   : > { %v4244_v40 = vunpack.i.h.bf16 %v4242_v41  ;;  %v4243_v44 = vunpack.i.l.bf16 %v4242_v41 }
 0x30a   : > { %3908 = vmatpush3.bf16.xpose.msra.mxu0 %v1901_v24  ;;  %3924 = vmatpush3.bf16.msra.mxu1 %v4981_v50  ;;  %v4184_v50 = vunpack.i.h.bf16 %v4182_v57  ;;  %v1421_v48 = vpack.c.bf16 %v4204_v52, %v4203_v53 }
 0x30b   : > { %4038 = vmatprep.subr.msk.bf16.mxu0 %vm1614_vm2, %v1517_v25  ;;  %3925 = vmatprep.subr.bf16.mxu1 %v4977_v46  ;;  %v4207_v26 = vpop.permute.xlu1 %4206  ;;  %v1604_v59 = vpack.c.bf16 %v4244_v40, %v4243_v44 }
 0x30c   : > { %v4209_v38 = vunpack.i.h.bf16 %v4207_v26  ;;  %v4208_v39 = vunpack.i.l.bf16 %v4207_v26  ;;  %v1419_v42 = vpack.c.bf16 %v4184_v50, %v4183_v34 }
 0x30e   : > { %3926 = vmatpush3.bf16.msra.mxu1 %v4977_v46  ;;  %v1603_v45 = vpack.c.bf16 %v4209_v38, %v4208_v39 }
 0x30f   : > { %3951 = vmatprep.subr.bf16.mxu1 %v5057_v28  ;;  %v5061_v29 = vpop.permute.xlu1 %4211 }
 0x312   : > { %3910 = vmatpush3.bf16.xpose.msra.mxu0 %v1904_v31 }
 0x313   : > { %3935 = vmatprep.subr.bf16.mxu0 %v1602_v33  ;;  %v5064_v35 = vpop.permute.xlu1 %4216 }
 0x317   : > { %v4232_v46 = vpop.permute.xlu1 %4231 }
 0x318   : > { %v4234_v60 = vunpack.i.h.bf16 %v4232_v46  ;;  %v4233_v61 = vunpack.i.l.bf16 %v4232_v46 }
 0x319   : > { %3912 = vmatmul.mubr.msk.bf16.vlgmr.msra.gmra.mrb[24].mxu0 %vm1614_vm2, %v1419_v42 }
 0x31a   : > { %3915 = vmatprep.mubr.msk.bf16.mxu0 %vm1614_vm2, %v1420_v51  ;;  %3936 = vmatpush3.bf16.msra.mxu0 %v1602_v33  ;;  %v5069_v63 = vpack.c.bf16 %v4234_v60, %v4233_v61 }
 0x31b   : > { %3937 = vmatprep.subr.bf16.mxu0 %v1603_v45  ;;  %v4237_v54 = vpop.permute.xlu1 %4236 }
 0x31c   : > { %v4239_v55 = vunpack.i.h.bf16 %v4237_v54  ;;  %v4238_v58 = vunpack.i.l.bf16 %v4237_v54 }
 0x31e   : > { %3938 = vmatpush3.bf16.msra.mxu0 %v1603_v45  ;;  %v1605_v62 = vpack.c.bf16 %v4239_v55, %v4238_v58 }
 0x31f   : > { %3939 = vmatprep.subr.bf16.mxu0 %v1604_v59 }
 0x321   : > { %3916 = vmatmul.mubr.msk.bf16.gmra.mrb[28].mxu0 %vm1614_vm2, %v1421_v48 }
 0x322   : > { %3940 = vmatpush3.bf16.msra.mxu0 %v1604_v59 }
 0x323   : > { %3941 = vmatprep.subr.bf16.mxu0 %v1605_v62 }
 0x326   : > { %3942 = vmatpush3.bf16.msra.mxu0 %v1605_v62 }
 0x327   : > { %3967 = vmatprep.subr.bf16.mxu0 %v5069_v63 }
 0x354   : > { %v5072_v0 = vpop.f32.mrb[8].mxu1 }
 0x355   : > { %v5074_v1 = vpop.f32.mrb[9].mxu1  ;;  %v1978_v4 = vsel %vm1971_vm3, %v5072_v0, -inf }
 0x356   : > { %v5078_v5 = vpop.f32.mrb[10].mxu1  ;;  %1979 = vmax.xlane.f32.xlu0 %v1978_v4  ;;  %v1972_v7 = vsel %vm1971_vm3, %v5074_v1, -inf }
 0x357   : > { %v5080_v56 = vpop.f32.mrb[11].mxu1  ;;  %v1981_v10 = vsel %vm1971_vm3, %v5078_v5, -inf }
 0x358   : > { %v1975_v6 = vsel %vm1971_vm3, %v5080_v56, -inf }
 0x359   : > { %1976 = vmax.xlane.f32.xlu1 %v1975_v6 }
 0x35a   : > { %1973 = vmax.xlane.f32.xlu0 %v1972_v7 }
 0x35c   : > { %v5086_v8 = vpop.f32.mrb[12].mxu1 }
 0x35d   : > { %v5088_v9 = vpop.f32.mrb[13].mxu1  ;;  %v1990_v15 = vsel %vm1971_vm3, %v5086_v8, -inf }
 0x35e   : > { %1982 = vmax.xlane.f32.xlu0 %v1981_v10  ;;  %v5092_v49 = vpop.f32.mrb[14].mxu1  ;;  %v1984_v16 = vsel %vm1971_vm3, %v5088_v9, -inf }
 0x35f   : > { %v5094_v11 = vpop.f32.mrb[15].mxu1  ;;  %v1993_v14 = vsel %vm1971_vm3, %v5092_v49, -inf }
 0x360   : > { %1994 = vmax.xlane.f32.xlu1 %v1993_v14  ;;  %v1987_v57 = vsel %vm1971_vm3, %v5094_v11, -inf }
 0x362   : > { %1991 = vmax.xlane.f32.xlu0 %v1990_v15 }
 0x364   : > { %1988 = vmax.xlane.f32.xlu1 %v1987_v57 }
 0x366   : > { %1985 = vmax.xlane.f32.xlu0 %v1984_v16 }
 0x3cb   : > { %v5104_v17 = vpop.f32.mrb[16].mxu0 }
 0x3cc   : > { %v5106_v18 = vpop.f32.mrb[17].mxu0  ;;  %v2002_v2 = vsel %vm1971_vm3, %v5104_v17, -inf }
 0x3cd   : > { %2003 = vmax.xlane.f32.xlu0 %v2002_v2  ;;  %v5110_v19 = vpop.f32.mrb[18].mxu0  ;;  %v1996_v30 = vsel %vm1971_vm3, %v5106_v18, -inf }
 0x3ce   : > { %v5112_v20 = vpop.f32.mrb[19].mxu0  ;;  %v2005_v21 = vsel %vm1971_vm3, %v5110_v19, -inf }
 0x3cf   : > { %2006 = vmax.xlane.f32.xlu1 %v2005_v21  ;;  %v1999_v31 = vsel %vm1971_vm3, %v5112_v20, -inf }
 0x3d3   : > { %v5116_v22 = vpop.f32.mrb[20].mxu0  ;;  %v5118_v3 = vpop.f32.mrb[16].mxu1 }
 0x3d4   : > { %v5120_v12 = vpop.f32.mrb[21].mxu0  ;;  %v5122_v23 = vpop.f32.mrb[17].mxu1  ;;  %v2026_v25 = vsel %vm1971_vm3, %v5118_v3, -inf  ;;  %v2014_v39 = vsel %vm1971_vm3, %v5116_v22, -inf }
 0x3d5   : > { %v5126_v32 = vpop.f32.mrb[18].mxu1  ;;  %2027 = vmax.xlane.f32.xlu0 %v2026_v25  ;;  %v5128_v13 = vpop.f32.mrb[22].mxu0  ;;  %v2020_v34 = vsel %vm1971_vm3, %v5122_v23, -inf  ;;  %v2008_v51 = vsel %vm1971_vm3, %v5120_v12, -inf }
 0x3d6   : > { %v5130_v24 = vpop.f32.mrb[23].mxu0  ;;  %v5132_v26 = vpop.f32.mrb[19].mxu1  ;;  %v2029_v27 = vsel %vm1971_vm3, %v5126_v32, -inf  ;;  %v2017_v41 = vsel %vm1971_vm3, %v5128_v13, -inf }
 0x3d7   : > { %2030 = vmax.xlane.f32.xlu1 %v2029_v27  ;;  %v2023_v38 = vsel %vm1971_vm3, %v5132_v26, -inf  ;;  %v2011_v40 = vsel %vm1971_vm3, %v5130_v24, -inf }
 0x3d9   : > { %1997 = vmax.xlane.f32.xlu0 %v1996_v30 }
 0x3db   : > { %v5140_v33 = vpop.f32.mrb[20].mxu1  ;;  %2000 = vmax.xlane.f32.xlu1 %v1999_v31 }
 0x3dc   : > { %v5142_v50 = vpop.f32.mrb[21].mxu1  ;;  %v2038_v42 = vsel %vm1971_vm3, %v5140_v33, -inf }
 0x3dd   : > { %v5146_v36 = vpop.f32.mrb[22].mxu1  ;;  %2021 = vmax.xlane.f32.xlu0 %v2020_v34  ;;  %v2032_v45 = vsel %vm1971_vm3, %v5142_v50, -inf }
 0x3de   : > { %v5148_v37 = vpop.f32.mrb[23].mxu1  ;;  %v2041_v46 = vsel %vm1971_vm3, %v5146_v36, -inf }
 0x3df   : > { %2024 = vmax.xlane.f32.xlu1 %v2023_v38  ;;  %v2035_v54 = vsel %vm1971_vm3, %v5148_v37, -inf }
 0x3e1   : > { %2015 = vmax.xlane.f32.xlu0 %v2014_v39 }
 0x3e3   : > { %2018 = vmax.xlane.f32.xlu1 %v2017_v41  ;;  %v1980_v57 = vpop.xlane.xlu0 %1979 }
 0x3e4   : > { %v2070_v21 = vsub.f32 %v5072_v0, %v1980_v57 }
 0x3e5   : > { %2039 = vmax.xlane.f32.xlu0 %v2038_v42 }
 0x3e6   : > { %v1977_v25 = vpop.xlane.xlu1 %1976  ;;  %v2104_v31 = vmul.f32 1.442695, %v2070_v21 }
 0x3e7   : > { %2042 = vmax.xlane.f32.xlu1 %v2041_v46  ;;  %v1974_v16 = vpop.xlane.xlu0 %1973  ;;  %v2069_v39 = vsub.f32 %v5080_v56, %v1977_v25 }
 0x3e8   : > { %v2068_v34 = vsub.f32 %v5074_v1, %v1974_v16  ;;  %4355 = vpow2.f32 %v2104_v31 }
 0x3e9   : > { %2009 = vmax.xlane.f32.xlu0 %v2008_v51 }
 0x3ea   : > { %v2100_v42 = vmul.f32 1.442695, %v2068_v34 }
 0x3eb   : > { %2012 = vmax.xlane.f32.xlu1 %v2011_v40  ;;  %v1983_v2 = vpop.xlane.xlu0 %1982 }
 0x3ec   : > { %v5164_v44 = vpop.f32.mrb[24].mxu0  ;;  %v2071_v27 = vsub.f32 %v5078_v5, %v1983_v2 }
 0x3ed   : > { %v5168_v52 = vpop.f32.mrb[25].mxu0  ;;  %2033 = vmax.xlane.f32.xlu0 %v2032_v45  ;;  %v2050_v58 = vsel %vm1971_vm3, %v5164_v44, -inf  ;;  %v1995_v38 = vpop.xlane.xlu1 %1994 }
 0x3ee   : > { %v5170_v53 = vpop.f32.mrb[26].mxu0  ;;  %v2044_v60 = vsel %vm1971_vm3, %v5168_v52, -inf  ;;  %v2106_v41 = vmul.f32 1.442695, %v2071_v27  ;;  %v2075_v0 = vsub.f32 %v5092_v49, %v1995_v38 }
 0x3ef   : > { %v5174_v55 = vpop.f32.mrb[27].mxu0  ;;  %2036 = vmax.xlane.f32.xlu1 %v2035_v54  ;;  %v2053_v59 = vsel %vm1971_vm3, %v5170_v53, -inf  ;;  %v1992_v30 = vpop.xlane.xlu0 %1991 }
 0x3f0   : > { %v2047_v4 = vsel %vm1971_vm3, %v5174_v55, -inf  ;;  %v2074_v46 = vsub.f32 %v5086_v8, %v1992_v30  ;;  %4357 = vpow2.f32 %v2106_v41  ;;  %v2114_v1 = vmul.f32 1.442695, %v2075_v0 }
 0x3f1   : > { %2051 = vmax.xlane.f32.xlu0 %v2050_v58  ;;  %v1989_v40 = vpop.xlane.xlu1 %1988  ;;  %4359 = vpow2.f32 %v2100_v42 }
 0x3f2   : > { %v2112_v5 = vmul.f32 1.442695, %v2074_v46  ;;  %v2073_v54 = vsub.f32 %v5094_v11, %v1989_v40  ;;  %v5212_v58 = vpop.eup %4355 }
 0x3f3   : > { %2054 = vmax.xlane.f32.xlu1 %v2053_v59  ;;  %v1986_v51 = vpop.xlane.xlu0 %1985  ;;  %v2170_v49 = vsel %vm1971_vm3, %v5212_v58, 0.0 }
 0x3f4   : > { %v5180_v48 = vpop.f32.mrb[28].mxu0  ;;  %v2072_v45 = vsub.f32 %v5088_v9, %v1986_v51  ;;  %v2110_v8 = vmul.f32 1.442695, %v2073_v54 }
 0x3f5   : > { %v5184_v61 = vpop.f32.mrb[29].mxu0  ;;  %2045 = vmax.xlane.f32.xlu0 %v2044_v60  ;;  %v2062_v7 = vsel %vm1971_vm3, %v5180_v48, -inf }
 0x3f6   : > { %v5186_v62 = vpop.f32.mrb[30].mxu0  ;;  %v2056_v14 = vsel %vm1971_vm3, %v5184_v61, -inf  ;;  %v2108_v56 = vmul.f32 1.442695, %v2072_v45 }
 0x3f7   : > { %v5190_v6 = vpop.f32.mrb[31].mxu0  ;;  %2048 = vmax.xlane.f32.xlu1 %v2047_v4  ;;  %v2065_v10 = vsel %vm1971_vm3, %v5186_v62, -inf }
 0x3f8   : > { %v2059_v15 = vsel %vm1971_vm3, %v5190_v6, -inf }
 0x3f9   : > { %2063 = vmax.xlane.f32.xlu0 %v2062_v7 }
 0x3fa   : > { %v5214_v59 = vpop.eup %4357 }
 0x3fb   : > { %2066 = vmax.xlane.f32.xlu1 %v2065_v10  ;;  %v5218_v60 = vpop.eup %4359  ;;  %v2173_v9 = vsel %vm1971_vm3, %v5214_v59, 0.0 }
 0x3fc   : > { %v2164_v4 = vsel %vm1971_vm3, %v5218_v60, 0.0 }
 0x3fd   : > { %2057 = vmax.xlane.f32.xlu0 %v2056_v14 }
 0x3ff   : > { %2060 = vmax.xlane.f32.xlu1 %v2059_v15 }
 0x410   : > { %4251 = vrot.lane.b32.xlu1 %v4979_v47, %s4565_s17 }
 0x413   : > { %4246 = vrot.lane.b32.xlu0 %v4979_v47, %s4564_s2  ;;  %v2102_v47 = vmul.f32 1.442695, %v2069_v39 }
 0x415   : > { %4361 = vpow2.f32 %v2102_v47 }
 0x416   : > { %4363 = vpow2.f32 %v2112_v5 }
 0x417   : > { %4365 = vpow2.f32 %v2114_v1 }
 0x418   : > { %4367 = vpow2.f32 %v2108_v56 }
 0x419   : > { %4369 = vpow2.f32 %v2110_v8 }
 0x41f   : > { %v5222_v11 = vpop.eup %4361 }
 0x420   : > { %v5226_v7 = vpop.eup %4363  ;;  %v2167_v10 = vsel %vm1971_vm3, %v5222_v11, 0.0 }
 0x421   : > { %v5230_v14 = vpop.eup %4365  ;;  %v2182_v15 = vsel %vm1971_vm3, %v5226_v7, 0.0 }
 0x422   : > { %v5234_v57 = vpop.eup %4367  ;;  %v2185_v16 = vsel %vm1971_vm3, %v5230_v14, 0.0 }
 0x423   : > { %v5238_v2 = vpop.eup %4369  ;;  %v2176_v21 = vsel %vm1971_vm3, %v5234_v57, 0.0 }
 0x424   : > { %v2179_v25 = vsel %vm1971_vm3, %v5238_v2, 0.0 }
 0x432   : > { %2171 = vadd.xlane.f32.xlu0 %v2170_v49 }
 0x434   : > { %2174 = vadd.xlane.f32.xlu1 %v2173_v9 }
 0x436   : > { %2165 = vadd.xlane.f32.xlu0 %v2164_v4 }
 0x438   : > { %2168 = vadd.xlane.f32.xlu1 %v2167_v10 }
 0x43a   : > { %2183 = vadd.xlane.f32.xlu0 %v2182_v15 }
 0x43c   : > { %2186 = vadd.xlane.f32.xlu1 %v2185_v16 }
 0x43e   : > { %2177 = vadd.xlane.f32.xlu0 %v2176_v21 }
 0x440   : > { %2180 = vadd.xlane.f32.xlu1 %v2179_v25 }
 0x45a   : > { %v2004_v27 = vpop.xlane.xlu0 %2003 }
 0x45b   : > { %v2078_v30 = vsub.f32 %v5104_v17, %v2004_v27 }
 0x45c   : > { %v2007_v34 = vpop.xlane.xlu1 %2006 }
 0x45d   : > { %v2120_v31 = vmul.f32 1.442695, %v2078_v30  ;;  %v2079_v40 = vsub.f32 %v5110_v19, %v2007_v34 }
 0x45f   : > { %4371 = vpow2.f32 %v2120_v31  ;;  %v2122_v54 = vmul.f32 1.442695, %v2079_v40 }
 0x462   : > { %v2028_v38 = vpop.xlane.xlu0 %2027 }
 0x463   : > { %v2086_v39 = vsub.f32 %v5118_v3, %v2028_v38 }
 0x464   : > { %v2031_v41 = vpop.xlane.xlu1 %2030 }
 0x465   : > { %v2136_v42 = vmul.f32 1.442695, %v2086_v39  ;;  %v2087_v56 = vsub.f32 %v5126_v32, %v2031_v41 }
 0x466   : > { %v1998_v46 = vpop.xlane.xlu0 %1997 }
 0x467   : > { %4373 = vpow2.f32 %v2136_v42  ;;  %v2076_v51 = vsub.f32 %v5106_v18, %v1998_v46  ;;  %v2138_v4 = vmul.f32 1.442695, %v2087_v56 }
 0x468   : > { %v2001_v47 = vpop.xlane.xlu1 %2000 }
 0x469   : > { %v5247_v0 = vpop.eup %4371  ;;  %v2116_v5 = vmul.f32 1.442695, %v2076_v51  ;;  %v2077_v10 = vsub.f32 %v5112_v20, %v2001_v47 }
 0x46a   : > { %v2022_v45 = vpop.xlane.xlu0 %2021  ;;  %v2194_v17 = vsel %vm1971_vm3, %v5247_v0, 0.0 }
 0x46b   : > { %4375 = vpow2.f32 %v2116_v5  ;;  %v2084_v1 = vsub.f32 %v5122_v23, %v2022_v45  ;;  %2195 = vadd.xlane.f32.xlu0 %v2194_v17 }
 0x46c   : > { %v2025_v3 = vpop.xlane.xlu1 %2024 }
 0x46d   : > { %v2132_v8 = vmul.f32 1.442695, %v2084_v1  ;;  %v2085_v27 = vsub.f32 %v5132_v26, %v2025_v3 }
 0x46e   : > { %v2016_v18 = vpop.xlane.xlu0 %2015 }
 0x46f   : > { %4377 = vpow2.f32 %v2132_v8  ;;  %v2082_v49 = vsub.f32 %v5116_v22, %v2016_v18  ;;  %v2118_v22 = vmul.f32 1.442695, %v2077_v10 }
 0x470   : > { %v2019_v9 = vpop.xlane.xlu1 %2018  ;;  %4379 = vpow2.f32 %v2122_v54 }
 0x471   : > { %v5255_v19 = vpop.eup %4373  ;;  %v2128_v15 = vmul.f32 1.442695, %v2082_v49 }
 0x472   : > { %v2040_v16 = vpop.xlane.xlu0 %2039  ;;  %v2218_v23 = vsel %vm1971_vm3, %v5255_v19, 0.0 }
 0x473   : > { %4381 = vpow2.f32 %v2128_v15  ;;  %v2090_v32 = vsub.f32 %v5140_v33, %v2040_v16  ;;  %2219 = vadd.xlane.f32.xlu0 %v2218_v23  ;;  %v2134_v33 = vmul.f32 1.442695, %v2085_v27 }
 0x474   : > { %v2043_v21 = vpop.xlane.xlu1 %2042  ;;  %4383 = vpow2.f32 %v2138_v4 }
 0x475   : > { %v5261_v25 = vpop.eup %4375  ;;  %v2144_v30 = vmul.f32 1.442695, %v2090_v32 }
 0x476   : > { %v2010_v31 = vpop.xlane.xlu0 %2009  ;;  %v2188_v20 = vsel %vm1971_vm3, %v5261_v25, 0.0 }
 0x477   : > { %4385 = vpow2.f32 %v2144_v30  ;;  %v2080_v34 = vsub.f32 %v5120_v12, %v2010_v31  ;;  %2189 = vadd.xlane.f32.xlu0 %v2188_v20  ;;  %v2083_v12 = vsub.f32 %v5128_v13, %v2019_v9 }
 0x478   : > { %v2013_v38 = vpop.xlane.xlu1 %2012  ;;  %4387 = vpow2.f32 %v2118_v22 }
 0x479   : > { %v5267_v39 = vpop.eup %4377  ;;  %v2124_v41 = vmul.f32 1.442695, %v2080_v34  ;;  %v2130_v13 = vmul.f32 1.442695, %v2083_v12  ;;  %v2081_v15 = vsub.f32 %v5130_v24, %v2013_v38 }
 0x47a   : > { %v2034_v42 = vpop.xlane.xlu0 %2033  ;;  %v2212_v46 = vsel %vm1971_vm3, %v5267_v39, 0.0  ;;  %v5271_v26 = vpop.eup %4379 }
 0x47b   : > { %4389 = vpow2.f32 %v2124_v41  ;;  %v2088_v51 = vsub.f32 %v5142_v50, %v2034_v42  ;;  %2213 = vadd.xlane.f32.xlu1 %v2212_v46  ;;  %v2197_v1 = vsel %vm1971_vm3, %v5271_v26, 0.0  ;;  %v2091_v50 = vsub.f32 %v5146_v36, %v2043_v21 }
 0x47c   : > { %v2037_v47 = vpop.xlane.xlu1 %2036  ;;  %4391 = vpow2.f32 %v2134_v33  ;;  %v2126_v20 = vmul.f32 1.442695, %v2081_v15 }
 0x47d   : > { %v5274_v40 = vpop.eup %4381  ;;  %v2140_v5 = vmul.f32 1.442695, %v2088_v51  ;;  %v2146_v36 = vmul.f32 1.442695, %v2091_v50  ;;  %v2089_v34 = vsub.f32 %v5148_v37, %v2037_v47 }
 0x47e   : > { %v2052_v45 = vpop.xlane.xlu0 %2051  ;;  %v2206_v17 = vsel %vm1971_vm3, %v5274_v40, 0.0  ;;  %v5281_v3 = vpop.eup %4383 }
 0x47f   : > { %v2094_v54 = vsub.f32 %v5164_v44, %v2052_v45  ;;  %2207 = vadd.xlane.f32.xlu0 %v2206_v17  ;;  %2198 = vadd.xlane.f32.xlu1 %v2197_v1  ;;  %4393 = vpow2.f32 %v2140_v5  ;;  %v2221_v4 = vsel %vm1971_vm3, %v5281_v3, 0.0 }
 0x480   : > { %v2055_v56 = vpop.xlane.xlu1 %2054 }
 0x481   : > { %v5285_v8 = vpop.eup %4385  ;;  %v2152_v18 = vmul.f32 1.442695, %v2094_v54  ;;  %v2095_v51 = vsub.f32 %v5170_v53, %v2055_v56 }
 0x482   : > { %v2046_v49 = vpop.xlane.xlu0 %2045  ;;  %v2230_v9 = vsel %vm1971_vm3, %v5285_v8, 0.0  ;;  %v5291_v10 = vpop.eup %4387 }
 0x483   : > { %4395 = vpow2.f32 %v2152_v18  ;;  %v2092_v44 = vsub.f32 %v5168_v52, %v2046_v49  ;;  %2231 = vadd.xlane.f32.xlu0 %v2230_v9  ;;  %2222 = vadd.xlane.f32.xlu1 %v2221_v4  ;;  %v2191_v30 = vsel %vm1971_vm3, %v5291_v10, 0.0 }
 0x484   : > { %v2049_v16 = vpop.xlane.xlu1 %2048  ;;  %4397 = vpow2.f32 %v2130_v13 }
 0x485   : > { %v5295_v23 = vpop.eup %4389  ;;  %v2148_v32 = vmul.f32 1.442695, %v2092_v44  ;;  %v2093_v21 = vsub.f32 %v5174_v55, %v2049_v16 }
 0x486   : > { %v2064_v22 = vpop.xlane.xlu0 %2063  ;;  %v2200_v27 = vsel %vm1971_vm3, %v5295_v23, 0.0  ;;  %v5302_v52 = vpop.eup %4391 }
 0x487   : > { %4399 = vpow2.f32 %v2148_v32  ;;  %v2150_v31 = vmul.f32 1.442695, %v2093_v21  ;;  %v2098_v24 = vsub.f32 %v5180_v48, %v2064_v22  ;;  %2201 = vadd.xlane.f32.xlu0 %v2200_v27  ;;  %2192 = vadd.xlane.f32.xlu1 %v2191_v30  ;;  %v2215_v41 = vsel %vm1971_vm3, %v5302_v52, 0.0 }
 0x488   : > { %4401 = vpow2.f32 %v2146_v36  ;;  %v2067_v55 = vpop.xlane.xlu1 %2066  ;;  %v2142_v48 = vmul.f32 1.442695, %v2089_v34 }
 0x489   : > { %4403 = vpow2.f32 %v2150_v31  ;;  %v2160_v38 = vmul.f32 1.442695, %v2098_v24  ;;  %v5308_v42 = vpop.eup %4393  ;;  %v2099_v54 = vsub.f32 %v5186_v62, %v2067_v55 }
 0x48a   : > { %v2058_v33 = vpop.xlane.xlu0 %2057  ;;  %4405 = vpow2.f32 %v2126_v20  ;;  %v2224_v17 = vsel %vm1971_vm3, %v5308_v42, 0.0 }
 0x48b   : > { %v2096_v46 = vsub.f32 %v5184_v61, %v2058_v33  ;;  %2216 = vadd.xlane.f32.xlu1 %v2215_v41  ;;  %4407 = vpow2.f32 %v2160_v38  ;;  %v2154_v61 = vmul.f32 1.442695, %v2095_v51  ;;  %v2162_v49 = vmul.f32 1.442695, %v2099_v54 }
 0x48c   : > { %v2061_v12 = vpop.xlane.xlu1 %2060  ;;  %4409 = vpow2.f32 %v2142_v48 }
 0x48d   : > { %v5312_v5 = vpop.eup %4395  ;;  %v2156_v37 = vmul.f32 1.442695, %v2096_v46  ;;  %v2097_v47 = vsub.f32 %v5190_v6, %v2061_v12 }
 0x48e   : > { %v2242_v45 = vsel %vm1971_vm3, %v5312_v5, 0.0  ;;  %v5319_v1 = vpop.eup %4397  ;;  %v4247_v55 = vpop.permute.xlu0 %4246 }
 0x48f   : > { %2243 = vadd.xlane.f32.xlu0 %v2242_v45  ;;  %2225 = vadd.xlane.f32.xlu1 %v2224_v17  ;;  %4411 = vpow2.f32 %v2156_v37  ;;  %v2158_v50 = vmul.f32 1.442695, %v2097_v47  ;;  %v2209_v13 = vsel %vm1971_vm3, %v5319_v1, 0.0 }
 0x490   : > { %4413 = vpow2.f32 %v2154_v61  ;;  %v5368_v38 = vpop.permute.xlu1 %4251 }
 0x491   : > { %v5321_v53 = vpop.eup %4399  ;;  %4415 = vpow2.f32 %v2158_v50 }
 0x492   : > { %v5324_v56 = vpop.eup %4401  ;;  %v2236_v6 = vsel %vm1971_vm3, %v5321_v53, 0.0  ;;  %4417 = vpow2.f32 %v2162_v49  ;;  %v4213_v49 = vunpack.i.l.bf16 %v5061_v29 }
 0x493   : > { %v5330_v18 = vpop.eup %4403  ;;  %2237 = vadd.xlane.f32.xlu0 %v2236_v6  ;;  %2210 = vadd.xlane.f32.xlu1 %v2209_v13  ;;  %v2233_v4 = vsel %vm1971_vm3, %v5324_v56, 0.0  ;;  %v4214_v13 = vunpack.i.h.bf16 %v5061_v29 }
 0x494   : > { %v5332_v9 = vpop.eup %4405  ;;  %v2239_v62 = vsel %vm1971_vm3, %v5330_v18, 0.0 }
 0x495   : > { %v5338_v44 = vpop.eup %4407  ;;  %v2203_v16 = vsel %vm1971_vm3, %v5332_v9, 0.0 }
 0x496   : > { %v5340_v36 = vpop.eup %4409  ;;  %v2254_v15 = vsel %vm1971_vm3, %v5338_v44, 0.0 }
 0x497   : > { %2240 = vadd.xlane.f32.xlu0 %v2239_v62  ;;  %2234 = vadd.xlane.f32.xlu1 %v2233_v4  ;;  %v2227_v27 = vsel %vm1971_vm3, %v5340_v36, 0.0 }
 0x499   : > { %v5346_v32 = vpop.eup %4411 }
 0x49a   : > { %v5348_v21 = vpop.eup %4413  ;;  %v2248_v22 = vsel %vm1971_vm3, %v5346_v32, 0.0 }
 0x49b   : > { %2255 = vadd.xlane.f32.xlu0 %v2254_v15  ;;  %2204 = vadd.xlane.f32.xlu1 %v2203_v16  ;;  %v5354_v30 = vpop.eup %4415  ;;  %v2245_v31 = vsel %vm1971_vm3, %v5348_v21, 0.0 }
 0x49c   : > { %v2251_v24 = vsel %vm1971_vm3, %v5354_v30, 0.0  ;;  %v5360_v20 = vpop.eup %4417 }
 0x49d   : > { %v2257_v34 = vsel %vm1971_vm3, %v5360_v20, 0.0 }
 0x49f   : > { %2249 = vadd.xlane.f32.xlu0 %v2248_v22  ;;  %2228 = vadd.xlane.f32.xlu1 %v2227_v27  ;;  %v4249_v27 = vunpack.i.h.bf16 %v4247_v55 }
 0x4a3   : > { %2246 = vadd.xlane.f32.xlu1 %v2245_v31  ;;  %2252 = vadd.xlane.f32.xlu0 %v2251_v24  ;;  %v4248_v31 = vunpack.i.l.bf16 %v4247_v55 }
 0x4a7   : > { %2258 = vadd.xlane.f32.xlu1 %v2257_v34  ;;  %v1608_v34 = vpack.c.bf16 %v4249_v27, %v4248_v31 }
 0x4b8   : > { %4261 = vrot.lane.b32.xlu1 %v4975_v43, %s4565_s17 }
 0x4b9   : > { %4256 = vrot.lane.b32.xlu0 %v4975_v43, %s4564_s2 }
 0x4bf   : > { %v2172_v33 = vpop.xlane.xlu0 %2171 }
 0x4c1   : > { %v2175_v41 = vpop.xlane.xlu1 %2174 }
 0x4c2   : > { %4419 = vrcp.f32 %v2175_v41 }
 0x4c3   : > { %v2166_v46 = vpop.xlane.xlu0 %2165 }
 0x4c4   : > { %4421 = vrcp.f32 %v2166_v46 }
 0x4c5   : > { %4423 = vrcp.f32 %v2172_v33  ;;  %v2169_v48 = vpop.xlane.xlu1 %2168 }
 0x4c6   : > { %4425 = vrcp.f32 %v2169_v48 }
 0x4c7   : > { %v2184_v51 = vpop.xlane.xlu0 %2183 }
 0x4c9   : > { %v2187_v12 = vpop.xlane.xlu1 %2186 }
 0x4ca   : > { %4427 = vrcp.f32 %v2187_v12 }
 0x4cb   : > { %v2178_v37 = vpop.xlane.xlu0 %2177 }
 0x4cc   : > { %4429 = vrcp.f32 %v2178_v37  ;;  %v4420_v47 = vpop.eup %4419 }
 0x4cd   : > { %4431 = vrcp.f32 %v2184_v51  ;;  %v2181_v45 = vpop.xlane.xlu1 %2180  ;;  %v2295_v54 = vmul.f32 %v4420_v47, %v5214_v59  ;;  %v1607_v59 = vpack.c.bf16 %v4214_v13, %v4213_v49 }
 0x4ce   : > { %v4422_v43 = vpop.eup %4421  ;;  %4433 = vrcp.f32 %v2181_v45 }
 0x4cf   : > { %v4424_v17 = vpop.eup %4423  ;;  %v2292_v50 = vmul.f32 %v4422_v43, %v5218_v60 }
 0x4d0   : > { %v4426_v61 = vpop.eup %4425  ;;  %v2294_v62 = vmul.f32 %v4424_v17, %v5212_v58 }
 0x4d1   : > { %v2293_v6 = vmul.f32 %v4426_v61, %v5222_v11 }
 0x4d2   : > { %v2325_v15 = vpack.c.bf16 %v2295_v54, %v2294_v62 }
 0x4d3   : > { %v2324_v4 = vpack.c.bf16 %v2293_v6, %v2292_v50 }
 0x4d4   : > { %v4428_v16 = vpop.eup %4427 }
 0x4d5   : > { %3927 = vmatprep.mubr.msk.bf16.mxu1 %vm1971_vm3, %v2324_v4  ;;  %v2299_v29 = vmul.f32 %v4428_v16, %v5230_v14  ;;  %v4219_v4 = vunpack.i.h.bf16 %v5064_v35 }
 0x4d6   : > { %v4430_v22 = vpop.eup %4429  ;;  %3928 = vmatmul.mubr.msk.bf16.vlgmr.msra.gmra.mrb[24].mxu1 %vm1971_vm3, %v2325_v15  ;;  %v4218_v15 = vunpack.i.l.bf16 %v5064_v35  ;;  %v4254_v35 = vunpack.i.h.bf16 %v5368_v38 }
 0x4d7   : > { %v4432_v60 = vpop.eup %4431  ;;  %3952 = vmatpush3.bf16.msra.mxu1 %v5057_v28  ;;  %v2296_v58 = vmul.f32 %v4430_v22, %v5234_v57 }
 0x4d8   : > { %v4434_v11 = vpop.eup %4433  ;;  %3953 = vmatprep.subr.bf16.mxu1 %v1607_v59  ;;  %v2298_v33 = vmul.f32 %v4432_v60, %v5226_v7 }
 0x4d9   : > { %v2297_v24 = vmul.f32 %v4434_v11, %v5238_v2 }
 0x4da   : > { %v2327_v55 = vpack.c.bf16 %v2299_v29, %v2298_v33 }
 0x4db   : > { %3954 = vmatpush3.bf16.msra.mxu1 %v1607_v59  ;;  %v2326_v41 = vpack.c.bf16 %v2297_v24, %v2296_v58  ;;  %v1611_v24 = vpack.c.bf16 %v4219_v4, %v4218_v15 }
 0x4dc   : > { %3955 = vmatprep.subr.bf16.mxu1 %v1608_v34 }
 0x4dd   : > { %3931 = vmatprep.mubr.msk.bf16.mxu1 %vm1971_vm3, %v2326_v41 }
 0x4de   : > { %3932 = vmatmul.mubr.msk.bf16.gmra.mrb[28].mxu1 %vm1971_vm3, %v2327_v55 }
 0x4df   : > { %3956 = vmatpush3.bf16.msra.mxu1 %v1608_v34 }
 0x4f8   : > { %v2196_v28 = vpop.xlane.xlu0 %2195 }
 0x500   : > { %v2220_v46 = vpop.xlane.xlu0 %2219 }
 0x504   : > { %v2190_v48 = vpop.xlane.xlu0 %2189 }
 0x508   : > { %v2214_v14 = vpop.xlane.xlu1 %2213 }
 0x50c   : > { %v2208_v51 = vpop.xlane.xlu0 %2207  ;;  %v2199_v57 = vpop.xlane.xlu1 %2198 }
 0x50d   : > { %4435 = vrcp.f32 %v2199_v57 }
 0x50e   : > { %4437 = vrcp.f32 %v2190_v48 }
 0x50f   : > { %4439 = vrcp.f32 %v2196_v28 }
 0x510   : > { %v2223_v12 = vpop.xlane.xlu1 %2222  ;;  %v5385_v2 = vpop.xlane.xlu0 %2231 }
 0x514   : > { %v2193_v7 = vpop.xlane.xlu1 %2192  ;;  %v2202_v37 = vpop.xlane.xlu0 %2201 }
 0x515   : > { %4441 = vrcp.f32 %v2193_v7 }
 0x516   : > { %4443 = vrcp.f32 %v2214_v14 }
 0x517   : > { %v4436_v17 = vpop.eup %4435 }
 0x518   : > { %v2217_v47 = vpop.xlane.xlu1 %2216  ;;  %v4438_v61 = vpop.eup %4437  ;;  %v2303_v6 = vmul.f32 %v4436_v17, %v5271_v26 }
 0x519   : > { %4445 = vrcp.f32 %v2217_v47  ;;  %v4440_v54 = vpop.eup %4439  ;;  %v2300_v16 = vmul.f32 %v4438_v61, %v5261_v25  ;;  %v4253_v25 = vunpack.i.l.bf16 %v5368_v38 }
 0x51a   : > { %v2302_v27 = vmul.f32 %v4440_v54, %v5247_v0  ;;  %4447 = vrcp.f32 %v2208_v51 }
 0x51b   : > { %4449 = vrcp.f32 %v2223_v12 }
 0x51c   : > { %v2244_v45 = vpop.xlane.xlu0 %2243  ;;  %v2226_v43 = vpop.xlane.xlu1 %2225  ;;  %v2329_v60 = vpack.c.bf16 %v2303_v6, %v2302_v27  ;;  %4451 = vrcp.f32 %v2202_v37 }
 0x51f   : > { %v4442_v50 = vpop.eup %4441 }
 0x520   : > { %v2238_v13 = vpop.xlane.xlu0 %2237  ;;  %v2211_v49 = vpop.xlane.xlu1 %2210  ;;  %v2301_v22 = vmul.f32 %v4442_v50, %v5291_v10 }
 0x521   : > { %v4444_v62 = vpop.eup %4443  ;;  %4453 = vrcp.f32 %v2211_v49 }
 0x522   : > { %v2328_v59 = vpack.c.bf16 %v2301_v22, %v2300_v16  ;;  %v2308_v26 = vmul.f32 %v4444_v62, %v5267_v39 }
 0x523   : > { %v4446_v31 = vpop.eup %4445 }
 0x524   : > { %v2241_v11 = vpop.xlane.xlu0 %2240  ;;  %v2235_v29 = vpop.xlane.xlu1 %2234  ;;  %v2309_v58 = vmul.f32 %v4446_v31, %v5302_v52  ;;  %3943 = vmatprep.mubr.msk.bf16.mxu0 %vm1971_vm3, %v2328_v59  ;;  %v1612_v52 = vpack.c.bf16 %v4254_v35, %v4253_v25 }
 0x525   : > { %3944 = vmatmul.mubr.msk.bf16.vlgmr.msra.gmra.mrb[32].mxu0 %vm1971_vm3, %v2329_v60  ;;  %4455 = vrcp.f32 %v2241_v11  ;;  %v4448_v33 = vpop.eup %4447 }
 0x526   : > { %v2332_v0 = vpack.c.bf16 %v2309_v58, %v2308_v26  ;;  %3968 = vmatpush3.bf16.msra.mxu0 %v5069_v63  ;;  %4457 = vrcp.f32 %v2238_v13  ;;  %v4450_v41 = vpop.eup %4449  ;;  %v2306_v6 = vmul.f32 %v4448_v33, %v5274_v40 }
 0x527   : > { %3969 = vmatprep.subr.bf16.mxu0 %v1611_v24  ;;  %v4452_v63 = vpop.eup %4451  ;;  %v2311_v50 = vmul.f32 %v4450_v41, %v5281_v3 }
 0x528   : > { %v2256_v39 = vpop.xlane.xlu0 %2255  ;;  %3959 = vmatprep.mubr.msk.bf16.mxu1 %vm1971_vm3, %v2332_v0  ;;  %v2205_v10 = vpop.xlane.xlu1 %2204  ;;  %v2304_v7 = vmul.f32 %v4452_v63, %v5295_v23 }
 0x529   : > { %4459 = vrcp.f32 %v2205_v10 }
 0x52a   : > { %4461 = vrcp.f32 %v2220_v46  ;;  %3970 = vmatpush3.bf16.msra.mxu0 %v1611_v24 }
 0x52b   : > { %4463 = vrcp.f32 %v2244_v45  ;;  %3971 = vmatprep.subr.bf16.mxu0 %v1612_v52  ;;  %v4454_v48 = vpop.eup %4453 }
 0x52c   : > { %v2250_v38 = vpop.xlane.xlu0 %2249  ;;  %v2229_v34 = vpop.xlane.xlu1 %2228  ;;  %4465 = vrcp.f32 %v2226_v43  ;;  %v2307_v37 = vmul.f32 %v4454_v48, %v5319_v1 }
 0x52d   : > { %4467 = vrcp.f32 %v2229_v34 }
 0x52e   : > { %4469 = vrcp.f32 %v2235_v29  ;;  %3972 = vmatpush3.bf16.msra.mxu0 %v1612_v52  ;;  %v2331_v15 = vpack.c.bf16 %v2307_v37, %v2306_v6 }
 0x52f   : > { %4471 = vrcp.f32 %v2250_v38  ;;  %v4456_v14 = vpop.eup %4455 }
 0x530   : > { %v2253_v55 = vpop.xlane.xlu0 %2252  ;;  %v2247_v28 = vpop.xlane.xlu1 %2246  ;;  %v2317_v61 = vmul.f32 %v4456_v14, %v5330_v18 }
 0x531   : > { %4473 = vrcp.f32 %v2253_v55  ;;  %v4458_v46 = vpop.eup %4457 }
 0x532   : > { %4475 = vrcp.f32 %v2247_v28  ;;  %v2316_v23 = vmul.f32 %v4458_v46, %v5321_v53 }
 0x533   : > { %v4460_v51 = vpop.eup %4459  ;;  %4477 = vrcp.f32 %v5385_v2 }
 0x534   : > { %v4257_v57 = vpop.permute.xlu0 %4256  ;;  %v2259_v12 = vpop.xlane.xlu1 %2258  ;;  %v2305_v17 = vmul.f32 %v4460_v51, %v5332_v9  ;;  %v2336_v3 = vpack.c.bf16 %v2317_v61, %v2316_v23 }
 0x535   : > { %v4462_v47 = vpop.eup %4461  ;;  %v4259_v45 = vunpack.i.h.bf16 %v4257_v57  ;;  %v4258_v43 = vunpack.i.l.bf16 %v4257_v57  ;;  %4479 = vrcp.f32 %v2259_v12  ;;  %v4332_v12 = vld [vmem:[%s4744_s23 + $0x8] sm:$0xff]  }
 0x536   : > { %v4464_v54 = vpop.eup %4463  ;;  %v2330_v49 = vpack.c.bf16 %v2305_v17, %v2304_v7  ;;  %v2310_v1 = vmul.f32 %v4462_v47, %v5255_v19  ;;  %4481 = vrcp.f32 %v2256_v39 }
 0x537   : > { %v4466_v13 = vpop.eup %4465  ;;  %v1609_v2 = vpack.c.bf16 %v4259_v45, %v4258_v43  ;;  %v2318_v11 = vmul.f32 %v4464_v54, %v5312_v5 }
 0x538   : > { %v4468_v62 = vpop.eup %4467  ;;  %v4262_v4 = vpop.permute.xlu1 %4261  ;;  %3947 = vmatprep.mubr.msk.bf16.mxu0 %vm1971_vm3, %v2330_v49  ;;  %v2312_v53 = vmul.f32 %v4466_v13, %v5308_v42  ;;  %v2333_v19 = vpack.c.bf16 %v2311_v50, %v2310_v1 }
 0x539   : > { %v4470_v9 = vpop.eup %4469  ;;  %v4264_v18 = vunpack.i.h.bf16 %v4262_v4  ;;  %v4263_v16 = vunpack.i.l.bf16 %v4262_v4  ;;  %3957 = vmatprep.subr.bf16.mxu1 %v1609_v2  ;;  %v2313_v40 = vmul.f32 %v4468_v62, %v5340_v36  ;;  %3948 = vmatmul.mubr.msk.bf16.gmra.mrb[36].mxu0 %vm1971_vm3, %v2331_v15 }
 0x53a   : > { %v4472_v22 = vpop.eup %4471  ;;  %3958 = vmatpush3.bf16.msra.mxu1 %v1609_v2  ;;  %3975 = vmatprep.mubr.msk.bf16.mxu0 %vm1971_vm3, %v2336_v3  ;;  %v2315_v24 = vmul.f32 %v4470_v9, %v5324_v56 }
 0x53b   : > { %v4474_v27 = vpop.eup %4473  ;;  %v1613_v31 = vpack.c.bf16 %v4264_v18, %v4263_v16  ;;  %v2334_v60 = vpack.c.bf16 %v2313_v40, %v2312_v53  ;;  %v2320_v58 = vmul.f32 %v4472_v22, %v5346_v32 }
 0x53c   : > { %v4476_v59 = vpop.eup %4475  ;;  %v2321_v36 = vmul.f32 %v4474_v27, %v5354_v30 }
 0x53d   : > { %v2319_v29 = vmul.f32 %v4476_v59, %v5348_v21  ;;  %3960 = vmatmul.mubr.msk.bf16.vlgmr.msra.gmra.mrb[32].mxu1 %vm1971_vm3, %v2333_v19  ;;  %3973 = vmatprep.subr.bf16.mxu0 %v1613_v31  ;;  %v4478_v26 = vpop.eup %4477 }
 0x53e   : > { %3963 = vmatprep.mubr.msk.bf16.mxu1 %vm1971_vm3, %v2334_v60  ;;  %3974 = vmatpush3.bf16.msra.mxu0 %v1613_v31  ;;  %v2338_v25 = vpack.c.bf16 %v2321_v36, %v2320_v58  ;;  %v2314_v5 = vmul.f32 %v4478_v26, %v5285_v8 }
 0x53f   : > { %v2337_v42 = vpack.c.bf16 %v2319_v29, %v2318_v11  ;;  %v4480_v35 = vpop.eup %4479 }
 0x540   : > { %v4482_v0 = vpop.eup %4481  ;;  %v2335_v21 = vpack.c.bf16 %v2315_v24, %v2314_v5  ;;  %v2323_v30 = vmul.f32 %v4480_v35, %v5360_v20 }
 0x541   : > { %3976 = vmatmul.mubr.msk.bf16.vlgmr.msra.gmra.mrb[40].mxu0 %vm1971_vm3, %v2337_v42  ;;  %v2322_v39 = vmul.f32 %v4482_v0, %v5338_v44  ;;  %v4331_v44 = vld [vmem:[%s4744_s23] sm:$0xff]   ;;  %s4568_s23 = smov 24  }
 0x542   : > { %3979 = vmatprep.mubr.msk.bf16.mxu0 %vm1971_vm3, %v2338_v25  ;;  %3983 = vmatprep.subr.bf16.mxu1 %v4331_v44 }
 0x543   : > { %v2339_v32 = vpack.c.bf16 %v2323_v30, %v2322_v39  ;;  %3984 = vmatpush3.bf16.msra.mxu1 %v4331_v44 }
 0x544   : > { %3985 = vmatprep.subr.bf16.mxu1 %v4332_v12 }
 0x545   : > { %3964 = vmatmul.mubr.msk.bf16.gmra.mrb[36].mxu1 %vm1971_vm3, %v2335_v21 }
 0x547   : > { %3986 = vmatpush3.bf16.msra.mxu1 %v4332_v12 }
 0x549   : > { %3980 = vmatmul.mubr.msk.bf16.gmra.mrb[44].mxu0 %vm1971_vm3, %v2339_v32 }
 0x5a9   : > { %v5429_v56 = vpop.f32.mrb[24].mxu1 }
 0x5aa   : > { %v5431_v10 = vpop.f32.mrb[25].mxu1 }
 0x5ab   : > { %v5433_v8 = vpop.f32.mrb[26].mxu1 }
 0x5ac   : > { %v5435_v52 = vpop.f32.mrb[27].mxu1 }
 0x5b1   : > { %v5437_v38 = vpop.f32.mrb[28].mxu1 }
 0x5b2   : > { %v5439_v34 = vpop.f32.mrb[29].mxu1 }
 0x5b3   : > { %v5441_v20 = vpop.f32.mrb[30].mxu1 }
 0x5b4   : > { %v5443_v33 = vpop.f32.mrb[31].mxu1 }
 0x5f8   : > { %v3945_v41 = vpop.f32.mrb[32].mxu0 }
 0x5f9   : > { %v2463_v63 = vpop.f32.mrb[33].mxu0 }
 0x5fa   : > { %v3946_v55 = vpop.f32.mrb[34].mxu0 }
 0x5fb   : > { %v4265_v28 = vpack.i.bf16 %v3946_v55, %v3945_v41  ;;  %v2466_v48 = vpop.f32.mrb[35].mxu0 }
 0x5fc   : > { %v4275_v14 = vpack.i.bf16 %v2466_v48, %v2463_v63 }
 0x5fd   : > { %4266 = vrot.lane.b32.xlu1 %v4265_v28, %s4566_s24 }
 0x5fe   : > { %4276 = vrot.lane.b32.xlu0 %v4275_v14, %s4566_s24 }
 0x60c   : > { %v3949_v46 = vpop.f32.mrb[36].mxu0 }
 0x60d   : > { %v2479_v51 = vpop.f32.mrb[37].mxu0 }
 0x60e   : > { %v3950_v57 = vpop.f32.mrb[38].mxu0 }
 0x60f   : > { %v4285_v7 = vpack.i.bf16 %v3950_v57, %v3949_v46  ;;  %v2482_v37 = vpop.f32.mrb[39].mxu0 }
 0x610   : > { %v3961_v47 = vpop.f32.mrb[32].mxu1  ;;  %v4290_v45 = vpack.i.bf16 %v2482_v37, %v2479_v51 }
 0x611   : > { %v2540_v43 = vpop.f32.mrb[33].mxu1 }
 0x612   : > { %v3962_v17 = vpop.f32.mrb[34].mxu1 }
 0x613   : > { %v4270_v61 = vpack.i.bf16 %v3962_v17, %v3961_v47  ;;  %v2543_v54 = vpop.f32.mrb[35].mxu1 }
 0x614   : > { %v4280_v50 = vpack.i.bf16 %v2543_v54, %v2540_v43  ;;  %v3977_v6 = vpop.f32.mrb[40].mxu0 }
 0x615   : > { %4271 = vrot.lane.b32.xlu1 %v4270_v61, %s4567_s8  ;;  %v2617_v13 = vpop.f32.mrb[41].mxu0 }
 0x616   : > { %4281 = vrot.lane.b32.xlu0 %v4280_v50, %s4567_s8  ;;  %v3978_v2 = vpop.f32.mrb[42].mxu0 }
 0x617   : > { %v4295_v49 = vpack.i.bf16 %v3978_v2, %v3977_v6  ;;  %v2620_v23 = vpop.f32.mrb[43].mxu0 }
 0x618   : > { %v3965_v62 = vpop.f32.mrb[36].mxu1  ;;  %v4300_v1 = vpack.i.bf16 %v2620_v23, %v2617_v13 }
 0x619   : > { %4286 = vrot.lane.b32.xlu1 %v4285_v7, %s4566_s24  ;;  %v2556_v4 = vpop.f32.mrb[37].mxu1 }
 0x61a   : > { %4291 = vrot.lane.b32.xlu0 %v4290_v45, %s4566_s24  ;;  %v3966_v15 = vpop.f32.mrb[38].mxu1 }
 0x61b   : > { %v4310_v9 = vpack.i.bf16 %v3966_v15, %v3965_v62  ;;  %v2559_v18 = vpop.f32.mrb[39].mxu1 }
 0x61c   : > { %v4305_v16 = vpack.i.bf16 %v2559_v18, %v2556_v4  ;;  %v3981_v3 = vpop.f32.mrb[44].mxu0 }
 0x61d   : > { %4296 = vrot.lane.b32.xlu1 %v4295_v49, %s4568_s23  ;;  %v2633_v40 = vpop.f32.mrb[45].mxu0 }
 0x61e   : > { %4301 = vrot.lane.b32.xlu0 %v4300_v1, %s4568_s23  ;;  %v3982_v22 = vpop.f32.mrb[46].mxu0 }
 0x61f   : > { %v4320_v53 = vpack.i.bf16 %v3982_v22, %v3981_v3  ;;  %v2636_v27 = vpop.f32.mrb[47].mxu0 }
 0x620   : > { %v4315_v19 = vpack.i.bf16 %v2636_v27, %v2633_v40 }
 0x621   : > { %4311 = vrot.lane.b32.xlu1 %v4310_v9, %s4567_s8 }
 0x622   : > { %4306 = vrot.lane.b32.xlu0 %v4305_v16, %s4567_s8 }
 0x625   : > { %4321 = vrot.lane.b32.xlu1 %v4320_v53, %s4568_s23 }
 0x626   : > { %4316 = vrot.lane.b32.xlu0 %v4315_v19, %s4568_s23 }
 0x66f   : > { %v4267_v31 = vpop.permute.xlu1 %4266 }
 0x670   : > { %v4277_v59 = vpop.permute.xlu0 %4276  ;;  %v4269_v29 = vunpack.i.h.bf16 %v4267_v31  ;;  %v4268_v36 = vunpack.i.l.bf16 %v4267_v31  ;;  %v3646_v31 = vld [vmem:[%s5718_s29] ss:$0 sm:$0xff] }
 0x671   : > { %v4279_v26 = vunpack.i.h.bf16 %v4277_v59  ;;  %v4278_v58 = vunpack.i.l.bf16 %v4277_v59 }
 0x672   : > { %v2747_v21 = vsel %vm1614_vm2, %v5433_v8, %v4269_v29  ;;  %v2746_v30 = vsel %vm1614_vm2, %v5429_v56, %v4268_v36 }
 0x673   : > { %v2745_v39 = vsel %vm1614_vm2, %v5435_v52, %v4279_v26  ;;  %v2744_v44 = vsel %vm1614_vm2, %v5431_v10, %v4278_v58 }
 0x687   : > { %v4272_v60 = vpop.permute.xlu1 %4271 }
 0x688   : > { %v4282_v11 = vpop.permute.xlu0 %4281  ;;  %v4273_v24 = vunpack.i.l.bf16 %v4272_v60  ;;  %v4274_v25 = vunpack.i.h.bf16 %v4272_v60 }
 0x689   : > { %v4284_v5 = vunpack.i.h.bf16 %v4282_v11  ;;  %v4283_v0 = vunpack.i.l.bf16 %v4282_v11 }
 0x68a   : > { %v2755_v41 = vsel %vm2752_vm4, %v2746_v30, %v4273_v24  ;;  %v2756_v48 = vsel %vm2752_vm4, %v2747_v21, %v4274_v25 }
 0x68b   : > { %v4287_v42 = vpop.permute.xlu1 %4286  ;;  %v2754_v8 = vsel %vm2752_vm4, %v2745_v39, %v4284_v5  ;;  %v2753_v56 = vsel %vm2752_vm4, %v2744_v44, %v4283_v0  ;;  %v4517_v0 = vld [vmem:[#allocation2 + $0x8] sm:$0xff] }
 0x68c   : > { %v4292_v35 = vpop.permute.xlu0 %4291  ;;  %v4289_v51 = vunpack.i.h.bf16 %v4287_v42  ;;  %v4288_v12 = vunpack.i.l.bf16 %v4287_v42  ;;  %v4515_v42 = vld [vmem:[#allocation2] sm:$0xff] }
 0x68d   : > { %v4294_v45 = vunpack.i.h.bf16 %v4292_v35  ;;  %v4293_v43 = vunpack.i.l.bf16 %v4292_v35  ;;  %v4516_v35 = vld [vmem:[#allocation2 + $0x10] sm:$0xff] }
 0x68e   : > { %v2751_v2 = vsel %vm1614_vm2, %v5441_v20, %v4289_v51  ;;  %v2750_v49 = vsel %vm1614_vm2, %v5437_v38, %v4288_v12  ;;  %v4519_v51 = vld [vmem:[#allocation2 + $0x20] sm:$0xff] }
 0x68f   : > { %v4297_v32 = vpop.permute.xlu1 %4296  ;;  %v2749_v62 = vsel %vm1614_vm2, %v5443_v33, %v4294_v45  ;;  %v2748_v1 = vsel %vm1614_vm2, %v5439_v34, %v4293_v43  ;;  %v4522_v45 = vld [vmem:[#allocation2 + $0x30] sm:$0xff] }
 0x690   : > { %v4299_v63 = vunpack.i.h.bf16 %v4297_v32  ;;  %v4298_v55 = vunpack.i.l.bf16 %v4297_v32  ;;  %v4302_v28 = vpop.permute.xlu0 %4301 }
 0x691   : > { %v4304_v14 = vunpack.i.h.bf16 %v4302_v28  ;;  %v4303_v46 = vunpack.i.l.bf16 %v4302_v28 }
 0x692   : > { %v2765_v52 = vsel %vm2761_vm5, %v2756_v48, %v4299_v63  ;;  %v2764_v57 = vsel %vm2761_vm5, %v2755_v41, %v4298_v55  ;;  %v4518_v41 = vld [vmem:[#allocation2 + $0x18] sm:$0xff] }
 0x693   : > { %v2771_v10 = vpack.c.bf16 %v2765_v52, %v2764_v57  ;;  %v2763_v7 = vsel %vm2761_vm5, %v2754_v8, %v4304_v14  ;;  %v2762_v37 = vsel %vm2761_vm5, %v2753_v56, %v4303_v46  ;;  %v4312_v47 = vpop.permute.xlu1 %4311  ;;  %v4520_v57 = vld [vmem:[#allocation2 + $0x28] sm:$0xff] }
 0x694   : > { %v2770_v17 = vpack.c.bf16 %v2763_v7, %v2762_v37  ;;  %v4307_v61 = vpop.permute.xlu0 %4306  ;;  %v4314_v54 = vunpack.i.h.bf16 %v4312_v47  ;;  %v4313_v50 = vunpack.i.l.bf16 %v4312_v47  ;;  %v4521_v7 = vld [vmem:[#allocation2 + $0x38] sm:$0xff] }
 0x695   : > { %v4309_v6 = vunpack.i.h.bf16 %v4307_v61  ;;  %v4308_v13 = vunpack.i.l.bf16 %v4307_v61 }
 0x696   : > { %3987 = vmatprep.mubr.msk.bf16.mxu1 %vm904_vm1, %v2770_v17  ;;  %v2760_v18 = vsel %vm2752_vm4, %v2751_v2, %v4314_v54  ;;  %v2759_v20 = vsel %vm2752_vm4, %v2750_v49, %v4313_v50 }
 0x697   : > { %3988 = vmatmul.mubr.msk.bf16.vlgmr.msra.gmra.mrb[40].mxu1 %vm904_vm1, %v2771_v10  ;;  %v4322_v23 = vpop.permute.xlu1 %4321  ;;  %v2758_v38 = vsel %vm2752_vm4, %v2749_v62, %v4309_v6  ;;  %v2757_v40 = vsel %vm2752_vm4, %v2748_v1, %v4308_v13 }
 0x698   : > { %v4324_v4 = vunpack.i.h.bf16 %v4322_v23  ;;  %v4323_v15 = vunpack.i.l.bf16 %v4322_v23  ;;  %v4317_v9 = vpop.permute.xlu0 %4316 }
 0x699   : > { %v4319_v16 = vunpack.i.h.bf16 %v4317_v9  ;;  %v4318_v3 = vunpack.i.l.bf16 %v4317_v9 }
 0x69a   : > { %v2769_v22 = vsel %vm2761_vm5, %v2760_v18, %v4324_v4  ;;  %v2768_v33 = vsel %vm2761_vm5, %v2759_v20, %v4323_v15 }
 0x69b   : > { %v2773_v53 = vpack.c.bf16 %v2769_v22, %v2768_v33  ;;  %v2767_v34 = vsel %vm2761_vm5, %v2758_v38, %v4319_v16  ;;  %v2766_v27 = vsel %vm2761_vm5, %v2757_v40, %v4318_v3 }
 0x69c   : > { %v2772_v19 = vpack.c.bf16 %v2767_v34, %v2766_v27 }
 0x69e   : > { %3991 = vmatprep.mubr.msk.bf16.mxu1 %vm904_vm1, %v2772_v19 }
 0x69f   : > { %3992 = vmatmul.mubr.msk.bf16.gmra.mrb[44].mxu1 %vm904_vm1, %v2773_v53 }
 0x76a   : > { %v3989_v59 = vpop.f32.mrb[40].mxu1 }
 0x76b   : > { %v2843_v60 = vpop.f32.mrb[41].mxu1  ;;  %v2852_v11 = vadd.f32 %v3989_v59, %v3646_v31 }
 0x76c   : > { %v2844_v29 = vadd.f32 %v3646_v31, %v2843_v60  ;;  %v3990_v36 = vpop.f32.mrb[42].mxu1 }
 0x76d   : > { %v2846_v26 = vpop.f32.mrb[43].mxu1  ;;  %v5490_v25 = vadd.f32 %v4516_v35, %v2852_v11  ;;  %v2855_v5 = vadd.f32 %v3990_v36, %v3646_v31 }
 0x76e   : > { %v5488_v58 = vadd.f32 %v4515_v42, %v2844_v29  ;;  %v2847_v24 = vadd.f32 %v3646_v31, %v2846_v26 }
 0x76f   : > { %v5498_v63 = vadd.f32 %v4518_v41, %v2855_v5  ;;  %v2890_v48 = vsel %vm904_vm1, %v5490_v25, 0.0 }
 0x770   : > { %v5492_v21 = vadd.f32 %v4517_v0, %v2847_v24  ;;  %v2884_v30 = vsel %vm904_vm1, %v5488_v58, 0.0 }
 0x771   : > { %2885 = vadd.xlane.f32.xlu0 %v2884_v30  ;;  %v2893_v10 = vsel %vm904_vm1, %v5498_v63, 0.0 }
 0x772   : > { %v3993_v39 = vpop.f32.mrb[44].mxu1  ;;  %v2887_v32 = vsel %vm904_vm1, %v5492_v21, 0.0 }
 0x773   : > { %2888 = vadd.xlane.f32.xlu1 %v2887_v32  ;;  %v2859_v44 = vpop.f32.mrb[45].mxu1  ;;  %v2868_v56 = vadd.f32 %v3993_v39, %v3646_v31 }
 0x774   : > { %v2860_v55 = vadd.f32 %v3646_v31, %v2859_v44  ;;  %v3994_v28 = vpop.f32.mrb[46].mxu1 }
 0x775   : > { %2891 = vadd.xlane.f32.xlu0 %v2890_v48  ;;  %v2862_v8 = vpop.f32.mrb[47].mxu1  ;;  %v2871_v14 = vadd.f32 %v3994_v28, %v3646_v31  ;;  %v5512_v43 = vadd.f32 %v4522_v45, %v2868_v56  ;;  %v4334_v28 = vld [vmem:[%s4761_s18 + $0x8] sm:$0xff]  }
 0x776   : > { %v2863_v46 = vadd.f32 %v3646_v31, %v2862_v8  ;;  %v5502_v52 = vadd.f32 %v4519_v51, %v2860_v55  ;;  %v4333_v55 = vld [vmem:[%s4761_s18] sm:$0xff]  }
 0x777   : > { %v5508_v37 = vadd.f32 %v4521_v7, %v2871_v14  ;;  %v2902_v54 = vsel %vm904_vm1, %v5512_v43, 0.0  ;;  %3995 = vmatprep.subr.bf16.mxu0 %v4333_v55 }
 0x778   : > { %v5504_v12 = vadd.f32 %v4520_v57, %v2863_v46  ;;  %v2896_v17 = vsel %vm904_vm1, %v5502_v52, 0.0  ;;  %3996 = vmatpush3.bf16.msra.mxu0 %v4333_v55 }
 0x779   : > { %2894 = vadd.xlane.f32.xlu0 %v2893_v10  ;;  %v2905_v61 = vsel %vm904_vm1, %v5508_v37, 0.0  ;;  %3997 = vmatprep.subr.bf16.mxu0 %v4334_v28 }
 0x77a   : > { %v2899_v47 = vsel %vm904_vm1, %v5504_v12, 0.0 }
 0x77b   : > { %2900 = vadd.xlane.f32.xlu1 %v2899_v47 }
 0x77c   : > { %3998 = vmatpush3.bf16.msra.mxu0 %v4334_v28 }
 0x77d   : > { %2897 = vadd.xlane.f32.xlu0 %v2896_v17 }
 0x77f   : > { %2906 = vadd.xlane.f32.xlu1 %v2905_v61 }
 0x781   : > { %2903 = vadd.xlane.f32.xlu0 %v2902_v54 }
 0x7fe   : > { %v2886_v50 = vpop.xlane.xlu0 %2885 }
 0x7ff   : > { %v2908_v6 = vmul.f32 0.03125, %v2886_v50 }
 0x800   : > { %v2889_v13 = vpop.xlane.xlu1 %2888 }
 0x801   : > { %v5521_v2 = vsub.f32 %v5488_v58, %v2908_v6  ;;  %v2909_v49 = vmul.f32 0.03125, %v2889_v13 }
 0x802   : > { %v2892_v23 = vpop.xlane.xlu0 %2891 }
 0x803   : > { %v5524_v62 = vsub.f32 %v5492_v21, %v2909_v49  ;;  %v2910_v1 = vmul.f32 0.03125, %v2892_v23  ;;  %v2924_v4 = vmul.f32 %v5521_v2, %v5521_v2  ;;  %v3653_v49 = vld [vmem:[%s5720_s0] ss:$0 sm:$0xff] }
 0x805   : > { %v5529_v15 = vsub.f32 %v5490_v25, %v2910_v1  ;;  %v2932_v9 = vsel %vm904_vm1, %v2924_v4, 0.0  ;;  %v2925_v18 = vmul.f32 %v5524_v62, %v5524_v62 }
 0x806   : > { %v2895_v20 = vpop.xlane.xlu0 %2894  ;;  %2933 = vadd.xlane.f32.xlu0 %v2932_v9 }
 0x807   : > { %v2911_v16 = vmul.f32 0.03125, %v2895_v20  ;;  %v2935_v3 = vsel %vm904_vm1, %v2925_v18, 0.0  ;;  %v2926_v38 = vmul.f32 %v5529_v15, %v5529_v15 }
 0x808   : > { %2936 = vadd.xlane.f32.xlu1 %v2935_v3  ;;  %v2901_v40 = vpop.xlane.xlu1 %2900 }
 0x809   : > { %v5538_v22 = vsub.f32 %v5498_v63, %v2911_v16  ;;  %v2913_v33 = vmul.f32 0.03125, %v2901_v40  ;;  %v2938_v53 = vsel %vm904_vm1, %v2926_v38, 0.0 }
 0x80a   : > { %2939 = vadd.xlane.f32.xlu0 %v2938_v53  ;;  %v2898_v34 = vpop.xlane.xlu0 %2897  ;;  %v3654_v53 = vld [vmem:[%s5721_s22] ss:$0 sm:$0xff] }
 0x80b   : > { %v5542_v27 = vsub.f32 %v5504_v12, %v2913_v33  ;;  %v2912_v19 = vmul.f32 0.03125, %v2898_v34  ;;  %v2927_v31 = vmul.f32 %v5538_v22, %v5538_v22 }
 0x80c   : > { %v2907_v59 = vpop.xlane.xlu1 %2906 }
 0x80d   : > { %v5547_v60 = vsub.f32 %v5502_v52, %v2912_v19  ;;  %v2915_v11 = vmul.f32 0.03125, %v2907_v59  ;;  %v2941_v29 = vsel %vm904_vm1, %v2927_v31, 0.0  ;;  %v2929_v36 = vmul.f32 %v5542_v27, %v5542_v27 }
 0x80e   : > { %2942 = vadd.xlane.f32.xlu1 %v2941_v29  ;;  %v2904_v26 = vpop.xlane.xlu0 %2903 }
 0x80f   : > { %v5553_v42 = vsub.f32 %v5508_v37, %v2915_v11  ;;  %v2914_v24 = vmul.f32 0.03125, %v2904_v26  ;;  %v2928_v35 = vmul.f32 %v5547_v60, %v5547_v60  ;;  %v2947_v0 = vsel %vm904_vm1, %v2929_v36, 0.0 }
 0x811   : > { %v5558_v5 = vsub.f32 %v5512_v43, %v2914_v24  ;;  %v2944_v30 = vsel %vm904_vm1, %v2928_v35, 0.0  ;;  %v2931_v39 = vmul.f32 %v5553_v42, %v5553_v42 }
 0x812   : > { %2948 = vadd.xlane.f32.xlu1 %v2947_v0  ;;  %2945 = vadd.xlane.f32.xlu0 %v2944_v30 }
 0x813   : > { %v2930_v32 = vmul.f32 %v5558_v5, %v5558_v5  ;;  %v2953_v44 = vsel %vm904_vm1, %v2931_v39, 0.0 }
 0x815   : > { %v2950_v41 = vsel %vm904_vm1, %v2930_v32, 0.0 }
 0x816   : > { %2954 = vadd.xlane.f32.xlu1 %v2953_v44  ;;  %2951 = vadd.xlane.f32.xlu0 %v2950_v41 }
 0x893   : > { %v2934_v48 = vpop.xlane.xlu0 %2933 }
 0x894   : > { %v2956_v8 = vmul.f32 0.03125, %v2934_v48 }
 0x895   : > { %v2937_v14 = vpop.xlane.xlu1 %2936 }
 0x896   : > { %v2964_v46 = vadd.f32 1e-05, %v2956_v8  ;;  %v2957_v56 = vmul.f32 0.03125, %v2937_v14 }
 0x897   : > { %v2940_v51 = vpop.xlane.xlu0 %2939 }
 0x898   : > { %4483 = vrsqrt.f32 %v2964_v46  ;;  %v2965_v57 = vadd.f32 1e-05, %v2957_v56  ;;  %v2958_v10 = vmul.f32 0.03125, %v2940_v51 }
 0x89a   : > { %4485 = vrsqrt.f32 %v2965_v57  ;;  %v2966_v7 = vadd.f32 1e-05, %v2958_v10 }
 0x89b   : > { %v2943_v47 = vpop.xlane.xlu1 %2942 }
 0x89c   : > { %4487 = vrsqrt.f32 %v2966_v7  ;;  %v2959_v45 = vmul.f32 0.03125, %v2943_v47  ;;  %v4336_v7 = vld [vmem:[%s4775_s12 + $0x8] sm:$0xff]   ;;  %v4338_v47 = vld [vmem:[%s4775_s12 + $0x18] sm:$0xff]  }
 0x89e   : > { %v2967_v17 = vadd.f32 1e-05, %v2959_v45  ;;  %v3655_v45 = vld [vmem:[%s834_s4] ss:$0 sm:$0xff] }
 0x89f   : > { %v2949_v61 = vpop.xlane.xlu1 %2948  ;;  %v2946_v54 = vpop.xlane.xlu0 %2945 }
 0x8a0   : > { %4489 = vrsqrt.f32 %v2967_v17  ;;  %v2961_v50 = vmul.f32 0.03125, %v2949_v61  ;;  %v2960_v6 = vmul.f32 0.03125, %v2946_v54 }
 0x8a2   : > { %v4484_v13 = vpop.eup %4483  ;;  %v2969_v23 = vadd.f32 1e-05, %v2961_v50  ;;  %v2968_v1 = vadd.f32 1e-05, %v2960_v6 }
 0x8a3   : > { %v2980_v4 = vmul.f32 %v4484_v13, %v5521_v2  ;;  %v2955_v9 = vpop.xlane.xlu1 %2954  ;;  %v2952_v18 = vpop.xlane.xlu0 %2951 }
 0x8a4   : > { %v4486_v20 = vpop.eup %4485  ;;  %4491 = vrsqrt.f32 %v2969_v23  ;;  %v2963_v16 = vmul.f32 0.03125, %v2955_v9  ;;  %v2962_v3 = vmul.f32 0.03125, %v2952_v18 }
 0x8a5   : > { %v2981_v38 = vmul.f32 %v4486_v20, %v5524_v62  ;;  %4493 = vrsqrt.f32 %v2968_v1  ;;  %v2994_v40 = vmul.f32 %v3653_v49, %v2980_v4 }
 0x8a6   : > { %v4488_v33 = vpop.eup %4487  ;;  %v2971_v34 = vadd.f32 1e-05, %v2963_v16  ;;  %v2970_v19 = vadd.f32 1e-05, %v2962_v3 }
 0x8a7   : > { %v2982_v2 = vmul.f32 %v4488_v33, %v5529_v15  ;;  %v2995_v31 = vmul.f32 %v3653_v49, %v2981_v38  ;;  %v3008_v59 = vadd.f32 %v3654_v53, %v2994_v40 }
 0x8a8   : > { %4495 = vrsqrt.f32 %v2971_v34 }
 0x8a9   : > { %4497 = vrsqrt.f32 %v2970_v19  ;;  %v3009_v11 = vadd.f32 %v3654_v53, %v2995_v31  ;;  %v2996_v36 = vmul.f32 %v3653_v49, %v2982_v2 }
 0x8aa   : > { %v4490_v29 = vpop.eup %4489 }
 0x8ab   : > { %v2983_v62 = vmul.f32 %v4490_v29, %v5538_v22  ;;  %v3016_v26 = vpack.c.bf16 %v3009_v11, %v3008_v59  ;;  %v3010_v30 = vadd.f32 %v3654_v53, %v2996_v36 }
 0x8ad   : > { %v2997_v24 = vmul.f32 %v3653_v49, %v2983_v62  ;;  %3999 = vmatprep.mubr.msk.bf16.mxu0 %vm904_vm1, %v3016_v26 }
 0x8ae   : > { %v4492_v35 = vpop.eup %4491 }
 0x8af   : > { %v4494_v0 = vpop.eup %4493  ;;  %v3011_v39 = vadd.f32 %v3654_v53, %v2997_v24  ;;  %v2985_v32 = vmul.f32 %v4492_v35, %v5542_v27 }
 0x8b0   : > { %v2984_v15 = vmul.f32 %v4494_v0, %v5547_v60 }
 0x8b1   : > { %v3017_v44 = vpack.c.bf16 %v3011_v39, %v3010_v30  ;;  %v2999_v41 = vmul.f32 %v3653_v49, %v2985_v32 }
 0x8b2   : > { %v4496_v55 = vpop.eup %4495  ;;  %v2998_v28 = vmul.f32 %v3653_v49, %v2984_v15 }
 0x8b3   : > { %v4498_v48 = vpop.eup %4497  ;;  %v2987_v22 = vmul.f32 %v4496_v55, %v5553_v42  ;;  %4000 = vmatmul.mubr.msk.bf16.vlgmr.msra.gmra.mrb[48].mxu0 %vm904_vm1, %v3017_v44  ;;  %v3013_v8 = vadd.f32 %v3654_v53, %v2999_v41  ;;  %v4335_v42 = vld [vmem:[%s4775_s12] sm:$0xff]  }
 0x8b4   : > { %v2986_v14 = vmul.f32 %v4498_v48, %v5558_v5  ;;  %v3012_v46 = vadd.f32 %v3654_v53, %v2998_v28  ;;  %4007 = vmatprep.subr.bf16.mxu1 %v4335_v42  ;;  %v4337_v5 = vld [vmem:[%s4775_s12 + $0x10] sm:$0xff]  }
 0x8b5   : > { %v3001_v56 = vmul.f32 %v3653_v49, %v2987_v22  ;;  %4008 = vmatpush3.bf16.msra.mxu1 %v4335_v42 }
 0x8b6   : > { %v3018_v27 = vpack.c.bf16 %v3013_v8, %v3012_v46  ;;  %v3000_v60 = vmul.f32 %v3653_v49, %v2986_v14  ;;  %4009 = vmatprep.subr.bf16.mxu1 %v4336_v7 }
 0x8b7   : > { %v3015_v51 = vadd.f32 %v3654_v53, %v3001_v56 }
 0x8b8   : > { %4003 = vmatprep.mubr.msk.bf16.mxu0 %vm904_vm1, %v3018_v27  ;;  %v3014_v57 = vadd.f32 %v3654_v53, %v3000_v60 }
 0x8b9   : > { %4010 = vmatpush3.bf16.msra.mxu1 %v4336_v7 }
 0x8ba   : > { %v3019_v10 = vpack.c.bf16 %v3015_v51, %v3014_v57  ;;  %4011 = vmatprep.subr.bf16.mxu1 %v4337_v5 }
 0x8bc   : > { %4004 = vmatmul.mubr.msk.bf16.gmra.mrb[52].mxu0 %vm904_vm1, %v3019_v10 }
 0x8bd   : > { %4012 = vmatpush3.bf16.msra.mxu1 %v4337_v5 }
 0x8be   : > { %4013 = vmatprep.subr.bf16.mxu1 %v4338_v47 }
 0x8c1   : > { %4014 = vmatpush3.bf16.msra.mxu1 %v4338_v47 }
 0x986   : > { %v4001_v17 = vpop.f32.mrb[48].mxu0 }
 0x987   : > { %v3098_v61 = vadd.f32 %v4001_v17, %v3655_v45  ;;  %v3089_v54 = vpop.f32.mrb[49].mxu0 }
 0x988   : > { %v3090_v50 = vadd.f32 %v3655_v45, %v3089_v54  ;;  %v4002_v6 = vpop.f32.mrb[50].mxu0 }
 0x989   : > { %v3130_v13 = vmul.f32 0.70710677, %v3098_v61  ;;  %v3101_v49 = vadd.f32 %v4002_v6, %v3655_v45  ;;  %v3092_v23 = vpop.f32.mrb[51].mxu0  ;;  %v3122_v35 = vmul.f32 0.5, %v3098_v61  ;;  %v3662_v6 = vld [vmem:[%s842_s11] ss:$0 sm:$0xff] }
 0x98a   : > { %v3128_v1 = vmul.f32 0.70710677, %v3090_v50  ;;  %v3093_v4 = vadd.f32 %v3655_v45, %v3092_v23  ;;  %v3120_v39 = vmul.f32 0.5, %v3090_v50  ;;  %s5723_s11 = sld [smem:[#allocation3_spill]] }
 0x98b   : > { %4499 = verf.f32 %v3130_v13  ;;  %v3131_v9 = vmul.f32 0.70710677, %v3101_v49  ;;  %v3123_v0 = vmul.f32 0.5, %v3101_v49 }
 0x98c   : > { %4501 = verf.f32 %v3128_v1  ;;  %v3129_v18 = vmul.f32 0.70710677, %v3093_v4  ;;  %v3121_v32 = vmul.f32 0.5, %v3093_v4 }
 0x98d   : > { %4503 = verf.f32 %v3131_v9 }
 0x98e   : > { %4505 = verf.f32 %v3129_v18 }
 0x98f   : > { %v4005_v20 = vpop.f32.mrb[52].mxu0 }
 0x990   : > { %v3114_v16 = vadd.f32 %v4005_v20, %v3655_v45  ;;  %v3105_v3 = vpop.f32.mrb[53].mxu0  ;;  %p3671_p8 = scmp.ne.s32.totalorder %s5723_s11, 1 }
 0x991   : > { %v3106_v38 = vadd.f32 %v3655_v45, %v3105_v3  ;;  %v4006_v40 = vpop.f32.mrb[54].mxu0  ;;  %vm3332_vm6 = vcmask (!%p3671_p8), 257024  }
 0x992   : > { %v3134_v33 = vmul.f32 0.70710677, %v3114_v16  ;;  %v3117_v53 = vadd.f32 %v4006_v40, %v3655_v45  ;;  %v3108_v34 = vpop.f32.mrb[55].mxu0  ;;  %v3126_v51 = vmul.f32 0.5, %v3114_v16 }
 0x993   : > { %v3132_v19 = vmul.f32 0.70710677, %v3106_v38  ;;  %v3109_v2 = vadd.f32 %v3655_v45, %v3108_v34  ;;  %v3124_v42 = vmul.f32 0.5, %v3106_v38 }
 0x994   : > { %4507 = verf.f32 %v3134_v33  ;;  %v3135_v31 = vmul.f32 0.70710677, %v3117_v53  ;;  %v3127_v57 = vmul.f32 0.5, %v3117_v53 }
 0x995   : > { %v4500_v59 = vpop.eup %4499  ;;  %4509 = verf.f32 %v3132_v19  ;;  %v3133_v11 = vmul.f32 0.70710677, %v3109_v2  ;;  %v3125_v7 = vmul.f32 0.5, %v3109_v2 }
 0x996   : > { %v4502_v29 = vpop.eup %4501  ;;  %v3146_v36 = vadd.f32 1.0, %v4500_v59  ;;  %4511 = verf.f32 %v3135_v31 }
 0x997   : > { %v4504_v62 = vpop.eup %4503  ;;  %v3144_v26 = vadd.f32 1.0, %v4502_v29  ;;  %4513 = verf.f32 %v3133_v11 }
 0x998   : > { %v4506_v24 = vpop.eup %4505  ;;  %v3147_v30 = vadd.f32 1.0, %v4504_v62  ;;  %v3154_v44 = vmul.f32 %v3146_v36, %v3122_v35 }
 0x999   : > { %v3145_v15 = vadd.f32 1.0, %v4506_v24  ;;  %v3152_v55 = vmul.f32 %v3144_v26, %v3120_v39 }
 0x99a   : > { %v3155_v41 = vmul.f32 %v3147_v30, %v3123_v0 }
 0x99b   : > { %v3153_v28 = vmul.f32 %v3145_v15, %v3121_v32 }
 0x99c   : > { %v3161_v48 = vpack.c.bf16 %v3155_v41, %v3154_v44 }
 0x99d   : > { %v3160_v22 = vpack.c.bf16 %v3153_v28, %v3152_v55 }
 0x99e   : > { %v4508_v8 = vpop.eup %4507 }
 0x99f   : > { %v4510_v14 = vpop.eup %4509  ;;  %v3150_v46 = vadd.f32 1.0, %v4508_v8  ;;  %4015 = vmatprep.mubr.msk.bf16.mxu1 %vm1971_vm3, %v3160_v22 }
 0x9a0   : > { %v4512_v56 = vpop.eup %4511  ;;  %v3148_v27 = vadd.f32 1.0, %v4510_v14  ;;  %4016 = vmatmul.mubr.msk.bf16.vlgmr.msra.gmra.mrb[48].mxu1 %vm1971_vm3, %v3161_v48 }
 0x9a1   : > { %v4514_v60 = vpop.eup %4513  ;;  %v3151_v10 = vadd.f32 1.0, %v4512_v56  ;;  %v3158_v47 = vmul.f32 %v3150_v46, %v3126_v51 }
 0x9a2   : > { %v3149_v5 = vadd.f32 1.0, %v4514_v60  ;;  %v3156_v17 = vmul.f32 %v3148_v27, %v3124_v42 }
 0x9a3   : > { %v3159_v45 = vmul.f32 %v3151_v10, %v3127_v57 }
 0x9a4   : > { %v3157_v61 = vmul.f32 %v3149_v5, %v3125_v7 }
 0x9a5   : > { %v3163_v54 = vpack.c.bf16 %v3159_v45, %v3158_v47 }
 0x9a6   : > { %v3162_v50 = vpack.c.bf16 %v3157_v61, %v3156_v17 }
 0x9a8   : > { %4019 = vmatprep.mubr.msk.bf16.mxu1 %vm1971_vm3, %v3162_v50 }
 0x9a9   : > { %4020 = vmatmul.mubr.msk.bf16.gmra.mrb[52].mxu1 %vm1971_vm3, %v3163_v54 }
 0xa73   : > { %v4017_v13 = vpop.f32.mrb[48].mxu1 }
 0xa74   : > { %v3258_v49 = vadd.f32 %v4017_v13, %v3662_v6  ;;  %v3249_v23 = vpop.f32.mrb[49].mxu1 }
 0xa75   : > { %v3250_v1 = vadd.f32 %v3662_v6, %v3249_v23  ;;  %v4018_v4 = vpop.f32.mrb[50].mxu1 }
 0xa76   : > { %v3282_v9 = vadd.f32 %v3258_v49, %v5490_v25  ;;  %v3261_v18 = vadd.f32 %v4018_v4, %v3662_v6  ;;  %v3252_v20 = vpop.f32.mrb[51].mxu1 }
 0xa77   : > { %v3280_v16 = vadd.f32 %v3250_v1, %v5488_v58  ;;  %v3253_v3 = vadd.f32 %v3662_v6, %v3252_v20 }
 0xa78   : > { %3290 = vst.msk [vmem:[#allocation2 + $0x10] sm:$0xff] %vm904_vm1, %v3282_v9  ;;  %v3283_v38 = vadd.f32 %v3261_v18, %v5498_v63 }
 0xa79   : > { %3288 = vst.msk [vmem:[#allocation2] sm:$0xff] %vm904_vm1, %v3280_v16  ;;  %v3281_v40 = vadd.f32 %v3253_v3, %v5492_v21 }
 0xa7a   : > { %3291 = vst.msk [vmem:[#allocation2 + $0x18] sm:$0xff] %vm904_vm1, %v3283_v38 }
 0xa7b   : > { %3289 = vst.msk [vmem:[#allocation2 + $0x8] sm:$0xff] %vm904_vm1, %v3281_v40 }
 0xa7c   : > { %v4021_v33 = vpop.f32.mrb[52].mxu1 }
 0xa7d   : > { %v3274_v53 = vadd.f32 %v4021_v33, %v3662_v6  ;;  %v3265_v25 = vpop.f32.mrb[53].mxu1 }
 0xa7e   : > { %v3266_v34 = vadd.f32 %v3662_v6, %v3265_v25  ;;  %v4022_v19 = vpop.f32.mrb[54].mxu1  ;;  %3299 = sbr.rel (%p3671_p8) target bundleno = 2697 (0xa89), region = 100 }
 0xa7f   : > { %v3286_v58 = vadd.f32 %v3274_v53, %v5512_v43  ;;  %v3277_v2 = vadd.f32 %v4022_v19, %v3662_v6  ;;  %v3268_v31 = vpop.f32.mrb[55].mxu1  ;;  %v3690_v43 = vpack.c.bf16 (!%p3671_p8), %v3280_v16, %v3280_v16 }
 0xa80   : > { %v3284_v59 = vadd.f32 %v3266_v34, %v5502_v52  ;;  %v3269_v63 = vadd.f32 %v3662_v6, %v3268_v31  ;;  %v3691_v52 = vpack.c.bf16 (!%p3671_p8), %v3281_v40, %v3281_v40 }
 0xa81   : > { %3294 = vst.msk [vmem:[#allocation2 + $0x30] sm:$0xff] %vm904_vm1, %v3286_v58  ;;  %v3287_v21 = vadd.f32 %v3277_v2, %v5508_v37  ;;  %v3692_v37 = vpack.c.bf16 (!%p3671_p8), %v3282_v9, %v3282_v9  ;;  %v3696_v62 = vpack.c.bf16 (!%p3671_p8), %v3286_v58, %v3286_v58 }
 0xa82   : > { %3292 = vst.msk [vmem:[#allocation2 + $0x20] sm:$0xff] %vm904_vm1, %v3284_v59  ;;  %v3285_v11 = vadd.f32 %v3269_v63, %v5504_v12  ;;  %v3693_v12 = vpack.c.bf16 (!%p3671_p8), %v3283_v38, %v3283_v38  ;;  %v3694_v29 = vpack.c.bf16 (!%p3671_p8), %v3284_v59, %v3284_v59 }
 0xa83   : > { %3295 = vst.msk [vmem:[#allocation2 + $0x38] sm:$0xff] %vm904_vm1, %v3287_v21  ;;  %v3697_v26 = vpack.c.bf16 (!%p3671_p8), %v3287_v21, %v3287_v21 }
 0xa84   : > { %3293 = vst.msk [vmem:[#allocation2 + $0x28] sm:$0xff] %vm904_vm1, %v3285_v11  ;;  %v3695_v36 = vpack.c.bf16 (!%p3671_p8), %v3285_v11, %v3285_v11 }
 0xa85   : > { %3333 = vst.msk [vmem:[%s4780_s7] sm:$0xf] %vm3332_vm6, %v3690_v43  ;;  %3334 = vst.msk [vmem:[%s4780_s7 + $0x4] sm:$0xf] %vm3332_vm6, %v3691_v52 }
 0xa86   : > { %3335 = vst.msk [vmem:[%s4780_s7 + $0x8] sm:$0xf] %vm3332_vm6, %v3692_v37  ;;  %3336 = vst.msk [vmem:[%s4780_s7 + $0xc] sm:$0xf] %vm3332_vm6, %v3693_v12 }
 0xa87   : > { %3337 = vst.msk [vmem:[%s4780_s7 + $0x10] sm:$0xf] %vm3332_vm6, %v3694_v29  ;;  %3338 = vst.msk [vmem:[%s4780_s7 + $0x14] sm:$0xf] %vm3332_vm6, %v3695_v36 }
 0xa88   : > { %3339 = vst.msk [vmem:[%s4780_s7 + $0x18] sm:$0xf] %vm3332_vm6, %v3696_v62  ;;  %3340 = vst.msk [vmem:[%s4780_s7 + $0x1c] sm:$0xf] %vm3332_vm6, %v3697_v26 }
 0xa89 PF: > { %s5724_s20 = sld [smem:[#allocation6_spill]]  ;;  %s5725_s27 = sld [smem:[#allocation4_spill]] }
 0xa8a   : > { %s5726_s28 = sld [smem:[#allocation5_spill]]  ;;  %s5727_s29 = sld [smem:[#allocation7_spill]] }
 0xa8b   : > { %s5728_s30 = sld [smem:[#allocation8_spill]] }
 0xa8f   : > { %s28_s0 = sadd.s32 1, %s5724_s20  }
 0xa90   : > { %p25_p9 = scmp.ge.s32.totalorder %s28_s0, 6  }
 0xa92   :  { %27 = sbr.rel (!%p25_p9) target bundleno = 14 (0xe), region = 178 }

// kernel: _lambda_.8
= control target key start
LH: loop header
LB: loop body
LE: loop exit
PB: predicated region body
PF: predicated region fallthrough
CT: control target
= control target key end

     0   :  { %s465_s12 = smov 0   ;;  %s512_s0 = inlined_call_operand.vmem [shape: bf16[32,128], index: 0, kind: input, shape index: {}]   ;;  %s513_s1 = inlined_call_operand.vmem [shape: bf16[128,32], index: 1, kind: input, shape index: {}]   ;;  %s514_s2 = inlined_call_operand.vmem [shape: f32[1,32], index: 2, kind: input, shape index: {}]   ;;  %s515_s3 = inlined_call_operand.vmem [shape: bf16[32,32], index: 3, kind: output, shape index: {}]  }
   0x1 LB: > { %s362_s13 = sadd.s32 4294967295, %s441_s12   ;;  %p366_p0 = scmp.ge.s32.totalorder %s441_s12, 1  ;;  %s441_s12 = sphi %s465_s12, %s13_s12  }
   0x2   : > { %p138_p1 = scmp.lt.s32.totalorder %s441_s12, 3 }
   0x4   : > { %p139_p2 = pnand %p366_p0, %p138_p1 }
   0x5   : > { %v426_v0 = vld [vmem:[%s513_s1] sm:$0xff] (!%p139_p2)   ;;  %v443_v1 = vmov (!%p139_p2), 0.0   ;;  %v427_v2 = vld [vmem:[%s513_s1 + $0x8] sm:$0xff] (!%p139_p2)   ;;  %vm444_vm0 = vmmov (!%p139_p2), 0   ;;  %s367_s18 = sshll.u32 (!%p139_p2), %s362_s13, 1  ;;  %v428_v3 = vld [vmem:[%s513_s1 + $0x10] sm:$0xff] (!%p139_p2)  }
   0x6   : > { %142 = sbr.rel (%p139_p2) target bundleno = 257 (0x101), region = 32  ;;  %396 = vmatprep.subr.bf16.mxu0 (!%p139_p2), %v443_v1  ;;  %412 = vmatprep.mubr.msk.bf16.mxu0 (!%p139_p2), %vm444_vm0, %v443_v1  ;;  %p163_p3 = scmp.lt.s32.totalorder (!%p139_p2), %s367_s18, 3  ;;  %v429_v4 = vld [vmem:[%s513_s1 + $0x18] sm:$0xff] (!%p139_p2)   ;;  %v430_v5 = vld [vmem:[%s513_s1 + $0x20] sm:$0xff] (!%p139_p2)   ;;  %v431_v6 = vld [vmem:[%s513_s1 + $0x28] sm:$0xff] (!%p139_p2)   ;;  %vm303_vm1 = vcmask (!%p139_p2), 257024  }
   0x7   : > { %397 = vmatpush3.bf16.msra.mxu0 (!%p139_p2), %v426_v0  ;;  %v432_v7 = vld [vmem:[%s513_s1 + $0x30] sm:$0xff] (!%p139_p2)   ;;  %v433_v8 = vld [vmem:[%s513_s1 + $0x38] sm:$0xff] (!%p139_p2)   ;;  %v371_v10 = vld [vmem:[%s514_s2] ss:$0 sm:$0xff] (!%p139_p2) }
   0x8   : > { %398 = vmatprep.subr.bf16.mxu0 (!%p139_p2), %v443_v1 }
   0xb   : > { %399 = vmatpush3.bf16.msra.mxu0 (!%p139_p2), %v427_v2 }
   0xc   : > { %400 = vmatprep.subr.bf16.mxu0 (!%p139_p2), %v443_v1 }
   0xd   : > { %s517_s18 = smov (!%p163_p3, %s367_s18), 3 }
   0xe   : > { %s368_s21 = sshll.u32 %s517_s18, 2 }
   0xf   : > { %s166_s24 = scalar_lea.vmem %s512_s0, %s368_s21  ;;  %401 = vmatpush3.bf16.msra.mxu0 %v428_v3  ;;  %s172_s13 = scalar_lea.vmem %s515_s3, %s368_s21 }
  0x10   : > { %402 = vmatprep.subr.bf16.mxu0 %v443_v1  ;;  %v434_v9 = vld [vmem:[%s166_s24] sm:$0xff]  }
  0x13   : > { %403 = vmatpush3.bf16.msra.mxu0 %v429_v4 }
  0x14   : > { %404 = vmatprep.subr.bf16.mxu0 %v443_v1 }
  0x17   : > { %405 = vmatpush3.bf16.msra.mxu0 %v430_v5 }
  0x18   : > { %406 = vmatprep.subr.bf16.mxu0 %v443_v1 }
  0x1b   : > { %407 = vmatpush3.bf16.msra.mxu0 %v431_v6 }
  0x1c   : > { %408 = vmatprep.subr.bf16.mxu0 %v443_v1 }
  0x1f   : > { %409 = vmatpush3.bf16.msra.mxu0 %v432_v7 }
  0x20   : > { %410 = vmatprep.subr.bf16.mxu0 %v443_v1 }
  0x23   : > { %411 = vmatpush3.bf16.msra.mxu0 %v433_v8 }
  0x26   : > { %413 = vmatmul.mubr.bf16.vlgmr.msra.gmra.mrb[0].mxu0 %v434_v9 }
  0xf9   : > { %v288_v11 = vpop.f32.mrb[0].mxu0 }
  0xfa   : > { %v289_v12 = vadd.f32 %v371_v10, %v288_v11  ;;  %v414_v13 = vpop.f32.mrb[1].mxu0 }
  0xfb   : > { %v291_v14 = vpop.f32.mrb[2].mxu0 }
  0xfc   : > { %v385_v15 = vpack.c.bf16 %v289_v12, %v289_v12  ;;  %v292_v16 = vadd.f32 %v371_v10, %v291_v14  ;;  %v415_v17 = vpop.f32.mrb[3].mxu0 }
  0xfe   : > { %304 = vst.msk [vmem:[%s172_s13] sm:$0xf] %vm303_vm1, %v385_v15  ;;  %v386_v18 = vpack.c.bf16 %v292_v16, %v292_v16 }
 0x100   : > { %305 = vst.msk [vmem:[%s172_s13 + $0x4] sm:$0xf] %vm303_vm1, %v386_v18 }
 0x101 PF: > { %s13_s12 = sadd.s32 1, %s441_s12  }
 0x102   : > { %p10_p4 = scmp.ge.s32.totalorder %s13_s12, 4  }
 0x104   :  { %12 = sbr.rel (!%p10_p4) target bundleno = 1 (0x1), region = 62 }

// kernel: _lambda_.9
= control target key start
LH: loop header
LB: loop body
LE: loop exit
PB: predicated region body
PF: predicated region fallthrough
CT: control target
= control target key end

     0   :  { %s2719_s27 = smov 0   ;;  %s2721_s28 = smov 0   ;;  %s3063_s0 = inlined_call_operand.vmem [shape: bf16[2,16,32], index: 0, kind: input, shape index: {}]   ;;  %s3064_s1 = inlined_call_operand.vmem [shape: f32[16,32], index: 1, kind: input, shape index: {}]   ;;  %s3065_s2 = inlined_call_operand.vmem [shape: f32[2,1,32], index: 2, kind: input, shape index: {}]   ;;  %s3066_s3 = inlined_call_operand.vmem [shape: f32[2,1,32], index: 3, kind: input, shape index: {}]   ;;  %s3067_s4 = inlined_call_operand.vmem [shape: bf16[2,32,32], index: 4, kind: input, shape index: {}]   ;;  %s3068_s5 = inlined_call_operand.vmem [shape: f32[2,1,32], index: 5, kind: input, shape index: {}]   ;;  %s3069_s6 = inlined_call_operand.vmem [shape: bf16[2,32,32], index: 6, kind: input, shape index: {}]   ;;  %s3070_s7 = inlined_call_operand.vmem [shape: f32[2,1,32], index: 7, kind: input, shape index: {}]   ;;  %s3071_s8 = inlined_call_operand.vmem [shape: bf16[2,32,32], index: 8, kind: input, shape index: {}]   ;;  %s3072_s9 = inlined_call_operand.vmem [shape: f32[2,1,32], index: 9, kind: input, shape index: {}]   ;;  %s3073_s10 = inlined_call_operand.vmem [shape: bf16[2,32,32], index: 10, kind: input, shape index: {}]   ;;  %s3074_s11 = inlined_call_operand.vmem [shape: f32[2,1,32], index: 11, kind: input, shape index: {}]   ;;  %s3075_s12 = inlined_call_operand.vmem [shape: f32[2,1,32], index: 12, kind: input, shape index: {}]   ;;  %s3076_s13 = inlined_call_operand.vmem [shape: f32[2,1,32], index: 13, kind: input, shape index: {}]   ;;  %s3077_s14 = inlined_call_operand.vmem [shape: bf16[2,32,64], index: 14, kind: input, shape index: {}]   ;;  %s3078_s15 = inlined_call_operand.vmem [shape: f32[2,1,64], index: 15, kind: input, shape index: {}]   ;;  %s3079_s16 = inlined_call_operand.vmem [shape: bf16[2,64,32], index: 16, kind: input, shape index: {}]   ;;  %s3080_s17 = inlined_call_operand.vmem [shape: f32[2,1,32], index: 17, kind: input, shape index: {}]   ;;  %s3081_s18 = inlined_call_operand.vmem [shape: bf16[2,16,32], index: 18, kind: output, shape index: {}]  }
   0x1   :  { %3088 = sst [smem:[#allocation10_spill]] %s3063_s0  ;;  %s2723_s29 = smov 0  }
   0x2   :  { %3089 = sst [smem:[#allocation11_spill]] %s3064_s1  ;;  %s2725_s30 = smov 0  }
   0x3   :  { %3090 = sst [smem:[#allocation12_spill]] %s3065_s2  ;;  %s2727_s0 = smov 0  }
   0x4   :  { %3091 = sst [smem:[#allocation13_spill]] %s3067_s4 }
   0x5   :  { %3092 = sst [smem:[#allocation14_spill]] %s3069_s6 }
   0x6   :  { %3093 = sst [smem:[#allocation15_spill]] %s3070_s7 }
   0x7   :  { %3094 = sst [smem:[#allocation16_spill]] %s3071_s8 }
   0x8   :  { %3095 = sst [smem:[#allocation17_spill]] %s3073_s10 }
   0x9   :  { %3096 = sst [smem:[#allocation18_spill]] %s3074_s11 }
   0xa   :  { %3097 = sst [smem:[#allocation19_spill]] %s3075_s12 }
   0xb   :  { %3098 = sst [smem:[#allocation20_spill]] %s3078_s15 }
   0xc   :  { %3099 = sst [smem:[#allocation21_spill]] %s3079_s16 }
   0xd   :  { %3100 = sst [smem:[#allocation22_spill]] %s3080_s17 }
   0xe   :  { %3101 = sst [smem:[#allocation23_spill]] %s3081_s18 }
   0xf LB: > { %3102 = sst [smem:[#allocation3_spill]] %s2598_s27  ;;  %s37_s19 = sadd.s32 1, %s2606_s29  ;;  %s2614_s0 = sphi %s2727_s0, %s28_s0   ;;  %s2610_s30 = sphi %s2725_s30, %s3144_s30   ;;  %s2606_s29 = sphi %s2723_s29, %s3143_s29   ;;  %s2602_s28 = sphi %s2721_s28, %s3142_s28   ;;  %s2598_s27 = sphi %s2719_s27, %s3141_s27  }
  0x10   : > { %3103 = sst [smem:[#allocation4_spill]] %s2606_s29  ;;  %s40_s1 = sadd.s32 1, %s2610_s30 }
  0x11   : > { %3104 = sst [smem:[#allocation5_spill]] %s2610_s30  ;;  %p38_p0 = scmp.ge.s32.totalorder %s37_s19, 2 }
  0x12   : > { %3105 = sst [smem:[#allocation6_spill]] %s2614_s0  ;;  %p2199_p1 = scmp.ge.s32.totalorder %s2614_s0, 1 }
  0x13   : > { %p664_p2 = scmp.lt.s32.totalorder %s2614_s0, 5  ;;  %s3146_s19 = smov (%p38_p0, %s37_s19), 0 }
  0x14   : > { %3106 = sst [smem:[#allocation7_spill]] %s3146_s19  ;;  %s3148_s1 = smov (!%p38_p0, %s40_s1), %s2610_s30 }
  0x15   : > { %p665_p3 = pnand %p2199_p1, %p664_p2  ;;  %p42_p4 = scmp.ge.s32.totalorder %s3148_s1, 2 }
  0x17   : > { %s3150_s1 = smov (%p42_p4, %s3148_s1), 0  ;;  %668 = sbr.rel (%p665_p3) target bundleno = 2645 (0xa55), region = 92 }
  0x18   : > { %3107 = sst [smem:[#allocation8_spill]] %s3150_s1 }
  0x1e   : > { %p778_p5 = scmp.lt.s32.totalorder %s2602_s28, 1  ;;  %p783_p6 = scmp.lt.s32.totalorder %s2598_s27, 1 }
  0x1f   : > { %s3108_s23 = sld [smem:[#allocation10_spill]]  ;;  %s3110_s4 = sld [smem:[#allocation13_spill]] }
  0x20   : > { %s3152_s28 = smov (!%p778_p5, %s2602_s28), 1  ;;  %s3111_s6 = sld [smem:[#allocation14_spill]] }
  0x21   : > { %s2753_s20 = scalar_select %p783_p6, %s2598_s27, 1 }
  0x22   : > { %s2260_s21 = sshll.u32 %s3152_s28, 3  ;;  %s3113_s8 = sld [smem:[#allocation16_spill]] }
  0x23   : > { %s2261_s27 = sshll.u32 %s2753_s20, 4  ;;  %s3114_s10 = sld [smem:[#allocation17_spill]] }
  0x24   : > { %s2814_s18 = scalar_lea.vmem %s3077_s14, %s2261_s27  ;;  %s3120_s29 = sld [smem:[#allocation21_spill]] }
  0x25   : > { %s782_s24 = scalar_lea.vmem %s3108_s23, %s2260_s21  ;;  %s2770_s28 = scalar_lea.vmem %s3110_s4, %s2261_s27 }
  0x26   : > { %s2779_s25 = scalar_lea.vmem %s3111_s6, %s2261_s27  ;;  %s3118_s4 = sld [smem:[#allocation20_spill]] }
  0x27   : > { %s3119_s6 = sld [smem:[#allocation22_spill]] }
  0x28   : > { %s2788_s19 = scalar_lea.vmem %s3113_s8, %s2261_s27  ;;  %s3121_s8 = sld [smem:[#allocation23_spill]] }
  0x29   : > { %s2797_s2 = scalar_lea.vmem %s3114_s10, %s2261_s27  ;;  %s3122_s27 = sld [smem:[#allocation3_spill]] }
  0x2a   : > { %3115 = sst [smem:[#allocation9_spill]] %s2797_s2  ;;  %s2266_s2 = sshll.u32 %s2753_s20, 5 }
  0x2b   : > { %s2828_s12 = scalar_lea.vmem %s3120_s29, %s2266_s2 }
  0x2c   : > { %s834_s10 = scalar_lea.vmem %s3118_s4, %s2753_s20 }
  0x2d   : > { %s842_s11 = scalar_lea.vmem %s3119_s6, %s2753_s20 }
  0x2e   : > { %s2833_s7 = scalar_lea.vmem %s3121_s8, %s2260_s21 }
  0x2f   : > { %p2216_p7 = scmp.ne.s32.totalorder %s3122_s27, 0 }
  0x30   : > { %v2271_v0 = vld [vmem:[%s782_s24] sm:$0xff] (!%p2216_p7)   ;;  %s3123_s17 = sld [smem:[#allocation11_spill]] (!%p2216_p7)  ;;  %vm861_vm0 = vcmask (!%p2216_p7), 261120  }
  0x31   : > { %852 = sbr.rel (%p2216_p7) target bundleno = 58 (0x3a), region = 96  ;;  %v2272_v3 = vunpack.c.l.bf16 (!%p2216_p7), %v2271_v0  ;;  %v2273_v4 = vunpack.c.h.bf16 (!%p2216_p7), %v2271_v0 }
  0x36   : > { %v857_v1 = vld [vmem:[%s3123_s17] sm:$0xff] (!%p2216_p7)  ;;  %v858_v2 = vld [vmem:[%s3123_s17 + $0x8] sm:$0xff] (!%p2216_p7) }
  0x37   : > { %v859_v5 = vadd.f32 (!%p2216_p7), %v2272_v3, %v857_v1  ;;  %v860_v6 = vadd.f32 (!%p2216_p7), %v2273_v4, %v858_v2 }
  0x39   : > { %862 = vst.msk [vmem:[#allocation2] sm:$0xff] %vm861_vm0, %v859_v5  ;;  %863 = vst.msk [vmem:[#allocation2 + $0x8] sm:$0xff] %vm861_vm0, %v860_v6 }
  0x3a PF: > { %vm868_vm1 = vcmask 261120   ;;  %v2518_v21 = vld [vmem:[%s2770_s28] sm:$0xff]   ;;  %v2616_v23 = vmov 0.0   ;;  %v2520_v24 = vld [vmem:[%s2770_s28 + $0x8] sm:$0xff]   ;;  %vm2617_vm2 = vmmov 0   ;;  %s3124_s24 = sld [smem:[#allocation12_spill]]  ;;  %s3126_s29 = scalar_lea.vmem %s3066_s3, %s2753_s20 }
  0x3b   : > { %v2519_v22 = vld [vmem:[%s2779_s25] sm:$0xff]   ;;  %2310 = vmatprep.subr.bf16.mxu0 %v2616_v23  ;;  %2318 = vmatprep.subr.bf16.mxu1 %v2616_v23  ;;  %v2521_v25 = vld [vmem:[%s2779_s25 + $0x8] sm:$0xff]   ;;  %s3128_s0 = sld [smem:[#allocation15_spill]]  ;;  %vm1182_vm3 = vcmask 64512   ;;  %s2618_s27 = smov 112   ;;  %vm1371_vm4 = vcmask 130048  }
  0x3c   : > { %2311 = vmatpush3.bf16.msra.mxu0 %v2518_v21  ;;  %2319 = vmatpush3.bf16.msra.mxu1 %v2519_v22  ;;  %v2218_v38 = vld [vmem:[%s3126_s29] ss:$0 sm:$0xff]  ;;  %v2523_v44 = vld [vmem:[%s2788_s19 + $0x8] sm:$0xff]   ;;  %s2619_s4 = smov 120   ;;  %s3130_s6 = scalar_lea.vmem %s3072_s9, %s2753_s20  ;;  %vm1668_vm5 = vcmask 195584   ;;  %vm1903_vm6 = vcmask 523264  }
  0x3d   : > { %2312 = vmatprep.subr.bf16.mxu0 %v2616_v23  ;;  %2320 = vmatprep.subr.bf16.mxu1 %v2616_v23  ;;  %v2522_v42 = vld [vmem:[%s2788_s19] sm:$0xff]   ;;  %s3127_s19 = scalar_lea.vmem %s3068_s5, %s2753_s20  ;;  %s2620_s8 = smov 104  }
  0x3e   : > { %2314 = vmatprep.mubr.msk.bf16.mxu0 %vm2617_vm2, %v2616_v23  ;;  %2322 = vmatprep.mubr.msk.bf16.mxu1 %vm2617_vm2, %v2616_v23  ;;  %v2219_v45 = vld [vmem:[%s3127_s19] ss:$0 sm:$0xff]  ;;  %s3131_s21 = sld [smem:[#allocation9_spill]]  ;;  %s2623_s2 = smov 24  }
  0x3f   : > { %v2227_v2 = vld [vmem:[%s3130_s6] ss:$0 sm:$0xff]  ;;  %s3132_s15 = sld [smem:[#allocation18_spill]]  ;;  %s3134_s26 = sld [smem:[#allocation19_spill]] }
  0x40   : > { %v2842_v7 = vld [vmem:[#allocation2] sm:$0xff]  ;;  %v2844_v8 = vld [vmem:[#allocation2 + $0x8] sm:$0xff]  ;;  %2313 = vmatpush3.bf16.msra.mxu0 %v2520_v24  ;;  %2321 = vmatpush3.bf16.msra.mxu1 %v2521_v25  ;;  %s3125_s28 = scalar_lea.vmem %s3124_s24, %s2753_s20  ;;  %s2621_s24 = smov 8  }
  0x41   : > { %v869_v9 = vsel %vm868_vm1, %v2842_v7, 0.0  ;;  %v872_v10 = vsel %vm868_vm1, %v2844_v8, 0.0  ;;  %2326 = vmatprep.subr.bf16.mxu0 %v2616_v23  ;;  %2334 = vmatprep.subr.bf16.mxu1 %v2616_v23  ;;  %v2217_v34 = vld [vmem:[%s3125_s28] ss:$0 sm:$0xff]  ;;  %s3129_s30 = scalar_lea.vmem %s3128_s0, %s2753_s20  ;;  %s2622_s28 = smov 16  }
  0x42   : > { %870 = vadd.xlane.f32.xlu0 %v869_v9  ;;  %v2223_v47 = vld [vmem:[%s3129_s30] ss:$0 sm:$0xff] }
  0x45   : > { %s3133_s23 = scalar_lea.vmem %s3132_s15, %s2753_s20 }
  0x46   : > { %873 = vadd.xlane.f32.xlu0 %v872_v10 }
  0xcf   : > { %v871_v11 = vpop.xlane.xlu0 %870 }
  0xd0   : > { %v876_v12 = vmul.f32 0.03125, %v871_v11 }
  0xd2   : > { %v878_v13 = vsub.f32 %v2842_v7, %v876_v12 }
  0xd3   : > { %v874_v14 = vpop.xlane.xlu0 %873 }
  0xd4   : > { %v877_v15 = vmul.f32 0.03125, %v874_v14  ;;  %v880_v16 = vmul.f32 %v878_v13, %v878_v13 }
  0xd6   : > { %v879_v17 = vsub.f32 %v2844_v8, %v877_v15  ;;  %v882_v18 = vsel %vm868_vm1, %v880_v16, 0.0 }
  0xd7   : > { %883 = vadd.xlane.f32.xlu1 %v882_v18 }
  0xd8   : > { %v881_v19 = vmul.f32 %v879_v17, %v879_v17 }
  0xda   : > { %v885_v20 = vsel %vm868_vm1, %v881_v19, 0.0 }
  0xdb   : > { %886 = vadd.xlane.f32.xlu1 %v885_v20 }
 0x164   : > { %v884_v26 = vpop.xlane.xlu1 %883 }
 0x165   : > { %v888_v27 = vmul.f32 0.03125, %v884_v26 }
 0x167   : > { %v890_v28 = vadd.f32 1e-05, %v888_v27 }
 0x168   : > { %v887_v29 = vpop.xlane.xlu1 %886 }
 0x169   : > { %2532 = vrsqrt.f32 %v890_v28  ;;  %v889_v30 = vmul.f32 0.03125, %v887_v29 }
 0x16b   : > { %v891_v31 = vadd.f32 1e-05, %v889_v30 }
 0x16d   : > { %2534 = vrsqrt.f32 %v891_v31 }
 0x173   : > { %v2533_v32 = vpop.eup %2532 }
 0x174   : > { %v894_v33 = vmul.f32 %v2533_v32, %v878_v13 }
 0x176   : > { %v902_v37 = vmul.f32 %v2217_v34, %v894_v33 }
 0x177   : > { %v2535_v35 = vpop.eup %2534 }
 0x178   : > { %v895_v36 = vmul.f32 %v2535_v35, %v879_v17  ;;  %v910_v40 = vadd.f32 %v2218_v38, %v902_v37 }
 0x17a   : > { %v903_v39 = vmul.f32 %v2217_v34, %v895_v36 }
 0x17c   : > { %v911_v41 = vadd.f32 %v2218_v38, %v903_v39 }
 0x17e   : > { %v912_v43 = vpack.c.bf16 %v911_v41, %v910_v40 }
 0x180   : > { %2315 = vmatmul.mubr.msk.bf16.vlgmr.msra.gmra.mrb[0].mxu0 %vm868_vm1, %v912_v43  ;;  %2323 = vmatmul.mubr.msk.bf16.vlgmr.msra.gmra.mrb[0].mxu1 %vm868_vm1, %v912_v43 }
 0x181   : > { %2327 = vmatpush3.bf16.msra.mxu0 %v2522_v42  ;;  %2330 = vmatprep.mubr.msk.bf16.mxu0 %vm2617_vm2, %v2616_v23 }
 0x182   : > { %2328 = vmatprep.subr.bf16.mxu0 %v2616_v23  ;;  %2336 = vmatprep.mubr.msk.bf16.mxu1 %vm2617_vm2, %v2616_v23 }
 0x185   : > { %2329 = vmatpush3.bf16.msra.mxu0 %v2523_v44 }
 0x186   : > { %2340 = vmatprep.subr.bf16.mxu0 %v2616_v23 }
 0x188   : > { %2331 = vmatmul.mubr.msk.bf16.vlgmr.msra.gmra.mrb[4].mxu0 %vm868_vm1, %v912_v43 }
 0x189   : > { %2342 = vmatprep.mubr.msk.bf16.mxu0 %vm2617_vm2, %v2616_v23 }
 0x253   : > { %v973_v46 = vpop.f32.mrb[0].mxu0  ;;  %v1039_v48 = vpop.f32.mrb[0].mxu1 }
 0x254   : > { %v974_v49 = vadd.f32 %v2219_v45, %v973_v46  ;;  %v2316_v50 = vpop.f32.mrb[1].mxu0  ;;  %v2324_v51 = vpop.f32.mrb[1].mxu1  ;;  %v1040_v54 = vadd.f32 %v2223_v47, %v1039_v48 }
 0x255   : > { %v976_v52 = vpop.f32.mrb[2].mxu0  ;;  %v1042_v53 = vpop.f32.mrb[2].mxu1 }
 0x256   : > { %v977_v55 = vadd.f32 %v2219_v45, %v976_v52  ;;  %v1043_v56 = vadd.f32 %v2223_v47, %v1042_v53  ;;  %v2317_v57 = vpop.f32.mrb[3].mxu0  ;;  %v2325_v58 = vpop.f32.mrb[3].mxu1  ;;  %v980_v59 = vmul.f32 0.35355338, %v974_v49 }
 0x258   : > { %v981_v60 = vmul.f32 0.35355338, %v977_v55  ;;  %v2463_v61 = vpack.i.bf16 %v1043_v56, %v1040_v54  ;;  %v1154_v62 = vpack.c.bf16 %v1043_v56, %v1040_v54 }
 0x25a   : > { %v1130_v63 = vpack.c.bf16 %v981_v60, %v980_v59  ;;  %2464 = vrot.lane.b32.xlu1 %v2463_v61, %s2618_s27  ;;  %2459 = vrot.lane.b32.xlu0 %v2463_v61, %s2619_s4  ;;  %v1187_v0 = vsel %vm1182_vm3, %v1154_v62, 0  ;;  %v2478_v1 = vpack.i.bf16 %v981_v60, %v980_v59 }
 0x25b   : > { %v1103_v3 = vpop.f32.mrb[4].mxu0  ;;  %2335 = vmatpush3.bf16.xpose.msra.mxu1 %v1187_v0 }
 0x25c   : > { %v2332_v4 = vpop.f32.mrb[5].mxu0  ;;  %2346 = vmatprep.subr.bf16.mxu1 %v2616_v23  ;;  %v1104_v6 = vadd.f32 %v2227_v2, %v1103_v3 }
 0x25d   : > { %v1106_v5 = vpop.f32.mrb[6].mxu0 }
 0x25e   : > { %v1107_v9 = vadd.f32 %v2227_v2, %v1106_v5  ;;  %2479 = vrot.lane.b32.xlu0 %v2478_v1, %s2618_s27  ;;  %2469 = vrot.lane.b32.xlu1 %v2478_v1, %s2619_s4  ;;  %v2333_v10 = vpop.f32.mrb[7].mxu0 }
 0x260   : > { %v1178_v11 = vpack.c.bf16 %v1107_v9, %v1104_v6  ;;  %v2912_v12 = vpack.i.bf16 %v1107_v9, %v1104_v6 }
 0x262   : > { %2474 = vrot.lane.b32.xlu1 %v2463_v61, %s2620_s8  ;;  %2337 = vmatmul.mubr.msk.bf16.vlgmr.msra.gmra.mrb[4].mxu1 %vm1182_vm3, %v1130_v63 }
 0x263   : > { %2348 = vmatprep.mubr.msk.bf16.mxu1 %vm2617_vm2, %v2616_v23 }
 0x266   : > { %2484 = vrot.lane.b32.xlu1 %v2478_v1, %s2620_s8 }
 0x2cc   : > { %v2465_v13 = vpop.permute.xlu1 %2464  ;;  %v2460_v14 = vpop.permute.xlu0 %2459 }
 0x2cd   : > { %v2467_v15 = vunpack.i.h.bf16 %v2465_v13  ;;  %v2466_v16 = vunpack.i.l.bf16 %v2465_v13  ;;  %v2462_v17 = vunpack.i.h.bf16 %v2460_v14  ;;  %v2461_v18 = vunpack.i.l.bf16 %v2460_v14 }
 0x2cf   : > { %v1156_v19 = vpack.c.bf16 %v2467_v15, %v2466_v16  ;;  %v1155_v20 = vpack.c.bf16 %v2462_v17, %v2461_v18 }
 0x2d0   : > { %v2470_v21 = vpop.permute.xlu1 %2469  ;;  %v2480_v22 = vpop.permute.xlu0 %2479 }
 0x2d1   : > { %v1234_v24 = vsel %vm1182_vm3, %v1155_v20, 0  ;;  %v1281_v25 = vsel %vm1182_vm3, %v1156_v19, 0  ;;  %v2482_v26 = vunpack.i.h.bf16 %v2480_v22  ;;  %v2481_v27 = vunpack.i.l.bf16 %v2480_v22 }
 0x2d2   : > { %2341 = vmatpush3.bf16.xpose.msra.mxu0 %v1234_v24  ;;  %2347 = vmatpush3.bf16.xpose.msra.mxu1 %v1281_v25  ;;  %v2472_v28 = vunpack.i.h.bf16 %v2470_v21  ;;  %v2471_v29 = vunpack.i.l.bf16 %v2470_v21 }
 0x2d3   : > { %2352 = vmatprep.subr.bf16.mxu0 %v2616_v23  ;;  %2358 = vmatprep.subr.bf16.mxu1 %v2616_v23  ;;  %v1132_v34 = vpack.c.bf16 %v2482_v26, %v2481_v27 }
 0x2d4   : > { %v2475_v30 = vpop.permute.xlu1 %2474  ;;  %v1131_v35 = vpack.c.bf16 %v2472_v28, %v2471_v29 }
 0x2d5   : > { %v2477_v31 = vunpack.i.h.bf16 %v2475_v30  ;;  %v2476_v32 = vunpack.i.l.bf16 %v2475_v30 }
 0x2d7   : > { %v1157_v33 = vpack.c.bf16 %v2477_v31, %v2476_v32 }
 0x2d8   : > { %v2485_v36 = vpop.permute.xlu1 %2484 }
 0x2d9   : > { %v1328_v37 = vsel %vm1182_vm3, %v1157_v33, 0  ;;  %2343 = vmatmul.mubr.msk.bf16.vlgmr.msra.gmra.mrb[8].mxu0 %vm1182_vm3, %v1131_v35  ;;  %2349 = vmatmul.mubr.msk.bf16.vlgmr.msra.gmra.mrb[8].mxu1 %vm1182_vm3, %v1132_v34  ;;  %v2487_v38 = vunpack.i.h.bf16 %v2485_v36  ;;  %v2486_v39 = vunpack.i.l.bf16 %v2485_v36 }
 0x2da   : > { %2353 = vmatpush3.bf16.xpose.msra.mxu0 %v1328_v37  ;;  %2359 = vmatpush3.bf16.msra.mxu1 %v1178_v11 }
 0x2db   : > { %2354 = vmatprep.mubr.msk.bf16.mxu0 %vm2617_vm2, %v2616_v23  ;;  %2360 = vmatprep.mubr.msk.bf16.mxu1 %vm2617_vm2, %v2616_v23  ;;  %v1133_v40 = vpack.c.bf16 %v2487_v38, %v2486_v39 }
 0x2dc   : > { %2370 = vmatprep.subr.bf16.mxu1 %v2616_v23  ;;  %2364 = vmatprep.subr.bf16.mxu0 %v2616_v23 }
 0x2e1   : > { %2355 = vmatmul.mubr.msk.bf16.vlgmr.msra.gmra.mrb[12].mxu0 %vm1182_vm3, %v1133_v40 }
 0x2e2   : > { %2366 = vmatprep.mubr.msk.bf16.mxu0 %vm2617_vm2, %v2616_v23 }
 0x335   : > { %v1223_v41 = vpop.f32.mrb[4].mxu1 }
 0x336   : > { %v2338_v42 = vpop.f32.mrb[5].mxu1  ;;  %v1372_v43 = vsel %vm1371_vm4, %v1223_v41, -inf }
 0x337   : > { %1373 = vmax.xlane.f32.xlu0 %v1372_v43  ;;  %v1226_v44 = vpop.f32.mrb[6].mxu1 }
 0x338   : > { %v2339_v45 = vpop.f32.mrb[7].mxu1  ;;  %v1375_v46 = vsel %vm1371_vm4, %v1226_v44, -inf }
 0x339   : > { %1376 = vmax.xlane.f32.xlu1 %v1375_v46 }
 0x3ac   : > { %v1270_v47 = vpop.f32.mrb[8].mxu0  ;;  %v1317_v48 = vpop.f32.mrb[8].mxu1 }
 0x3ad   : > { %v2344_v49 = vpop.f32.mrb[9].mxu0  ;;  %v2350_v50 = vpop.f32.mrb[9].mxu1  ;;  %v1378_v51 = vsel %vm1371_vm4, %v1270_v47, -inf  ;;  %v1384_v60 = vsel %vm1371_vm4, %v1317_v48, -inf }
 0x3ae   : > { %v1320_v52 = vpop.f32.mrb[10].mxu1  ;;  %1379 = vmax.xlane.f32.xlu0 %v1378_v51  ;;  %v1273_v53 = vpop.f32.mrb[10].mxu0 }
 0x3af   : > { %v2345_v54 = vpop.f32.mrb[11].mxu0  ;;  %v2351_v55 = vpop.f32.mrb[11].mxu1  ;;  %v1387_v56 = vsel %vm1371_vm4, %v1320_v52, -inf  ;;  %v1381_v57 = vsel %vm1371_vm4, %v1273_v53, -inf }
 0x3b0   : > { %1388 = vmax.xlane.f32.xlu1 %v1387_v56 }
 0x3b2   : > { %1382 = vmax.xlane.f32.xlu0 %v1381_v57 }
 0x3b4   : > { %v1364_v58 = vpop.f32.mrb[12].mxu0 }
 0x3b5   : > { %v2356_v59 = vpop.f32.mrb[13].mxu0  ;;  %v1390_v0 = vsel %vm1371_vm4, %v1364_v58, -inf }
 0x3b6   : > { %1385 = vmax.xlane.f32.xlu0 %v1384_v60  ;;  %v2941_v61 = vpop.f32.mrb[14].mxu0 }
 0x3b7   : > { %v2357_v62 = vpop.f32.mrb[15].mxu0  ;;  %v1393_v63 = vsel %vm1371_vm4, %v2941_v61, -inf }
 0x3b8   : > { %1394 = vmax.xlane.f32.xlu1 %v1393_v63 }
 0x3ba   : > { %1391 = vmax.xlane.f32.xlu0 %v1390_v0 }
 0x3c4   : > { %v1374_v1 = vpop.xlane.xlu0 %1373 }
 0x3c5   : > { %v1396_v2 = vsub.f32 %v1223_v41, %v1374_v1 }
 0x3c6   : > { %v1377_v3 = vpop.xlane.xlu1 %1376 }
 0x3c7   : > { %v1404_v4 = vmul.f32 1.442695, %v1396_v2  ;;  %v1397_v5 = vsub.f32 %v1226_v44, %v1377_v3 }
 0x3c9   : > { %2536 = vpow2.f32 %v1404_v4  ;;  %v1406_v6 = vmul.f32 1.442695, %v1397_v5 }
 0x3cb   : > { %2538 = vpow2.f32 %v1406_v6 }
 0x3d3   : > { %v2537_v9 = vpop.eup %2536 }
 0x3d4   : > { %v1420_v10 = vsel %vm1371_vm4, %v2537_v9, 0.0 }
 0x3d5   : > { %v2539_v11 = vpop.eup %2538  ;;  %1421 = vadd.xlane.f32.xlu0 %v1420_v10 }
 0x3d6   : > { %v1423_v13 = vsel %vm1371_vm4, %v2539_v11, 0.0 }
 0x3d7   : > { %1424 = vadd.xlane.f32.xlu1 %v1423_v13 }
 0x43b   : > { %v1380_v14 = vpop.xlane.xlu0 %1379 }
 0x43c   : > { %v1398_v15 = vsub.f32 %v1270_v47, %v1380_v14 }
 0x43d   : > { %v1389_v16 = vpop.xlane.xlu1 %1388 }
 0x43e   : > { %v1408_v17 = vmul.f32 1.442695, %v1398_v15  ;;  %v1401_v18 = vsub.f32 %v1320_v52, %v1389_v16 }
 0x43f   : > { %v1383_v19 = vpop.xlane.xlu0 %1382 }
 0x440   : > { %2540 = vpow2.f32 %v1408_v17  ;;  %v1399_v20 = vsub.f32 %v1273_v53, %v1383_v19  ;;  %v1414_v21 = vmul.f32 1.442695, %v1401_v18 }
 0x442   : > { %v1410_v22 = vmul.f32 1.442695, %v1399_v20 }
 0x443   : > { %v1386_v24 = vpop.xlane.xlu0 %1385 }
 0x444   : > { %2542 = vpow2.f32 %v1410_v22  ;;  %v1400_v25 = vsub.f32 %v1317_v48, %v1386_v24 }
 0x445   : > { %2544 = vpow2.f32 %v1414_v21  ;;  %v1395_v40 = vpop.xlane.xlu1 %1394 }
 0x446   : > { %v1412_v26 = vmul.f32 1.442695, %v1400_v25  ;;  %v1403_v48 = vsub.f32 %v2941_v61, %v1395_v40 }
 0x447   : > { %v1392_v27 = vpop.xlane.xlu0 %1391 }
 0x448   : > { %2546 = vpow2.f32 %v1412_v26  ;;  %v1402_v28 = vsub.f32 %v1364_v58, %v1392_v27  ;;  %v1418_v49 = vmul.f32 1.442695, %v1403_v48 }
 0x44a   : > { %v2541_v29 = vpop.eup %2540  ;;  %v1416_v30 = vmul.f32 1.442695, %v1402_v28  ;;  %v2524_v28 = vld [vmem:[%s3131_s21] sm:$0xff]  }
 0x44b   : > { %v1426_v31 = vsel %vm1371_vm4, %v2541_v29, 0.0 }
 0x44c   : > { %2548 = vpow2.f32 %v1416_v30  ;;  %1427 = vadd.xlane.f32.xlu0 %v1426_v31 }
 0x44e   : > { %v2543_v32 = vpop.eup %2542 }
 0x44f   : > { %v1429_v33 = vsel %vm1371_vm4, %v2543_v32, 0.0  ;;  %v2545_v34 = vpop.eup %2544 }
 0x450   : > { %1430 = vadd.xlane.f32.xlu1 %v1429_v33  ;;  %v1435_v37 = vsel %vm1371_vm4, %v2545_v34, 0.0 }
 0x452   : > { %v2547_v35 = vpop.eup %2546 }
 0x453   : > { %v1432_v36 = vsel %vm1371_vm4, %v2547_v35, 0.0 }
 0x454   : > { %1433 = vadd.xlane.f32.xlu0 %v1432_v36  ;;  %1436 = vadd.xlane.f32.xlu1 %v1435_v37 }
 0x456   : > { %v2952_v38 = vpop.eup %2548 }
 0x457   : > { %v1438_v39 = vsel %vm1371_vm4, %v2952_v38, 0.0 }
 0x458   : > { %1439 = vadd.xlane.f32.xlu0 %v1438_v39  ;;  %v2525_v39 = vld [vmem:[%s3131_s21 + $0x8] sm:$0xff]  }
 0x462   : > { %v1422_v41 = vpop.xlane.xlu0 %1421 }
 0x463   : > { %2550 = vrcp.f32 %v1422_v41 }
 0x464   : > { %v1425_v42 = vpop.xlane.xlu1 %1424 }
 0x465   : > { %2552 = vrcp.f32 %v1425_v42  ;;  %2494 = vrot.lane.b32.xlu1 %v2912_v12, %s2618_s27  ;;  %s3136_s27 = scalar_lea.vmem %s3076_s13, %s2753_s20 }
 0x466   : > { %2554 = vpow2.f32 %v1418_v49 }
 0x46d   : > { %v2551_v43 = vpop.eup %2550 }
 0x46e   : > { %2489 = vrot.lane.b32.xlu0 %v2912_v12, %s2619_s4  ;;  %v1452_v45 = vmul.f32 %v2551_v43, %v2537_v9 }
 0x46f   : > { %v2553_v44 = vpop.eup %2552 }
 0x470   : > { %v1453_v46 = vmul.f32 %v2553_v44, %v2539_v11  ;;  %v2555_v50 = vpop.eup %2554 }
 0x471   : > { %v1441_v51 = vsel %vm1371_vm4, %v2555_v50, 0.0 }
 0x472   : > { %v1460_v47 = vpack.c.bf16 %v1453_v46, %v1452_v45 }
 0x474   : > { %2361 = vmatmul.mubr.msk.bf16.vlgmr.msra.gmra.mrb[12].mxu1 %vm1371_vm4, %v1460_v47 }
 0x475   : > { %2372 = vmatprep.mubr.msk.bf16.mxu1 %vm2617_vm2, %v2616_v23 }
 0x489   : > { %1442 = vadd.xlane.f32.xlu1 %v1441_v51 }
 0x49a   : > { %2499 = vrot.lane.b32.xlu1 %v2912_v12, %s2620_s8  ;;  %s3139_s8 = sld [smem:[#allocation3_spill]] }
 0x4a0   : > { %p2255_p8 = scmp.ne.s32.totalorder %s3139_s8, 1 }
 0x4a1   : > { %vm1964_vm7 = vcmask (!%p2255_p8), 257024  }
 0x4d9   : > { %v1428_v52 = vpop.xlane.xlu0 %1427 }
 0x4dd   : > { %v1431_v53 = vpop.xlane.xlu1 %1430 }
 0x4de   : > { %2556 = vrcp.f32 %v1431_v53 }
 0x4df   : > { %2558 = vrcp.f32 %v1428_v52 }
 0x4e1   : > { %v1434_v54 = vpop.xlane.xlu0 %1433  ;;  %v1437_v55 = vpop.xlane.xlu1 %1436 }
 0x4e2   : > { %2560 = vrcp.f32 %v1434_v54 }
 0x4e3   : > { %2562 = vrcp.f32 %v1437_v55 }
 0x4e5   : > { %v1440_v56 = vpop.xlane.xlu0 %1439  ;;  %v2495_v57 = vpop.permute.xlu1 %2494 }
 0x4e6   : > { %v2497_v58 = vunpack.i.h.bf16 %v2495_v57  ;;  %v2496_v59 = vunpack.i.l.bf16 %v2495_v57  ;;  %2564 = vrcp.f32 %v1440_v56 }
 0x4e8   : > { %v2557_v60 = vpop.eup %2556  ;;  %v1180_v61 = vpack.c.bf16 %v2497_v58, %v2496_v59 }
 0x4e9   : > { %v2490_v62 = vpop.permute.xlu0 %2489  ;;  %v2559_v63 = vpop.eup %2558  ;;  %v1455_v12 = vmul.f32 %v2557_v60, %v2543_v32 }
 0x4ea   : > { %v2492_v0 = vunpack.i.h.bf16 %v2490_v62  ;;  %v2491_v1 = vunpack.i.l.bf16 %v2490_v62  ;;  %2371 = vmatpush3.bf16.msra.mxu1 %v1180_v61  ;;  %v1454_v5 = vmul.f32 %v2559_v63, %v2541_v29  ;;  %v2239_v61 = vld [vmem:[%s3133_s23] ss:$0 sm:$0xff] }
 0x4eb   : > { %2382 = vmatprep.subr.bf16.mxu1 %v2616_v23 }
 0x4ec   : > { %v2561_v2 = vpop.eup %2560  ;;  %v1179_v3 = vpack.c.bf16 %v2492_v0, %v2491_v1  ;;  %v1461_v10 = vpack.c.bf16 %v1455_v12, %v1454_v5 }
 0x4ed   : > { %v2563_v4 = vpop.eup %2562  ;;  %v1456_v6 = vmul.f32 %v2561_v2, %v2547_v35 }
 0x4ee   : > { %v1457_v9 = vmul.f32 %v2563_v4, %v2545_v34  ;;  %2365 = vmatpush3.bf16.msra.mxu0 %v1179_v3 }
 0x4ef   : > { %2376 = vmatprep.subr.bf16.mxu0 %v2616_v23 }
 0x4f0   : > { %v1462_v11 = vpack.c.bf16 %v1457_v9, %v1456_v6  ;;  %v2565_v18 = vpop.eup %2564 }
 0x4f1   : > { %2367 = vmatmul.mubr.msk.bf16.vlgmr.msra.gmra.mrb[16].mxu0 %vm1371_vm4, %v1461_v10  ;;  %v1458_v20 = vmul.f32 %v2565_v18, %v2952_v38  ;;  %v2526_v18 = vld [vmem:[%s2814_s18] sm:$0xff]  }
 0x4f2   : > { %2373 = vmatmul.mubr.msk.bf16.vlgmr.msra.gmra.mrb[16].mxu1 %vm1371_vm4, %v1462_v11  ;;  %2378 = vmatprep.mubr.msk.bf16.mxu0 %vm2617_vm2, %v2616_v23 }
 0x4f3   : > { %2386 = vmatprep.mubr.msk.bf16.mxu1 %vm2617_vm2, %v2616_v23  ;;  %2383 = vmatpush3.bf16.msra.mxu1 %v2524_v28 }
 0x4f4   : > { %2384 = vmatprep.subr.bf16.mxu1 %v2616_v23 }
 0x4f7   : > { %2385 = vmatpush3.bf16.msra.mxu1 %v2525_v39  ;;  %v2529_v39 = vld [vmem:[%s2828_s12 + $0x8] sm:$0xff]  }
 0x4f8   : > { %2398 = vmatprep.subr.bf16.mxu1 %v2616_v23 }
 0x516   : > { %v1443_v13 = vpop.xlane.xlu1 %1442 }
 0x517   : > { %2566 = vrcp.f32 %v1443_v13 }
 0x51a   : > { %v2500_v14 = vpop.permute.xlu1 %2499 }
 0x51b   : > { %v2502_v15 = vunpack.i.h.bf16 %v2500_v14  ;;  %v2501_v16 = vunpack.i.l.bf16 %v2500_v14 }
 0x51d   : > { %v1181_v17 = vpack.c.bf16 %v2502_v15, %v2501_v16 }
 0x51f   : > { %2377 = vmatpush3.bf16.msra.mxu0 %v1181_v17 }
 0x520   : > { %2390 = vmatprep.subr.bf16.mxu0 %v2616_v23 }
 0x521   : > { %v2567_v19 = vpop.eup %2566 }
 0x522   : > { %v1459_v21 = vmul.f32 %v2567_v19, %v2555_v50  ;;  %v2527_v19 = vld [vmem:[%s2814_s18 + $0x8] sm:$0xff]   ;;  %s3135_s18 = scalar_lea.vmem %s3134_s26, %s2753_s20 }
 0x524   : > { %v1463_v22 = vpack.c.bf16 %v1459_v21, %v1458_v20 }
 0x526   : > { %2379 = vmatmul.mubr.msk.bf16.vlgmr.msra.gmra.mrb[20].mxu0 %vm1371_vm4, %v1463_v22 }
 0x527   : > { %2394 = vmatprep.mubr.msk.bf16.mxu0 %vm2617_vm2, %v2616_v23  ;;  %2391 = vmatpush3.bf16.msra.mxu0 %v2526_v18 }
 0x528   : > { %2392 = vmatprep.subr.bf16.mxu0 %v2616_v23 }
 0x52b   : > { %2393 = vmatpush3.bf16.msra.mxu0 %v2527_v19 }
 0x547   : > { %v1501_v24 = vpop.f32.mrb[12].mxu1 }
 0x548   : > { %v2362_v25 = vpop.f32.mrb[13].mxu1 }
 0x549   : > { %v1504_v26 = vpop.f32.mrb[14].mxu1 }
 0x54a   : > { %v2363_v27 = vpop.f32.mrb[15].mxu1 }
 0x5c4   : > { %v1545_v29 = vpop.f32.mrb[16].mxu0 }
 0x5c5   : > { %v1589_v30 = vpop.f32.mrb[16].mxu1  ;;  %v2368_v31 = vpop.f32.mrb[17].mxu0 }
 0x5c6   : > { %v2374_v32 = vpop.f32.mrb[17].mxu1  ;;  %v1548_v33 = vpop.f32.mrb[18].mxu0 }
 0x5c7   : > { %v2503_v34 = vpack.i.bf16 %v1548_v33, %v1545_v29  ;;  %v1592_v35 = vpop.f32.mrb[18].mxu1  ;;  %v2369_v36 = vpop.f32.mrb[19].mxu0  ;;  %v2243_v29 = vld [vmem:[%s3135_s18] ss:$0 sm:$0xff] }
 0x5c8   : > { %v2508_v37 = vpack.i.bf16 %v1592_v35, %v1589_v30  ;;  %v2375_v38 = vpop.f32.mrb[19].mxu1  ;;  %v2244_v33 = vld [vmem:[%s3136_s27] ss:$0 sm:$0xff] }
 0x5c9   : > { %2504 = vrot.lane.b32.xlu1 %v2503_v34, %s2621_s24  ;;  %v2528_v38 = vld [vmem:[%s2828_s12] sm:$0xff]  }
 0x5ca   : > { %2509 = vrot.lane.b32.xlu0 %v2508_v37, %s2622_s28 }
 0x5f9   : > { %v1633_v40 = vpop.f32.mrb[20].mxu0 }
 0x5fa   : > { %v2380_v41 = vpop.f32.mrb[21].mxu0 }
 0x5fb   : > { %v1636_v42 = vpop.f32.mrb[22].mxu0  ;;  %v2531_v41 = vld [vmem:[%s2828_s12 + $0x18] sm:$0xff]  }
 0x5fc   : > { %v2513_v43 = vpack.i.bf16 %v1636_v42, %v1633_v40  ;;  %v2381_v44 = vpop.f32.mrb[23].mxu0  ;;  %v2530_v40 = vld [vmem:[%s2828_s12 + $0x10] sm:$0xff]   ;;  %v2245_v42 = vld [vmem:[%s834_s10] ss:$0 sm:$0xff] }
 0x5fe   : > { %2514 = vrot.lane.b32.xlu1 %v2513_v43, %s2623_s2 }
 0x63b   : > { %v2505_v45 = vpop.permute.xlu1 %2504 }
 0x63c   : > { %v2510_v46 = vpop.permute.xlu0 %2509  ;;  %v2507_v47 = vunpack.i.h.bf16 %v2505_v45  ;;  %v2506_v48 = vunpack.i.l.bf16 %v2505_v45 }
 0x63d   : > { %v2512_v49 = vunpack.i.h.bf16 %v2510_v46  ;;  %v2511_v50 = vunpack.i.l.bf16 %v2510_v46 }
 0x63e   : > { %v1665_v51 = vsel %vm1182_vm3, %v1504_v26, %v2507_v47  ;;  %v1664_v52 = vsel %vm1182_vm3, %v1501_v24, %v2506_v48 }
 0x63f   : > { %v1666_v56 = vsel %vm1371_vm4, %v1664_v52, %v2511_v50  ;;  %v1667_v57 = vsel %vm1371_vm4, %v1665_v51, %v2512_v49 }
 0x670   : > { %v2515_v53 = vpop.permute.xlu1 %2514 }
 0x671   : > { %v2517_v54 = vunpack.i.h.bf16 %v2515_v53  ;;  %v2516_v55 = vunpack.i.l.bf16 %v2515_v53 }
 0x673   : > { %v1670_v58 = vsel %vm1668_vm5, %v1667_v57, %v2517_v54  ;;  %v1669_v59 = vsel %vm1668_vm5, %v1666_v56, %v2516_v55 }
 0x674   : > { %v1671_v60 = vpack.c.bf16 %v1670_v58, %v1669_v59  ;;  %v2249_v59 = vld [vmem:[%s842_s11] ss:$0 sm:$0xff] }
 0x676   : > { %2387 = vmatmul.mubr.msk.bf16.vlgmr.msra.gmra.mrb[20].mxu1 %vm868_vm1, %v1671_v60 }
 0x677   : > { %2406 = vmatprep.mubr.msk.bf16.mxu1 %vm2617_vm2, %v2616_v23  ;;  %2399 = vmatpush3.bf16.msra.mxu1 %v2528_v38 }
 0x678   : > { %2400 = vmatprep.subr.bf16.mxu1 %v2616_v23 }
 0x67b   : > { %2401 = vmatpush3.bf16.msra.mxu1 %v2529_v39 }
 0x67c   : > { %2402 = vmatprep.subr.bf16.mxu1 %v2616_v23 }
 0x67f   : > { %2403 = vmatpush3.bf16.msra.mxu1 %v2530_v40 }
 0x680   : > { %2404 = vmatprep.subr.bf16.mxu1 %v2616_v23 }
 0x683   : > { %2405 = vmatpush3.bf16.msra.mxu1 %v2531_v41 }
 0x749   : > { %v1732_v62 = vpop.f32.mrb[20].mxu1 }
 0x74a   : > { %v1733_v63 = vadd.f32 %v2239_v61, %v1732_v62  ;;  %v2388_v0 = vpop.f32.mrb[21].mxu1 }
 0x74b   : > { %v1735_v1 = vpop.f32.mrb[22].mxu1 }
 0x74c   : > { %v2997_v12 = vadd.f32 %v1733_v63, %v2842_v7  ;;  %v1736_v2 = vadd.f32 %v2239_v61, %v1735_v1  ;;  %v2389_v3 = vpop.f32.mrb[23].mxu1 }
 0x74e   : > { %v3000_v4 = vadd.f32 %v1736_v2, %v2844_v8  ;;  %v1743_v5 = vsel %vm868_vm1, %v2997_v12, 0.0 }
 0x74f   : > { %1744 = vadd.xlane.f32.xlu0 %v1743_v5 }
 0x750   : > { %v1746_v6 = vsel %vm868_vm1, %v3000_v4, 0.0 }
 0x751   : > { %1747 = vadd.xlane.f32.xlu1 %v1746_v6 }
 0x7dc   : > { %v1745_v9 = vpop.xlane.xlu0 %1744 }
 0x7dd   : > { %v1749_v10 = vmul.f32 0.03125, %v1745_v9 }
 0x7de   : > { %v1748_v11 = vpop.xlane.xlu1 %1747 }
 0x7df   : > { %v1751_v7 = vsub.f32 %v2997_v12, %v1749_v10  ;;  %v1750_v13 = vmul.f32 0.03125, %v1748_v11 }
 0x7e1   : > { %v1752_v14 = vsub.f32 %v3000_v4, %v1750_v13  ;;  %v1753_v8 = vmul.f32 %v1751_v7, %v1751_v7 }
 0x7e3   : > { %v1755_v15 = vsel %vm868_vm1, %v1753_v8, 0.0  ;;  %v1754_v16 = vmul.f32 %v1752_v14, %v1752_v14 }
 0x7e4   : > { %1756 = vadd.xlane.f32.xlu0 %v1755_v15 }
 0x7e5   : > { %v1758_v17 = vsel %vm868_vm1, %v1754_v16, 0.0 }
 0x7e8   : > { %1759 = vadd.xlane.f32.xlu0 %v1758_v17 }
 0x871   : > { %v1757_v20 = vpop.xlane.xlu0 %1756 }
 0x872   : > { %v1761_v21 = vmul.f32 0.03125, %v1757_v20 }
 0x874   : > { %v1763_v22 = vadd.f32 1e-05, %v1761_v21 }
 0x875   : > { %v1760_v24 = vpop.xlane.xlu0 %1759 }
 0x876   : > { %2568 = vrsqrt.f32 %v1763_v22  ;;  %v1762_v25 = vmul.f32 0.03125, %v1760_v24 }
 0x878   : > { %v1764_v26 = vadd.f32 1e-05, %v1762_v25 }
 0x87a   : > { %2570 = vrsqrt.f32 %v1764_v26 }
 0x880   : > { %v2569_v27 = vpop.eup %2568 }
 0x881   : > { %v1767_v28 = vmul.f32 %v2569_v27, %v1751_v7 }
 0x883   : > { %v1775_v31 = vmul.f32 %v2243_v29, %v1767_v28 }
 0x884   : > { %v2571_v30 = vpop.eup %2570 }
 0x885   : > { %v1768_v32 = vmul.f32 %v2571_v30, %v1752_v14  ;;  %v1783_v35 = vadd.f32 %v2244_v33, %v1775_v31 }
 0x887   : > { %v1776_v34 = vmul.f32 %v2243_v29, %v1768_v32 }
 0x889   : > { %v1784_v36 = vadd.f32 %v2244_v33, %v1776_v34 }
 0x88b   : > { %v1785_v37 = vpack.c.bf16 %v1784_v36, %v1783_v35 }
 0x88d   : > { %2395 = vmatmul.mubr.msk.bf16.vlgmr.msra.gmra.mrb[24].mxu0 %vm868_vm1, %v1785_v37 }
 0x960   : > { %v1846_v43 = vpop.f32.mrb[24].mxu0 }
 0x961   : > { %v1847_v44 = vadd.f32 %v2245_v42, %v1846_v43  ;;  %v2396_v45 = vpop.f32.mrb[25].mxu0 }
 0x962   : > { %v1849_v46 = vpop.f32.mrb[26].mxu0 }
 0x963   : > { %v1855_v47 = vmul.f32 0.70710677, %v1847_v44  ;;  %v1850_v48 = vadd.f32 %v2245_v42, %v1849_v46  ;;  %v2397_v49 = vpop.f32.mrb[27].mxu0  ;;  %v1853_v53 = vmul.f32 0.5, %v1847_v44 }
 0x965   : > { %2572 = verf.f32 %v1855_v47  ;;  %v1856_v50 = vmul.f32 0.70710677, %v1850_v48  ;;  %v1854_v54 = vmul.f32 0.5, %v1850_v48 }
 0x967   : > { %2574 = verf.f32 %v1856_v50 }
 0x96f   : > { %v2573_v51 = vpop.eup %2572 }
 0x970   : > { %v1859_v23 = vadd.f32 1.0, %v2573_v51 }
 0x971   : > { %v2575_v52 = vpop.eup %2574 }
 0x972   : > { %v1860_v55 = vadd.f32 1.0, %v2575_v52  ;;  %v1861_v56 = vmul.f32 %v1859_v23, %v1853_v53 }
 0x974   : > { %v1862_v57 = vmul.f32 %v1860_v55, %v1854_v54 }
 0x976   : > { %v1863_v58 = vpack.c.bf16 %v1862_v57, %v1861_v56 }
 0x978   : > { %2407 = vmatmul.mubr.msk.bf16.vlgmr.msra.gmra.mrb[24].mxu1 %vm1903_vm6, %v1863_v58 }
 0xa4b   : > { %v1941_v60 = vpop.f32.mrb[24].mxu1 }
 0xa4c   : > { %v1942_v61 = vadd.f32 %v2249_v59, %v1941_v60  ;;  %v2408_v62 = vpop.f32.mrb[25].mxu1  ;;  %1955 = sbr.rel (%p2255_p8) target bundleno = 2645 (0xa55), region = 100 }
 0xa4d   : > { %v1944_v63 = vpop.f32.mrb[26].mxu1 }
 0xa4e   : > { %v1948_v0 = vadd.f32 %v1942_v61, %v2997_v12  ;;  %v1945_v1 = vadd.f32 %v2249_v59, %v1944_v63  ;;  %v2409_v2 = vpop.f32.mrb[27].mxu1 }
 0xa50   : > { %1950 = vst.msk [vmem:[#allocation2] sm:$0xff] %vm868_vm1, %v1948_v0  ;;  %v1949_v3 = vadd.f32 %v1945_v1, %v3000_v4  ;;  %v2268_v5 = vpack.c.bf16 (!%p2255_p8), %v1948_v0, %v1948_v0 }
 0xa52   : > { %1951 = vst.msk [vmem:[#allocation2 + $0x8] sm:$0xff] %vm868_vm1, %v1949_v3  ;;  %v2269_v6 = vpack.c.bf16 (!%p2255_p8), %v1949_v3, %v1949_v3 }
 0xa53   : > { %1965 = vst.msk [vmem:[%s2833_s7] sm:$0xf] %vm1964_vm7, %v2268_v5 }
 0xa54   : > { %1966 = vst.msk [vmem:[%s2833_s7 + $0x4] sm:$0xf] %vm1964_vm7, %v2269_v6 }
 0xa55 PF: > { %s3140_s11 = sld [smem:[#allocation6_spill]]  ;;  %s3141_s27 = sld [smem:[#allocation4_spill]] }
 0xa56   : > { %s3142_s28 = sld [smem:[#allocation5_spill]]  ;;  %s3143_s29 = sld [smem:[#allocation7_spill]] }
 0xa57   : > { %s3144_s30 = sld [smem:[#allocation8_spill]] }
 0xa5b   : > { %s28_s0 = sadd.s32 1, %s3140_s11  }
 0xa5c   : > { %p25_p9 = scmp.ge.s32.totalorder %s28_s0, 6  }
 0xa5e   :  { %27 = sbr.rel (!%p25_p9) target bundleno = 15 (0xf), region = 178 }

// kernel: _lambda_.10
= control target key start
LH: loop header
LB: loop body
LE: loop exit
PB: predicated region body
PF: predicated region fallthrough
CT: control target
= control target key end

     0   :  { %v182_v0 = vmov 0.0   ;;  %vm183_vm0 = vmmov 0   ;;  %vm128_vm1 = vcmask 257024   ;;  %s237_s1 = inlined_call_operand.vmem [shape: bf16[128,32], index: 1, kind: input, shape index: {}]   ;;  %s238_s0 = inlined_call_operand.vmem [shape: bf16[8,128], index: 0, kind: input, shape index: {}]   ;;  %s239_s2 = inlined_call_operand.vmem [shape: f32[1,32], index: 2, kind: input, shape index: {}]   ;;  %s240_s3 = inlined_call_operand.vmem [shape: bf16[8,32], index: 3, kind: output, shape index: {}]  }
   0x1   :  { %152 = vmatprep.subr.bf16.mxu0 %v182_v0  ;;  %v174_v1 = vld [vmem:[%s237_s1] sm:$0xff]   ;;  %168 = vmatprep.mubr.msk.bf16.mxu0 %vm183_vm0, %v182_v0  ;;  %v175_v2 = vld [vmem:[%s237_s1 + $0x8] sm:$0xff]   ;;  %v176_v3 = vld [vmem:[%s237_s1 + $0x10] sm:$0xff]  }
   0x2   :  { %153 = vmatpush3.bf16.msra.mxu0 %v174_v1  ;;  %v177_v4 = vld [vmem:[%s237_s1 + $0x18] sm:$0xff]   ;;  %v178_v5 = vld [vmem:[%s237_s1 + $0x20] sm:$0xff]   ;;  %v179_v6 = vld [vmem:[%s237_s1 + $0x28] sm:$0xff]  }
   0x3   :  { %154 = vmatprep.subr.bf16.mxu0 %v182_v0  ;;  %v180_v7 = vld [vmem:[%s237_s1 + $0x30] sm:$0xff]   ;;  %v181_v8 = vld [vmem:[%s237_s1 + $0x38] sm:$0xff]   ;;  %v15_v9 = vld [vmem:[%s238_s0] sm:$0xf] }
   0x4   :  { %v134_v10 = vld [vmem:[%s239_s2] ss:$0 sm:$0xff] }
   0x6   :  { %155 = vmatpush3.bf16.msra.mxu0 %v175_v2 }
   0x7   :  { %156 = vmatprep.subr.bf16.mxu0 %v182_v0 }
   0xa   :  { %157 = vmatpush3.bf16.msra.mxu0 %v176_v3 }
   0xb   :  { %158 = vmatprep.subr.bf16.mxu0 %v182_v0 }
   0xe   :  { %159 = vmatpush3.bf16.msra.mxu0 %v177_v4 }
   0xf   :  { %160 = vmatprep.subr.bf16.mxu0 %v182_v0 }
  0x12   :  { %161 = vmatpush3.bf16.msra.mxu0 %v178_v5 }
  0x13   :  { %162 = vmatprep.subr.bf16.mxu0 %v182_v0 }
  0x16   :  { %163 = vmatpush3.bf16.msra.mxu0 %v179_v6 }
  0x17   :  { %164 = vmatprep.subr.bf16.mxu0 %v182_v0 }
  0x1a   :  { %165 = vmatpush3.bf16.msra.mxu0 %v180_v7 }
  0x1b   :  { %166 = vmatprep.subr.bf16.mxu0 %v182_v0 }
  0x1e   :  { %167 = vmatpush3.bf16.msra.mxu0 %v181_v8 }
  0x21   :  { %169 = vmatmul.mubr.bf16.vlgmr.msra.gmra.mrb[0].mxu0 %v15_v9 }
  0xf4   :  { %v121_v11 = vpop.f32.mrb[0].mxu0 }
  0xf5   :  { %v122_v12 = vadd.f32 %v134_v10, %v121_v11  ;;  %v170_v13 = vpop.f32.mrb[1].mxu0 }
  0xf6   :  { %v124_v14 = vpop.f32.mrb[2].mxu0 }
  0xf7   :  { %v127_v15 = vpack.c.bf16 %v122_v12, %v122_v12  ;;  %v171_v16 = vpop.f32.mrb[3].mxu0 }
  0xf9   :  { %129 = vst.msk [vmem:[%s240_s3] sm:$0xf] %vm128_vm1, %v127_v15 }

// kernel: _lambda_.11
= control target key start
LH: loop header
LB: loop body
LE: loop exit
PB: predicated region body
PF: predicated region fallthrough
CT: control target
= control target key end

     0   :  { %s2478_s27 = smov 0   ;;  %s2480_s28 = smov 0   ;;  %s2785_s0 = inlined_call_operand.vmem [shape: bf16[2,4,32], index: 0, kind: input, shape index: {}]   ;;  %s2786_s1 = inlined_call_operand.vmem [shape: f32[4,32], index: 1, kind: input, shape index: {}]   ;;  %s2787_s2 = inlined_call_operand.vmem [shape: f32[2,1,32], index: 2, kind: input, shape index: {}]   ;;  %s2788_s3 = inlined_call_operand.vmem [shape: f32[2,1,32], index: 3, kind: input, shape index: {}]   ;;  %s2789_s4 = inlined_call_operand.vmem [shape: bf16[2,32,32], index: 4, kind: input, shape index: {}]   ;;  %s2790_s5 = inlined_call_operand.vmem [shape: f32[2,1,32], index: 5, kind: input, shape index: {}]   ;;  %s2791_s6 = inlined_call_operand.vmem [shape: bf16[2,32,32], index: 6, kind: input, shape index: {}]   ;;  %s2792_s7 = inlined_call_operand.vmem [shape: f32[2,1,32], index: 7, kind: input, shape index: {}]   ;;  %s2793_s8 = inlined_call_operand.vmem [shape: bf16[2,32,32], index: 8, kind: input, shape index: {}]   ;;  %s2794_s9 = inlined_call_operand.vmem [shape: f32[2,1,32], index: 9, kind: input, shape index: {}]   ;;  %s2795_s10 = inlined_call_operand.vmem [shape: bf16[2,32,32], index: 10, kind: input, shape index: {}]   ;;  %s2796_s11 = inlined_call_operand.vmem [shape: f32[2,1,32], index: 11, kind: input, shape index: {}]   ;;  %s2797_s12 = inlined_call_operand.vmem [shape: f32[2,1,32], index: 12, kind: input, shape index: {}]   ;;  %s2798_s13 = inlined_call_operand.vmem [shape: f32[2,1,32], index: 13, kind: input, shape index: {}]   ;;  %s2799_s14 = inlined_call_operand.vmem [shape: bf16[2,32,64], index: 14, kind: input, shape index: {}]   ;;  %s2800_s15 = inlined_call_operand.vmem [shape: f32[2,1,64], index: 15, kind: input, shape index: {}]   ;;  %s2801_s16 = inlined_call_operand.vmem [shape: bf16[2,64,32], index: 16, kind: input, shape index: {}]   ;;  %s2802_s17 = inlined_call_operand.vmem [shape: f32[2,1,32], index: 17, kind: input, shape index: {}]   ;;  %s2803_s18 = inlined_call_operand.vmem [shape: bf16[2,4,32], index: 18, kind: output, shape index: {}]  }
   0x1   :  { %2809 = sst [smem:[#allocation10_spill]] %s2785_s0  ;;  %s2482_s29 = smov 0  }
   0x2   :  { %2810 = sst [smem:[#allocation11_spill]] %s2786_s1  ;;  %s2484_s30 = smov 0  }
   0x3   :  { %2811 = sst [smem:[#allocation12_spill]] %s2787_s2  ;;  %s2486_s0 = smov 0  }
   0x4   :  { %2812 = sst [smem:[#allocation13_spill]] %s2789_s4 }
   0x5   :  { %2813 = sst [smem:[#allocation14_spill]] %s2791_s6 }
   0x6   :  { %2814 = sst [smem:[#allocation15_spill]] %s2792_s7 }
   0x7   :  { %2815 = sst [smem:[#allocation16_spill]] %s2793_s8 }
   0x8   :  { %2816 = sst [smem:[#allocation17_spill]] %s2795_s10 }
   0x9   :  { %2817 = sst [smem:[#allocation18_spill]] %s2796_s11 }
   0xa   :  { %2818 = sst [smem:[#allocation19_spill]] %s2797_s12 }
   0xb   :  { %2819 = sst [smem:[#allocation20_spill]] %s2800_s15 }
   0xc   :  { %2820 = sst [smem:[#allocation21_spill]] %s2801_s16 }
   0xd   :  { %2821 = sst [smem:[#allocation22_spill]] %s2802_s17 }
   0xe   :  { %2822 = sst [smem:[#allocation23_spill]] %s2803_s18 }
   0xf LB: > { %2823 = sst [smem:[#allocation3_spill]] %s2357_s27  ;;  %s37_s19 = sadd.s32 1, %s2365_s29  ;;  %s2373_s0 = sphi %s2486_s0, %s28_s0   ;;  %s2369_s30 = sphi %s2484_s30, %s2865_s30   ;;  %s2365_s29 = sphi %s2482_s29, %s2864_s29   ;;  %s2361_s28 = sphi %s2480_s28, %s2863_s28   ;;  %s2357_s27 = sphi %s2478_s27, %s2862_s27  }
  0x10   : > { %2824 = sst [smem:[#allocation4_spill]] %s2365_s29  ;;  %s40_s1 = sadd.s32 1, %s2369_s30 }
  0x11   : > { %2825 = sst [smem:[#allocation5_spill]] %s2369_s30  ;;  %p38_p0 = scmp.ge.s32.totalorder %s37_s19, 2 }
  0x12   : > { %2826 = sst [smem:[#allocation6_spill]] %s2373_s0  ;;  %p2052_p1 = scmp.ge.s32.totalorder %s2373_s0, 1 }
  0x13   : > { %p663_p2 = scmp.lt.s32.totalorder %s2373_s0, 5  ;;  %s2867_s19 = smov (%p38_p0, %s37_s19), 0 }
  0x14   : > { %2827 = sst [smem:[#allocation7_spill]] %s2867_s19  ;;  %s2869_s1 = smov (!%p38_p0, %s40_s1), %s2369_s30 }
  0x15   : > { %p664_p3 = pnand %p2052_p1, %p663_p2  ;;  %p42_p4 = scmp.ge.s32.totalorder %s2869_s1, 2 }
  0x17   : > { %s2871_s1 = smov (%p42_p4, %s2869_s1), 0  ;;  %667 = sbr.rel (%p664_p3) target bundleno = 2613 (0xa35), region = 92 }
  0x18   : > { %2828 = sst [smem:[#allocation8_spill]] %s2871_s1 }
  0x1e   : > { %p775_p5 = scmp.lt.s32.totalorder %s2361_s28, 1  ;;  %p779_p6 = scmp.lt.s32.totalorder %s2357_s27, 1 }
  0x1f   : > { %s2829_s23 = sld [smem:[#allocation10_spill]]  ;;  %s2831_s4 = sld [smem:[#allocation13_spill]] }
  0x20   : > { %s2873_s28 = smov (!%p775_p5, %s2361_s28), 1  ;;  %s2832_s6 = sld [smem:[#allocation14_spill]] }
  0x21   : > { %s2512_s20 = scalar_select %p779_p6, %s2357_s27, 1 }
  0x22   : > { %s2053_s21 = sshll.u32 %s2873_s28, 1  ;;  %s2834_s8 = sld [smem:[#allocation16_spill]] }
  0x23   : > { %s2109_s27 = sshll.u32 %s2512_s20, 4  ;;  %s2835_s10 = sld [smem:[#allocation17_spill]] }
  0x24   : > { %s2573_s18 = scalar_lea.vmem %s2799_s14, %s2109_s27  ;;  %s2841_s29 = sld [smem:[#allocation21_spill]] }
  0x25   : > { %s778_s24 = scalar_lea.vmem %s2829_s23, %s2053_s21  ;;  %s2529_s28 = scalar_lea.vmem %s2831_s4, %s2109_s27 }
  0x26   : > { %s2538_s25 = scalar_lea.vmem %s2832_s6, %s2109_s27  ;;  %s2839_s4 = sld [smem:[#allocation20_spill]] }
  0x27   : > { %s2840_s6 = sld [smem:[#allocation22_spill]] }
  0x28   : > { %s2547_s19 = scalar_lea.vmem %s2834_s8, %s2109_s27  ;;  %s2842_s8 = sld [smem:[#allocation23_spill]] }
  0x29   : > { %s2556_s2 = scalar_lea.vmem %s2835_s10, %s2109_s27  ;;  %s2843_s27 = sld [smem:[#allocation3_spill]] }
  0x2a   : > { %2836 = sst [smem:[#allocation9_spill]] %s2556_s2  ;;  %s2114_s2 = sshll.u32 %s2512_s20, 5 }
  0x2b   : > { %s2587_s12 = scalar_lea.vmem %s2841_s29, %s2114_s2 }
  0x2c   : > { %s830_s10 = scalar_lea.vmem %s2839_s4, %s2512_s20 }
  0x2d   : > { %s838_s11 = scalar_lea.vmem %s2840_s6, %s2512_s20 }
  0x2e   : > { %s2592_s7 = scalar_lea.vmem %s2842_s8, %s2053_s21 }
  0x2f   : > { %p2067_p7 = scmp.ne.s32.totalorder %s2843_s27, 0 }
  0x30   : > { %v848_v0 = vld [vmem:[%s778_s24] sm:$0x3] (!%p2067_p7)  ;;  %s2844_s17 = sld [smem:[#allocation11_spill]] (!%p2067_p7)  ;;  %vm852_vm0 = vcmask (!%p2067_p7), 257024  }
  0x31   : > { %847 = sbr.rel (%p2067_p7) target bundleno = 58 (0x3a), region = 96  ;;  %v849_v2 = vunpack.c.l.bf16 (!%p2067_p7), %v848_v0 }
  0x36   : > { %v850_v1 = vld [vmem:[%s2844_s17] sm:$0xf] (!%p2067_p7) }
  0x37   : > { %v851_v3 = vadd.f32 (!%p2067_p7), %v850_v1, %v849_v2 }
  0x39   : > { %853 = vst.msk [vmem:[#allocation2] sm:$0xf] %vm852_vm0, %v851_v3 }
  0x3a PF: > { %vm857_vm1 = vcmask 257024   ;;  %v2299_v11 = vld [vmem:[%s2529_s28] sm:$0xff]   ;;  %v2375_v13 = vmov 0.0   ;;  %v2301_v14 = vld [vmem:[%s2529_s28 + $0x8] sm:$0xff]   ;;  %vm2376_vm2 = vmmov 0   ;;  %s2845_s21 = sld [smem:[#allocation12_spill]]  ;;  %s2851_s17 = scalar_lea.vmem %s2794_s9, %s2512_s20 }
  0x3b   : > { %v2300_v12 = vld [vmem:[%s2538_s25] sm:$0xff]   ;;  %2151 = vmatprep.subr.bf16.mxu0 %v2375_v13  ;;  %2159 = vmatprep.subr.bf16.mxu1 %v2375_v13  ;;  %v2302_v15 = vld [vmem:[%s2538_s25 + $0x8] sm:$0xff]   ;;  %s2847_s25 = scalar_lea.vmem %s2788_s3, %s2512_s20  ;;  %vm910_vm3 = vcmask 261120   ;;  %s2849_s1 = sld [smem:[#allocation15_spill]]  ;;  %vm1123_vm4 = vcmask 64512   ;;  %vm1361_vm5 = vcmask 1041408  }
  0x3c   : > { %2152 = vmatpush3.bf16.msra.mxu0 %v2299_v11  ;;  %2160 = vmatpush3.bf16.msra.mxu1 %v2300_v12  ;;  %v2069_v22 = vld [vmem:[%s2847_s25] ss:$0 sm:$0xff]  ;;  %v2304_v27 = vld [vmem:[%s2547_s19 + $0x8] sm:$0xff]   ;;  %s2377_s0 = smov 120   ;;  %s2378_s30 = smov 112   ;;  %vm1308_vm6 = vcmask 27648  }
  0x3d   : > { %2153 = vmatprep.subr.bf16.mxu0 %v2375_v13  ;;  %2161 = vmatprep.subr.bf16.mxu1 %v2375_v13  ;;  %v2303_v25 = vld [vmem:[%s2547_s19] sm:$0xff]   ;;  %s2848_s19 = scalar_lea.vmem %s2790_s5, %s2512_s20  ;;  %s2379_s27 = smov 104   ;;  %vm1357_vm7 = vcmask 31744   ;;  %vm1556_vm8 = vcmask 130048   ;;  %vm1558_vm9 = vcmask 195584   ;;  %vm1769_vm10 = vcmask 523264  }
  0x3e   : > { %2155 = vmatprep.mubr.msk.bf16.mxu0 %vm2376_vm2, %v2375_v13  ;;  %2163 = vmatprep.mubr.msk.bf16.mxu1 %vm2376_vm2, %v2375_v13  ;;  %v2070_v28 = vld [vmem:[%s2848_s19] ss:$0 sm:$0xff]  ;;  %s2852_s6 = sld [smem:[#allocation9_spill]]  ;;  %s2380_s8 = smov 8  }
  0x3f   : > { %v2078_v51 = vld [vmem:[%s2851_s17] ss:$0 sm:$0xff]  ;;  %s2853_s25 = sld [smem:[#allocation18_spill]]  ;;  %s2855_s15 = sld [smem:[#allocation19_spill]] }
  0x40   : > { %v2598_v4 = vld [vmem:[#allocation2] sm:$0xf]  ;;  %2154 = vmatpush3.bf16.msra.mxu0 %v2301_v14  ;;  %2162 = vmatpush3.bf16.msra.mxu1 %v2302_v15  ;;  %s2846_s24 = scalar_lea.vmem %s2845_s21, %s2512_s20  ;;  %s2381_s21 = smov 16  }
  0x41   : > { %v858_v5 = vsel %vm857_vm1, %v2598_v4, 0.0  ;;  %2167 = vmatprep.subr.bf16.mxu0 %v2375_v13  ;;  %2175 = vmatprep.subr.bf16.mxu1 %v2375_v13  ;;  %v2068_v20 = vld [vmem:[%s2846_s24] ss:$0 sm:$0xff]  ;;  %s2850_s26 = scalar_lea.vmem %s2849_s1, %s2512_s20  ;;  %s2382_s24 = smov 24  }
  0x42   : > { %859 = vadd.xlane.f32.xlu0 %v858_v5  ;;  %v2074_v29 = vld [vmem:[%s2850_s26] ss:$0 sm:$0xff] }
  0x45   : > { %s2854_s29 = scalar_lea.vmem %s2853_s25, %s2512_s20  ;;  %s2856_s23 = scalar_lea.vmem %s2855_s15, %s2512_s20 }
  0xcf   : > { %v860_v6 = vpop.xlane.xlu0 %859 }
  0xd0   : > { %v862_v7 = vmul.f32 0.03125, %v860_v6 }
  0xd2   : > { %v863_v8 = vsub.f32 %v2598_v4, %v862_v7 }
  0xd4   : > { %v864_v9 = vmul.f32 %v863_v8, %v863_v8 }
  0xd6   : > { %v865_v10 = vsel %vm857_vm1, %v864_v9, 0.0 }
  0xd7   : > { %866 = vadd.xlane.f32.xlu0 %v865_v10 }
 0x164   : > { %v867_v16 = vpop.xlane.xlu0 %866 }
 0x165   : > { %v868_v17 = vmul.f32 0.03125, %v867_v16 }
 0x167   : > { %v869_v18 = vadd.f32 1e-05, %v868_v17 }
 0x169   : > { %2313 = vrsqrt.f32 %v869_v18 }
 0x173   : > { %v2314_v19 = vpop.eup %2313 }
 0x174   : > { %v871_v21 = vmul.f32 %v2314_v19, %v863_v8 }
 0x176   : > { %v878_v23 = vmul.f32 %v2068_v20, %v871_v21 }
 0x178   : > { %v885_v24 = vadd.f32 %v2069_v22, %v878_v23 }
 0x17a   : > { %v886_v26 = vpack.c.bf16 %v885_v24, %v885_v24 }
 0x17c   : > { %2156 = vmatmul.mubr.msk.bf16.vlgmr.msra.gmra.mrb[0].mxu0 %vm910_vm3, %v886_v26  ;;  %2164 = vmatmul.mubr.msk.bf16.vlgmr.msra.gmra.mrb[0].mxu1 %vm910_vm3, %v886_v26 }
 0x17d   : > { %2168 = vmatpush3.bf16.msra.mxu0 %v2303_v25  ;;  %2171 = vmatprep.mubr.msk.bf16.mxu0 %vm2376_vm2, %v2375_v13 }
 0x17e   : > { %2169 = vmatprep.subr.bf16.mxu0 %v2375_v13  ;;  %2177 = vmatprep.mubr.msk.bf16.mxu1 %vm2376_vm2, %v2375_v13 }
 0x181   : > { %2170 = vmatpush3.bf16.msra.mxu0 %v2304_v27 }
 0x182   : > { %2181 = vmatprep.subr.bf16.mxu0 %v2375_v13 }
 0x184   : > { %2172 = vmatmul.mubr.msk.bf16.vlgmr.msra.gmra.mrb[4].mxu0 %vm910_vm3, %v886_v26 }
 0x185   : > { %2183 = vmatprep.mubr.msk.bf16.mxu0 %vm2376_vm2, %v2375_v13 }
 0x24f   : > { %v948_v30 = vpop.f32.mrb[0].mxu0  ;;  %v1012_v31 = vpop.f32.mrb[0].mxu1 }
 0x250   : > { %v949_v32 = vadd.f32 %v2070_v28, %v948_v30  ;;  %v1013_v33 = vadd.f32 %v2074_v29, %v1012_v31  ;;  %v2157_v34 = vpop.f32.mrb[1].mxu0  ;;  %v2165_v35 = vpop.f32.mrb[1].mxu1 }
 0x251   : > { %v951_v36 = vpop.f32.mrb[2].mxu0  ;;  %v1015_v37 = vpop.f32.mrb[2].mxu1 }
 0x252   : > { %v954_v38 = vmul.f32 0.35355338, %v949_v32  ;;  %1096 = vrot.lane.b32.xlu1 %v1013_v33, %s2377_s0  ;;  %v2158_v39 = vpop.f32.mrb[3].mxu0  ;;  %v2166_v40 = vpop.f32.mrb[3].mxu1  ;;  %v1105_v41 = vpack.c.bf16 %v1013_v33, %v1013_v33 }
 0x254   : > { %1082 = vrot.lane.b32.xlu0 %v954_v38, %s2377_s0  ;;  %v1128_v42 = vsel %vm1123_vm4, %v1105_v41, 0  ;;  %v1091_v46 = vpack.c.bf16 %v954_v38, %v954_v38 }
 0x255   : > { %2176 = vmatpush3.bf16.xpose.msra.mxu1 %v1128_v42 }
 0x256   : > { %1099 = vrot.lane.b32.xlu1 %v1013_v33, %s2378_s30  ;;  %2187 = vmatprep.subr.bf16.mxu1 %v2375_v13 }
 0x257   : > { %v1075_v43 = vpop.f32.mrb[4].mxu0 }
 0x258   : > { %v2173_v44 = vpop.f32.mrb[5].mxu0  ;;  %v2669_v55 = vadd.f32 %v2078_v51, %v1075_v43 }
 0x259   : > { %v1078_v45 = vpop.f32.mrb[6].mxu0 }
 0x25a   : > { %1102 = vrot.lane.b32.xlu1 %v1013_v33, %s2379_s27  ;;  %v2174_v47 = vpop.f32.mrb[7].mxu0  ;;  %v1119_v61 = vpack.c.bf16 %v2669_v55, %v2669_v55 }
 0x25c   : > { %2178 = vmatmul.mubr.msk.bf16.vlgmr.msra.gmra.mrb[4].mxu1 %vm1123_vm4, %v1091_v46  ;;  %v1363_v0 = vsel %vm1361_vm5, %v1119_v61, 0 }
 0x25d   : > { %2189 = vmatprep.mubr.msk.bf16.mxu1 %vm2376_vm2, %v2375_v13 }
 0x25e   : > { %1085 = vrot.lane.b32.xlu1 %v954_v38, %s2378_s30 }
 0x262   : > { %1088 = vrot.lane.b32.xlu1 %v954_v38, %s2379_s27 }
 0x2c4   : > { %v1097_v48 = vpop.permute.xlu1 %1096 }
 0x2c5   : > { %v1106_v49 = vpack.c.bf16 %v1097_v48, %v1097_v48 }
 0x2c6   : > { %v1083_v54 = vpop.permute.xlu0 %1082 }
 0x2c7   : > { %v1174_v50 = vsel %vm1123_vm4, %v1106_v49, 0  ;;  %v1092_v58 = vpack.c.bf16 %v1083_v54, %v1083_v54 }
 0x2c8   : > { %v1100_v52 = vpop.permute.xlu1 %1099  ;;  %2182 = vmatpush3.bf16.xpose.msra.mxu0 %v1174_v50 }
 0x2c9   : > { %v1107_v53 = vpack.c.bf16 %v1100_v52, %v1100_v52  ;;  %2193 = vmatprep.subr.bf16.mxu0 %v2375_v13 }
 0x2cb   : > { %v1220_v56 = vsel %vm1123_vm4, %v1107_v53, 0 }
 0x2cc   : > { %v1103_v57 = vpop.permute.xlu1 %1102  ;;  %2188 = vmatpush3.bf16.xpose.msra.mxu1 %v1220_v56 }
 0x2cd   : > { %v1108_v59 = vpack.c.bf16 %v1103_v57, %v1103_v57  ;;  %2199 = vmatprep.subr.bf16.mxu1 %v2375_v13 }
 0x2cf   : > { %v1266_v60 = vsel %vm1123_vm4, %v1108_v59, 0  ;;  %2184 = vmatmul.mubr.msk.bf16.vlgmr.msra.gmra.mrb[8].mxu0 %vm1123_vm4, %v1092_v58 }
 0x2d0   : > { %v1086_v62 = vpop.permute.xlu1 %1085  ;;  %2194 = vmatpush3.bf16.xpose.msra.mxu0 %v1266_v60  ;;  %2195 = vmatprep.mubr.msk.bf16.mxu0 %vm2376_vm2, %v2375_v13 }
 0x2d1   : > { %v1093_v63 = vpack.c.bf16 %v1086_v62, %v1086_v62  ;;  %2205 = vmatprep.subr.bf16.mxu0 %v2375_v13 }
 0x2d3   : > { %2190 = vmatmul.mubr.msk.bf16.vlgmr.msra.gmra.mrb[8].mxu1 %vm1123_vm4, %v1093_v63 }
 0x2d4   : > { %v1089_v1 = vpop.permute.xlu1 %1088  ;;  %2200 = vmatpush3.bf16.msra.mxu1 %v1363_v0  ;;  %2201 = vmatprep.mubr.msk.bf16.mxu1 %vm2376_vm2, %v2375_v13 }
 0x2d5   : > { %v1094_v2 = vpack.c.bf16 %v1089_v1, %v1089_v1  ;;  %2211 = vmatprep.subr.bf16.mxu1 %v2375_v13 }
 0x2d7   : > { %2196 = vmatmul.mubr.msk.bf16.vlgmr.msra.gmra.mrb[12].mxu0 %vm1123_vm4, %v1094_v2 }
 0x2d8   : > { %2207 = vmatprep.mubr.msk.bf16.mxu0 %vm2376_vm2, %v2375_v13 }
 0x32f   : > { %v1164_v3 = vpop.f32.mrb[4].mxu1 }
 0x330   : > { %v2179_v5 = vpop.f32.mrb[5].mxu1  ;;  %v1309_v6 = vsel %vm1308_vm6, %v1164_v3, -inf }
 0x331   : > { %1310 = vmax.xlane.f32.xlu1 %v1309_v6  ;;  %v1167_v7 = vpop.f32.mrb[6].mxu1 }
 0x332   : > { %v2180_v8 = vpop.f32.mrb[7].mxu1 }
 0x3a2   : > { %v1210_v9 = vpop.f32.mrb[8].mxu0 }
 0x3a3   : > { %v2185_v10 = vpop.f32.mrb[9].mxu0  ;;  %v1312_v11 = vsel %vm1308_vm6, %v1210_v9, -inf }
 0x3a4   : > { %1313 = vmax.xlane.f32.xlu0 %v1312_v11  ;;  %v1213_v12 = vpop.f32.mrb[10].mxu0  ;;  %v2305_v11 = vld [vmem:[%s2852_s6] sm:$0xff]  }
 0x3a5   : > { %v2186_v14 = vpop.f32.mrb[11].mxu0 }
 0x3a6   : > { %v1256_v15 = vpop.f32.mrb[8].mxu1 }
 0x3a7   : > { %v2191_v16 = vpop.f32.mrb[9].mxu1  ;;  %v1315_v17 = vsel %vm1308_vm6, %v1256_v15, -inf }
 0x3a8   : > { %1316 = vmax.xlane.f32.xlu1 %v1315_v17  ;;  %v1259_v18 = vpop.f32.mrb[10].mxu1 }
 0x3a9   : > { %v2192_v19 = vpop.f32.mrb[11].mxu1 }
 0x3aa   : > { %v1302_v20 = vpop.f32.mrb[12].mxu0 }
 0x3ab   : > { %v2197_v21 = vpop.f32.mrb[13].mxu0  ;;  %v1318_v22 = vsel %vm1308_vm6, %v1302_v20, -inf }
 0x3ac   : > { %1319 = vmax.xlane.f32.xlu1 %v1318_v22  ;;  %v1305_v23 = vpop.f32.mrb[14].mxu0  ;;  %v2306_v21 = vld [vmem:[%s2852_s6 + $0x8] sm:$0xff]  }
 0x3ad   : > { %v2198_v24 = vpop.f32.mrb[15].mxu0 }
 0x3be   : > { %v1311_v25 = vpop.xlane.xlu1 %1310 }
 0x3bf   : > { %v1321_v26 = vsub.f32 %v1164_v3, %v1311_v25 }
 0x3c1   : > { %v1325_v27 = vmul.f32 1.442695, %v1321_v26 }
 0x3c3   : > { %2315 = vpow2.f32 %v1325_v27 }
 0x3cd   : > { %v2316_v28 = vpop.eup %2315 }
 0x3ce   : > { %v1333_v29 = vsel %vm1308_vm6, %v2316_v28, 0.0 }
 0x3cf   : > { %1334 = vadd.xlane.f32.xlu0 %v1333_v29 }
 0x431   : > { %v1314_v30 = vpop.xlane.xlu0 %1313 }
 0x432   : > { %v1322_v31 = vsub.f32 %v1210_v9, %v1314_v30 }
 0x434   : > { %v1327_v32 = vmul.f32 1.442695, %v1322_v31 }
 0x435   : > { %v1317_v33 = vpop.xlane.xlu1 %1316 }
 0x436   : > { %2317 = vpow2.f32 %v1327_v32  ;;  %v1323_v34 = vsub.f32 %v1256_v15, %v1317_v33  ;;  %v2090_v33 = vld [vmem:[%s2854_s29] ss:$0 sm:$0xff] }
 0x438   : > { %v1329_v35 = vmul.f32 1.442695, %v1323_v34 }
 0x439   : > { %v1320_v41 = vpop.xlane.xlu1 %1319 }
 0x43a   : > { %2319 = vpow2.f32 %v1329_v35  ;;  %v1324_v42 = vsub.f32 %v1302_v20, %v1320_v41 }
 0x43c   : > { %v1331_v43 = vmul.f32 1.442695, %v1324_v42 }
 0x440   : > { %v2318_v36 = vpop.eup %2317 }
 0x441   : > { %v1336_v37 = vsel %vm1308_vm6, %v2318_v36, 0.0 }
 0x442   : > { %1337 = vadd.xlane.f32.xlu1 %v1336_v37 }
 0x444   : > { %v2320_v38 = vpop.eup %2319 }
 0x445   : > { %v1339_v39 = vsel %vm1308_vm6, %v2320_v38, 0.0 }
 0x446   : > { %1340 = vadd.xlane.f32.xlu0 %v1339_v39 }
 0x453   : > { %1113 = vrot.lane.b32.xlu1 %v2669_v55, %s2378_s30 }
 0x45c   : > { %1110 = vrot.lane.b32.xlu0 %v2669_v55, %s2377_s0  ;;  %v1335_v40 = vpop.xlane.xlu0 %1334  ;;  %s2857_s0 = scalar_lea.vmem %s2798_s13, %s2512_s20 }
 0x45d   : > { %2321 = vrcp.f32 %v1335_v40 }
 0x45e   : > { %2323 = vpow2.f32 %v1331_v43 }
 0x467   : > { %v2322_v44 = vpop.eup %2321 }
 0x468   : > { %v1349_v45 = vmul.f32 %v2322_v44, %v2316_v28  ;;  %v2324_v47 = vpop.eup %2323 }
 0x469   : > { %v1342_v48 = vsel %vm1308_vm6, %v2324_v47, 0.0 }
 0x46a   : > { %v1353_v46 = vpack.c.bf16 %v1349_v45, %v1349_v45 }
 0x46c   : > { %2202 = vmatmul.mubr.msk.bf16.vlgmr.msra.gmra.mrb[12].mxu1 %vm1357_vm7, %v1353_v46  ;;  %v2307_v46 = vld [vmem:[%s2573_s18] sm:$0xff]  }
 0x46d   : > { %2213 = vmatprep.mubr.msk.bf16.mxu1 %vm2376_vm2, %v2375_v13 }
 0x477   : > { %1343 = vadd.xlane.f32.xlu1 %v1342_v48 }
 0x488   : > { %1116 = vrot.lane.b32.xlu1 %v2669_v55, %s2379_s27 }
 0x4cf   : > { %v1338_v49 = vpop.xlane.xlu1 %1337 }
 0x4d0   : > { %2325 = vrcp.f32 %v1338_v49 }
 0x4d3   : > { %v1341_v50 = vpop.xlane.xlu0 %1340  ;;  %v1114_v51 = vpop.permute.xlu1 %1113 }
 0x4d4   : > { %2327 = vrcp.f32 %v1341_v50  ;;  %v1121_v52 = vpack.c.bf16 %v1114_v51, %v1114_v51  ;;  %v2094_v51 = vld [vmem:[%s2856_s23] ss:$0 sm:$0xff] }
 0x4d6   : > { %v1455_v53 = vsel %vm1361_vm5, %v1121_v52, 0 }
 0x4d7   : > { %v1111_v54 = vpop.permute.xlu0 %1110  ;;  %2212 = vmatpush3.bf16.msra.mxu1 %v1455_v53  ;;  %v2095_v53 = vld [vmem:[%s2857_s0] ss:$0 sm:$0xff] }
 0x4d8   : > { %v1120_v56 = vpack.c.bf16 %v1111_v54, %v1111_v54  ;;  %2223 = vmatprep.subr.bf16.mxu1 %v2375_v13 }
 0x4da   : > { %v2326_v57 = vpop.eup %2325  ;;  %v1409_v58 = vsel %vm1361_vm5, %v1120_v56, 0 }
 0x4db   : > { %v1350_v59 = vmul.f32 %v2326_v57, %v2318_v36  ;;  %2206 = vmatpush3.bf16.msra.mxu0 %v1409_v58  ;;  %v2309_v58 = vld [vmem:[%s2587_s12] sm:$0xff]  }
 0x4dc   : > { %2217 = vmatprep.subr.bf16.mxu0 %v2375_v13 }
 0x4dd   : > { %v1354_v55 = vpack.c.bf16 %v1350_v59, %v1350_v59  ;;  %v2310_v59 = vld [vmem:[%s2587_s12 + $0x8] sm:$0xff]  }
 0x4de   : > { %v2328_v60 = vpop.eup %2327 }
 0x4df   : > { %v1351_v61 = vmul.f32 %v2328_v60, %v2320_v38  ;;  %2208 = vmatmul.mubr.msk.bf16.vlgmr.msra.gmra.mrb[16].mxu0 %vm1357_vm7, %v1354_v55  ;;  %v2311_v55 = vld [vmem:[%s2587_s12 + $0x10] sm:$0xff]   ;;  %v2312_v60 = vld [vmem:[%s2587_s12 + $0x18] sm:$0xff]  }
 0x4e0   : > { %2219 = vmatprep.mubr.msk.bf16.mxu0 %vm2376_vm2, %v2375_v13 }
 0x4e1   : > { %v1355_v62 = vpack.c.bf16 %v1351_v61, %v1351_v61  ;;  %v2096_v61 = vld [vmem:[%s830_s10] ss:$0 sm:$0xff]  ;;  %s2860_s10 = sld [smem:[#allocation3_spill]] }
 0x4e3   : > { %2214 = vmatmul.mubr.msk.bf16.vlgmr.msra.gmra.mrb[16].mxu1 %vm1357_vm7, %v1355_v62 }
 0x4e4   : > { %2227 = vmatprep.mubr.msk.bf16.mxu1 %vm2376_vm2, %v2375_v13  ;;  %2224 = vmatpush3.bf16.msra.mxu1 %v2305_v11 }
 0x4e5   : > { %2225 = vmatprep.subr.bf16.mxu1 %v2375_v13 }
 0x4e7   : > { %p2106_p8 = scmp.ne.s32.totalorder %s2860_s10, 1 }
 0x4e8   : > { %2226 = vmatpush3.bf16.msra.mxu1 %v2306_v21  ;;  %vm1820_vm11 = vcmask (!%p2106_p8), 254976  }
 0x4e9   : > { %2239 = vmatprep.subr.bf16.mxu1 %v2375_v13 }
 0x504   : > { %v1344_v63 = vpop.xlane.xlu1 %1343 }
 0x505   : > { %2329 = vrcp.f32 %v1344_v63 }
 0x508   : > { %v1117_v0 = vpop.permute.xlu1 %1116 }
 0x509   : > { %v1122_v1 = vpack.c.bf16 %v1117_v0, %v1117_v0 }
 0x50b   : > { %v1501_v2 = vsel %vm1361_vm5, %v1122_v1, 0 }
 0x50c   : > { %2218 = vmatpush3.bf16.msra.mxu0 %v1501_v2 }
 0x50d   : > { %2231 = vmatprep.subr.bf16.mxu0 %v2375_v13 }
 0x50f   : > { %v2330_v3 = vpop.eup %2329 }
 0x510   : > { %v1352_v5 = vmul.f32 %v2330_v3, %v2324_v47  ;;  %v2308_v47 = vld [vmem:[%s2573_s18 + $0x8] sm:$0xff]  }
 0x512   : > { %v1356_v6 = vpack.c.bf16 %v1352_v5, %v1352_v5 }
 0x514   : > { %2220 = vmatmul.mubr.msk.bf16.vlgmr.msra.gmra.mrb[20].mxu0 %vm1357_vm7, %v1356_v6 }
 0x515   : > { %2235 = vmatprep.mubr.msk.bf16.mxu0 %vm2376_vm2, %v2375_v13  ;;  %2232 = vmatpush3.bf16.msra.mxu0 %v2307_v46 }
 0x516   : > { %2233 = vmatprep.subr.bf16.mxu0 %v2375_v13 }
 0x519   : > { %2234 = vmatpush3.bf16.msra.mxu0 %v2308_v47 }
 0x53f   : > { %v1399_v7 = vpop.f32.mrb[12].mxu1 }
 0x540   : > { %v2203_v8 = vpop.f32.mrb[13].mxu1 }
 0x541   : > { %v1402_v9 = vpop.f32.mrb[14].mxu1 }
 0x542   : > { %v2204_v10 = vpop.f32.mrb[15].mxu1  ;;  %v2100_v9 = vld [vmem:[%s838_s11] ss:$0 sm:$0xff] }
 0x5b2   : > { %v1445_v12 = vpop.f32.mrb[16].mxu0 }
 0x5b3   : > { %1544 = vrot.lane.b32.xlu0 %v1445_v12, %s2380_s8  ;;  %v2209_v14 = vpop.f32.mrb[17].mxu0 }
 0x5b4   : > { %v1448_v15 = vpop.f32.mrb[18].mxu0 }
 0x5b5   : > { %v2210_v16 = vpop.f32.mrb[19].mxu0 }
 0x5b6   : > { %v1491_v17 = vpop.f32.mrb[16].mxu1 }
 0x5b7   : > { %1548 = vrot.lane.b32.xlu1 %v1491_v17, %s2381_s21  ;;  %v2215_v18 = vpop.f32.mrb[17].mxu1 }
 0x5b8   : > { %v1494_v19 = vpop.f32.mrb[18].mxu1 }
 0x5b9   : > { %v2216_v20 = vpop.f32.mrb[19].mxu1 }
 0x5e7   : > { %v1537_v22 = vpop.f32.mrb[20].mxu0 }
 0x5e8   : > { %1552 = vrot.lane.b32.xlu0 %v1537_v22, %s2382_s24  ;;  %v2221_v23 = vpop.f32.mrb[21].mxu0 }
 0x5e9   : > { %v1540_v24 = vpop.f32.mrb[22].mxu0 }
 0x5ea   : > { %v2222_v25 = vpop.f32.mrb[23].mxu0 }
 0x625   : > { %v1545_v26 = vpop.permute.xlu0 %1544 }
 0x626   : > { %v1555_v28 = vsel %vm1123_vm4, %v1399_v7, %v1545_v26 }
 0x629   : > { %v1549_v27 = vpop.permute.xlu1 %1548 }
 0x62a   : > { %v1557_v29 = vsel %vm1556_vm8, %v1555_v28, %v1549_v27 }
 0x65a   : > { %v1553_v30 = vpop.permute.xlu0 %1552 }
 0x65b   : > { %v1559_v31 = vsel %vm1558_vm9, %v1557_v29, %v1553_v30 }
 0x65c   : > { %v1560_v32 = vpack.c.bf16 %v1559_v31, %v1559_v31 }
 0x65e   : > { %2228 = vmatmul.mubr.msk.bf16.vlgmr.msra.gmra.mrb[20].mxu1 %vm910_vm3, %v1560_v32 }
 0x65f   : > { %2247 = vmatprep.mubr.msk.bf16.mxu1 %vm2376_vm2, %v2375_v13  ;;  %2240 = vmatpush3.bf16.msra.mxu1 %v2309_v58 }
 0x660   : > { %2241 = vmatprep.subr.bf16.mxu1 %v2375_v13 }
 0x663   : > { %2242 = vmatpush3.bf16.msra.mxu1 %v2310_v59 }
 0x664   : > { %2243 = vmatprep.subr.bf16.mxu1 %v2375_v13 }
 0x667   : > { %2244 = vmatpush3.bf16.msra.mxu1 %v2311_v55 }
 0x668   : > { %2245 = vmatprep.subr.bf16.mxu1 %v2375_v13 }
 0x66b   : > { %2246 = vmatpush3.bf16.msra.mxu1 %v2312_v60 }
 0x731   : > { %v1621_v34 = vpop.f32.mrb[20].mxu1 }
 0x732   : > { %v1622_v35 = vadd.f32 %v2090_v33, %v1621_v34  ;;  %v2229_v36 = vpop.f32.mrb[21].mxu1 }
 0x733   : > { %v1624_v37 = vpop.f32.mrb[22].mxu1 }
 0x734   : > { %v1627_v38 = vadd.f32 %v1622_v35, %v2598_v4  ;;  %v2230_v39 = vpop.f32.mrb[23].mxu1 }
 0x736   : > { %v1630_v40 = vsel %vm857_vm1, %v1627_v38, 0.0 }
 0x737   : > { %1631 = vadd.xlane.f32.xlu1 %v1630_v40 }
 0x7c4   : > { %v1632_v41 = vpop.xlane.xlu1 %1631 }
 0x7c5   : > { %v1633_v42 = vmul.f32 0.03125, %v1632_v41 }
 0x7c7   : > { %v1634_v43 = vsub.f32 %v1627_v38, %v1633_v42 }
 0x7c9   : > { %v1635_v44 = vmul.f32 %v1634_v43, %v1634_v43 }
 0x7cb   : > { %v1636_v45 = vsel %vm857_vm1, %v1635_v44, 0.0 }
 0x7cc   : > { %1637 = vadd.xlane.f32.xlu0 %v1636_v45 }
 0x859   : > { %v1638_v4 = vpop.xlane.xlu0 %1637 }
 0x85a   : > { %v1639_v48 = vmul.f32 0.03125, %v1638_v4 }
 0x85c   : > { %v1640_v49 = vadd.f32 1e-05, %v1639_v48 }
 0x85e   : > { %2331 = vrsqrt.f32 %v1640_v49 }
 0x868   : > { %v2332_v50 = vpop.eup %2331 }
 0x869   : > { %v1642_v52 = vmul.f32 %v2332_v50, %v1634_v43 }
 0x86b   : > { %v1649_v54 = vmul.f32 %v2094_v51, %v1642_v52 }
 0x86d   : > { %v1656_v56 = vadd.f32 %v2095_v53, %v1649_v54 }
 0x86f   : > { %v1657_v57 = vpack.c.bf16 %v1656_v56, %v1656_v56 }
 0x871   : > { %2236 = vmatmul.mubr.msk.bf16.vlgmr.msra.gmra.mrb[24].mxu0 %vm910_vm3, %v1657_v57 }
 0x944   : > { %v1718_v62 = vpop.f32.mrb[24].mxu0 }
 0x945   : > { %v1719_v63 = vadd.f32 %v2096_v61, %v1718_v62  ;;  %v2237_v0 = vpop.f32.mrb[25].mxu0 }
 0x946   : > { %v1721_v1 = vpop.f32.mrb[26].mxu0 }
 0x947   : > { %v1725_v2 = vmul.f32 0.70710677, %v1719_v63  ;;  %v2238_v3 = vpop.f32.mrb[27].mxu0  ;;  %v1724_v6 = vmul.f32 0.5, %v1719_v63 }
 0x949   : > { %2333 = verf.f32 %v1725_v2 }
 0x953   : > { %v2334_v5 = vpop.eup %2333 }
 0x954   : > { %v1727_v7 = vadd.f32 1.0, %v2334_v5 }
 0x956   : > { %v1728_v8 = vmul.f32 %v1727_v7, %v1724_v6 }
 0x958   : > { %v1729_v13 = vpack.c.bf16 %v1728_v8, %v1728_v8 }
 0x95a   : > { %2248 = vmatmul.mubr.msk.bf16.vlgmr.msra.gmra.mrb[24].mxu1 %vm1769_vm10, %v1729_v13 }
 0xa2c   : > { %1818 = sbr.rel (%p2106_p8) target bundleno = 2613 (0xa35), region = 100 }
 0xa2d   : > { %v1807_v10 = vpop.f32.mrb[24].mxu1 }
 0xa2e   : > { %v1808_v11 = vadd.f32 %v2100_v9, %v1807_v10  ;;  %v2249_v12 = vpop.f32.mrb[25].mxu1 }
 0xa2f   : > { %v1810_v14 = vpop.f32.mrb[26].mxu1 }
 0xa30   : > { %v1813_v15 = vadd.f32 %v1808_v11, %v1627_v38  ;;  %v2250_v16 = vpop.f32.mrb[27].mxu1 }
 0xa32   : > { %1814 = vst.msk [vmem:[#allocation2] sm:$0xf] %vm857_vm1, %v1813_v15  ;;  %v1819_v17 = vpack.c.bf16 (!%p2106_p8), %v1813_v15, %v1813_v15 }
 0xa34   : > { %1821 = vst.msk [vmem:[%s2592_s7] sm:$0x3] %vm1820_vm11, %v1819_v17 }
 0xa35 PF: > { %s2861_s17 = sld [smem:[#allocation6_spill]]  ;;  %s2862_s27 = sld [smem:[#allocation4_spill]] }
 0xa36   : > { %s2863_s28 = sld [smem:[#allocation5_spill]]  ;;  %s2864_s29 = sld [smem:[#allocation7_spill]] }
 0xa37   : > { %s2865_s30 = sld [smem:[#allocation8_spill]] }
 0xa3b   : > { %s28_s0 = sadd.s32 1, %s2861_s17  }
 0xa3c   : > { %p25_p9 = scmp.ge.s32.totalorder %s28_s0, 6  }
 0xa3e   :  { %27 = sbr.rel (!%p25_p9) target bundleno = 15 (0xf), region = 178 }

</bundles_post_ra>
